<compile_context>
chip_gen: v7x
topology: tpu7x:2x2x1
jax: 0.10.0
libtpu: 0.0.40
codegen_flags: <defaults>
</compile_context>

<pallas_src>
import math
import functools

import jax
import jax.numpy as jnp
from jax.experimental import pallas as pl
from jax.experimental.pallas import tpu as pltpu


def _round_up(v: int, m: int) -> int:
    return ((v + m - 1) // m) * m


def _memory_unit_kernel(x_ref, w_ref, wt_ref, out_good_ref, out_bad_ref, att_ref,
                        *, shrink_thres: float, mem_dim: int,
                        use_bf16_matmul: bool, epsilon: float = 1e-12):
    x = x_ref[...]                        # (TN, F)      streamed row tile
    w = w_ref[...]                        # (M_pad, F)   resident in VMEM, single copy
    wt = wt_ref[...]                      # (F, M_pad)   resident in VMEM, single copy

    # bf16 MXU operands only when explicitly requested (numerics gate);
    # accumulation stays f32 either way.
    mx_dtype = jnp.bfloat16 if use_bf16_matmul else w.dtype

    # logits = x @ W.T via the pre-transposed resident W^T (no per-step
    # transpose of the weight block inside the kernel).
    logits = jnp.dot(x.astype(mx_dtype), wt.astype(mx_dtype),
                     preferred_element_type=jnp.float32)         # (TN, M_pad) f32

    m_pad = logits.shape[1]
    if mem_dim != m_pad:
        # Mask out padded memory slots so the softmax ignores them.
        valid = jax.lax.broadcasted_iota(jnp.int32, (1, m_pad), 1) < mem_dim
        logits = jnp.where(valid, logits, jnp.float32(-1e30))

    # Softmax in f32 (divides lowered to reciprocals; exact to hold tolerance).
    row_max = jnp.max(logits, axis=1, keepdims=True)
    e = jnp.exp(logits - row_max)
    denom = jnp.sum(e, axis=1, keepdims=True)
    att_bad = e * pl.reciprocal(denom, approx=False)             # (TN, M_pad)

    if shrink_thres > 0:
        # hard_shrink_relu: relu(a - lambd) * a / (|a - lambd| + eps).
        # For shifted <= 0 the result is exactly 0, so one where suffices;
        # the untaken (possibly huge) branch is discarded by the select.
        shifted = att_bad - shrink_thres
        num = att_bad * shifted * pl.reciprocal(shifted + epsilon, approx=False)
        att_good = jnp.where(shifted > 0, num, 0.0)
        # F.normalize(p=1, dim=1): a / max(||a||_1, eps); att_good >= 0 so no abs.
        l1 = jnp.sum(att_good, axis=1, keepdims=True)
        att_good = att_good * pl.reciprocal(jnp.maximum(l1, epsilon), approx=False)
    else:
        att_good = att_bad

    # Two back-to-back matmuls sharing the stationary RHS W (no sublane concat
    # / slicing of (TN, M_pad) tiles).
    w_mx = w.astype(mx_dtype)
    out_good_ref[...] = jnp.dot(att_good.astype(mx_dtype), w_mx,
                                preferred_element_type=jnp.float32
                                ).astype(out_good_ref.dtype)
    out_bad_ref[...] = jnp.dot(att_bad.astype(mx_dtype), w_mx,
                               preferred_element_type=jnp.float32
                               ).astype(out_bad_ref.dtype)
    att_ref[...] = att_good.astype(att_ref.dtype)


def memory_unit_forward(x, weight, shrink_thres: float = 0.0025, *,
                        row_tile: int | None = None,
                        use_bf16_matmul: bool = False):
    """x: (rows, fea_dim), weight: (mem_dim, fea_dim). Returns dict like MemoryUnit."""
    rows, fea_dim = x.shape
    mem_dim, fea_dim_w = weight.shape
    assert fea_dim == fea_dim_w

    # Feature axis: keep unpadded.  Blocks whose last dim equals the full array
    # extent are exempt from the 128-lane rule, and padding a small C (e.g. 4)
    # to 128 would inflate HBM traffic for x and both outputs by ~32x.
    f_b = fea_dim
    # Memory axis: pad to a lane-dense multiple of 128 (padded slots are masked
    # before the softmax and sliced off afterwards).
    m_pad = _round_up(mem_dim, 128)

    itemsize = x.dtype.itemsize

    # Per-generation VMEM budget (64 MiB/TC on v7x, 128 MiB on v5e/v6e).
    try:
        phys_vmem = int(pltpu.get_tpu_info().vmem_capacity_bytes)
    except Exception:
        phys_vmem = 64 * 2 ** 20
    vmem_cap = max(min(phys_vmem - 8 * 2 ** 20, 100 * 2 ** 20), 24 * 2 ** 20)

    # Resident weights: W and W^T, each a single (non-pipelined) VMEM copy.
    resident = 2 * m_pad * f_b * itemsize

    def vmem_estimate(tn):
        # Double-buffered streamed IO: x tile + 2 output tiles + att tile.
        io = 2 * (3 * tn * f_b + tn * m_pad) * itemsize
        # In-kernel f32 intermediates (logits/exp/att_bad/att_good + out temps).
        temps = (4 * tn * m_pad + 2 * tn * f_b) * 4
        return int(1.25 * (io + temps + resident)) + (2 << 20)

    rows8 = _round_up(rows, 8)
    if row_tile is not None:
        tn = _round_up(min(row_tile, rows8), 8)
    else:
        # Biggest row tile that fits the per-core budget (bigger tiles amortize
        # per-grid-step overhead and raise streaming efficiency).
        tn = 8
        for cand in (1024, 768, 512, 384, 256, 128, 64, 32, 16, 8):
            if cand <= rows8 and vmem_estimate(cand) <= vmem_cap:
                tn = cand
                break
    rows_pad = _round_up(rows, tn)

    xp = x if rows_pad == rows else jnp.pad(x, ((0, rows_pad - rows), (0, 0)))
    wp = weight if m_pad == mem_dim else jnp.pad(weight, ((0, m_pad - mem_dim), (0, 0)))
    wtp = jnp.transpose(wp)       # (f_b, m_pad): transposed once, outside the kernel

    grid = (rows_pad // tn,)
    kernel = functools.partial(_memory_unit_kernel,
                               shrink_thres=float(shrink_thres),
                               mem_dim=mem_dim,
                               use_bf16_matmul=use_bf16_matmul)

    # Advisory cost estimate for XLA's scheduler.
    flops = 2 * rows_pad * m_pad * f_b * 3            # logits + 2 output matmuls
    bytes_accessed = (rows_pad * f_b * 3 + 2 * m_pad * f_b + rows_pad * m_pad) * itemsize
    cost = pl.CostEstimate(flops=flops,
                           transcendentals=rows_pad * m_pad,
                           bytes_accessed=bytes_accessed)

    out_good, out_bad, att = pl.pallas_call(
        kernel,
        out_shape=(
            jax.ShapeDtypeStruct((rows_pad, f_b), x.dtype),     # output_good
            jax.ShapeDtypeStruct((rows_pad, f_b), x.dtype),     # output_bad
            jax.ShapeDtypeStruct((rows_pad, m_pad), x.dtype),   # att
        ),
        grid_spec=pl.GridSpec(
            grid=grid,
            in_specs=[
                pl.BlockSpec((tn, f_b), lambda i: (i, 0)),                   # x row tile
                pl.BlockSpec(memory_space=pltpu.MemorySpace.VMEM),           # W (resident)
                pl.BlockSpec(memory_space=pltpu.MemorySpace.VMEM),           # W^T (resident)
            ],
            out_specs=[
                pl.BlockSpec((tn, f_b), lambda i: (i, 0)),
                pl.BlockSpec((tn, f_b), lambda i: (i, 0)),
                pl.BlockSpec((tn, m_pad), lambda i: (i, 0)),
            ],
        ),
        compiler_params=pltpu.CompilerParams(
            dimension_semantics=("parallel",),      # row tiles shard across TCs on v7x
            vmem_limit_bytes=int(vmem_cap)),
        cost_estimate=cost,
    )(xp, wp, wtp)

    return {
        'output_good': out_good[:rows, :fea_dim],
        'output_bad': out_bad[:rows, :fea_dim],
        'att': att[:rows, :mem_dim],
    }


def mem_module_forward(inp, weight, shrink_thres: float = 0.0025, *,
                       use_bf16_matmul: bool = False):
    """inp: (N, C, H, W) with C == fea_dim; weight: (mem_dim, fea_dim)."""
    # TODO(synk): an NHWC end-to-end variant (and an in-kernel att reduction
    # for losses that only need a scalar of att) would avoid the layout
    # transposes and the large (rows, mem_dim) att writeback.
    n, c, h, w_sp = inp.shape
    mem_dim = weight.shape[0]

    x2d = jnp.transpose(inp, (0, 2, 3, 1)).reshape(-1, c)        # (N*H*W, C)
    res = memory_unit_forward(x2d, weight, shrink_thres,
                              use_bf16_matmul=use_bf16_matmul)

    def to_nchw(a, last):
        return jnp.transpose(a.reshape(n, h, w_sp, last), (0, 3, 1, 2))

    y_good = jnp.concatenate([to_nchw(res['output_good'], c), inp], axis=1)
    y_bad = jnp.concatenate([to_nchw(res['output_bad'], c), inp], axis=1)
    att = to_nchw(res['att'], mem_dim)
    return {'output_good': y_good, 'output_bad': y_bad, 'att': att}


if __name__ == "__main__":
    # Small 4-D shapes consistent with MemModule.forward: (N, C, H, W), C == fea_dim.
    N, C, H, W = 2, 4, 16, 16
    MEM_DIM, FEA_DIM = 64, C
    SHRINK_THRES = 0.0025

    key = jax.random.PRNGKey(0)
    kx, kw = jax.random.split(key)

    # Deterministic init matching reset_parameters(): U(-stdv, stdv), stdv = 1/sqrt(fea_dim)
    stdv = 1.0 / math.sqrt(FEA_DIM)
    weight = jax.random.uniform(kw, (MEM_DIM, FEA_DIM), jnp.float32,
                                minval=-stdv, maxval=stdv)
    inp = jax.random.normal(kx, (N, C, H, W), jnp.float32)

    out = mem_module_forward(inp, weight, shrink_thres=SHRINK_THRES)
    jax.block_until_ready(out)

    # Pure-JAX reference of the full MemModule forward.
    x2d = jnp.transpose(inp, (0, 2, 3, 1)).reshape(-1, FEA_DIM)
    logits = x2d @ weight.T
    att_bad_ref = jax.nn.softmax(logits, axis=1)
    shifted = att_bad_ref - SHRINK_THRES
    att_good_ref = jnp.maximum(shifted, 0.0) * att_bad_ref / (jnp.abs(shifted) + 1e-12)
    att_good_ref = att_good_ref / jnp.maximum(
        jnp.sum(jnp.abs(att_good_ref), axis=1, keepdims=True), 1e-12)
    out_good_ref = att_good_ref @ weight
    out_bad_ref = att_bad_ref @ weight

    def to_nchw_ref(a, last):
        return jnp.transpose(a.reshape(N, H, W, last), (0, 3, 1, 2))

    ref = {
        'output_good': jnp.concatenate([to_nchw_ref(out_good_ref, C), inp], axis=1),
        'output_bad': jnp.concatenate([to_nchw_ref(out_bad_ref, C), inp], axis=1),
        'att': to_nchw_ref(att_good_ref, MEM_DIM),
    }
    for k in ref:
        assert out[k].shape == ref[k].shape, f"shape mismatch in {k}"
        assert jnp.allclose(out[k], ref[k], atol=1e-5, rtol=1e-5), f"mismatch in {k}"

    print("KERNEL_OK")
</pallas_src>

<mosaic_0001>
module attributes {stable_mosaic.version = 11 : i64} {
  func.func @_memory_unit_kernel(%arg0: i32, %arg1: memref<512x4xf32, #tpu.memory_space<vmem>>, %arg2: memref<128x4xf32, #tpu.memory_space<vmem>>, %arg3: memref<4x128xf32, #tpu.memory_space<vmem>>, %arg4: memref<512x4xf32, #tpu.memory_space<vmem>>, %arg5: memref<512x4xf32, #tpu.memory_space<vmem>>, %arg6: memref<512x128xf32, #tpu.memory_space<vmem>>) attributes {dimension_semantics = [#tpu.dimension_semantics<parallel>], iteration_bounds = array<i64: 1>, scalar_prefetch = 0 : i64, scratch_operands = 0 : i64, tpu.core_type = #tpu.core_type<tc>, window_params = [{transform_indices = @transform_0, window_bounds = array<i64: 512, 4>}, {pipeline_mode = #tpu.pipeline_mode<synchronous>, transform_indices = @transform_1, window_bounds = array<i64: 128, 4>}, {pipeline_mode = #tpu.pipeline_mode<synchronous>, transform_indices = @transform_2, window_bounds = array<i64: 4, 128>}, {transform_indices = @transform_3, window_bounds = array<i64: 512, 4>}, {transform_indices = @transform_4, window_bounds = array<i64: 512, 4>}, {transform_indices = @transform_5, window_bounds = array<i64: 512, 128>}]} {
    %c0 = arith.constant 0 : index
    %c0_0 = arith.constant 0 : index
    %0 = vector.load %arg1[%c0, %c0_0] : memref<512x4xf32, #tpu.memory_space<vmem>>, vector<512x4xf32>
    %c0_1 = arith.constant 0 : index
    %c0_2 = arith.constant 0 : index
    %1 = vector.load %arg2[%c0_1, %c0_2] : memref<128x4xf32, #tpu.memory_space<vmem>>, vector<128x4xf32>
    %c0_3 = arith.constant 0 : index
    %c0_4 = arith.constant 0 : index
    %2 = vector.load %arg3[%c0_3, %c0_4] : memref<4x128xf32, #tpu.memory_space<vmem>>, vector<4x128xf32>
    %cst = arith.constant dense<0.000000e+00> : vector<512x128xf32>
    %3 = tpu.matmul %0, %2, %cst {dimension_numbers = #tpu.dot_dimension_numbers<[1], [0], [0], [1], [0, 0, 1, 1], [], []>} : vector<512x4xf32>, vector<4x128xf32>, vector<512x128xf32> -> vector<512x128xf32>
    %4 = tpu.iota {dimensions = array<i32: 1>} : vector<1x128xi32>
    %c64_i32 = arith.constant 64 : i32
    %5 = vector.broadcast %c64_i32 : i32 to vector<1x128xi32>
    %6 = arith.cmpi slt, %4, %5 : vector<1x128xi32>
    %cst_5 = arith.constant -1.000000e+30 : f32
    %7 = vector.shape_cast %6 : vector<1x128xi1> to vector<1x128xi1>
    %8 = vector.broadcast %7 : vector<1x128xi1> to vector<512x128xi1>
    %9 = vector.broadcast %cst_5 : f32 to vector<512x128xf32>
    %10 = arith.select %8, %3, %9 : vector<512x128xi1>, vector<512x128xf32>
    %cst_6 = arith.constant dense<0xFF800000> : vector<512xf32>
    %11 = vector.multi_reduction <maximumf>, %10, %cst_6 [1] : vector<512x128xf32> to vector<512xf32>
    %12 = vector.shape_cast %11 : vector<512xf32> to vector<512x1xf32>
    %13 = vector.broadcast %12 : vector<512x1xf32> to vector<512x128xf32>
    %14 = arith.subf %10, %13 : vector<512x128xf32>
    %15 = math.exp %14 : vector<512x128xf32>
    %cst_7 = arith.constant dense<0.000000e+00> : vector<512xf32>
    %16 = vector.multi_reduction <add>, %15, %cst_7 [1] : vector<512x128xf32> to vector<512xf32>
    %17 = vector.shape_cast %16 : vector<512xf32> to vector<512x1xf32>
    %18 = tpu.reciprocal %17 : vector<512x1xf32> -> vector<512x1xf32>
    %19 = vector.broadcast %18 : vector<512x1xf32> to vector<512x128xf32>
    %20 = arith.mulf %15, %19 : vector<512x128xf32>
    %cst_8 = arith.constant 2.500000e-03 : f32
    %21 = vector.broadcast %cst_8 : f32 to vector<512x128xf32>
    %22 = arith.subf %20, %21 : vector<512x128xf32>
    %23 = arith.mulf %20, %22 : vector<512x128xf32>
    %cst_9 = arith.constant 9.99999996E-13 : f32
    %24 = vector.broadcast %cst_9 : f32 to vector<512x128xf32>
    %25 = arith.addf %22, %24 : vector<512x128xf32>
    %26 = tpu.reciprocal %25 : vector<512x128xf32> -> vector<512x128xf32>
    %27 = arith.mulf %23, %26 : vector<512x128xf32>
    %cst_10 = arith.constant 0.000000e+00 : f32
    %28 = vector.broadcast %cst_10 : f32 to vector<512x128xf32>
    %29 = arith.cmpf ogt, %22, %28 : vector<512x128xf32>
    %cst_11 = arith.constant 0.000000e+00 : f32
    %30 = vector.broadcast %cst_11 : f32 to vector<512x128xf32>
    %31 = arith.select %29, %27, %30 : vector<512x128xi1>, vector<512x128xf32>
    %cst_12 = arith.constant dense<0.000000e+00> : vector<512xf32>
    %32 = vector.multi_reduction <add>, %31, %cst_12 [1] : vector<512x128xf32> to vector<512xf32>
    %33 = vector.shape_cast %32 : vector<512xf32> to vector<512x1xf32>
    %cst_13 = arith.constant 9.99999996E-13 : f32
    %34 = vector.broadcast %cst_13 : f32 to vector<512x1xf32>
    %35 = arith.maximumf %33, %34 : vector<512x1xf32>
    %36 = tpu.reciprocal %35 : vector<512x1xf32> -> vector<512x1xf32>
    %37 = vector.broadcast %36 : vector<512x1xf32> to vector<512x128xf32>
    %38 = arith.mulf %31, %37 : vector<512x128xf32>
    %cst_14 = arith.constant dense<0.000000e+00> : vector<512x4xf32>
    %39 = tpu.matmul %38, %1, %cst_14 {dimension_numbers = #tpu.dot_dimension_numbers<[1], [0], [0], [1], [0, 0, 1, 1], [], []>} : vector<512x128xf32>, vector<128x4xf32>, vector<512x4xf32> -> vector<512x4xf32>
    %c0_15 = arith.constant 0 : index
    %c0_16 = arith.constant 0 : index
    %40 = vector.load %arg4[%c0_15, %c0_16] : memref<512x4xf32, #tpu.memory_space<vmem>>, vector<512x4xf32>
    tpu.vector_store %arg4[%c0_15, %c0_16], %39 {strides = array<i32>} : memref<512x4xf32, #tpu.memory_space<vmem>>, vector<512x4xf32>,
    %cst_17 = arith.constant dense<0.000000e+00> : vector<512x4xf32>
    %41 = tpu.matmul %20, %1, %cst_17 {dimension_numbers = #tpu.dot_dimension_numbers<[1], [0], [0], [1], [0, 0, 1, 1], [], []>} : vector<512x128xf32>, vector<128x4xf32>, vector<512x4xf32> -> vector<512x4xf32>
    %c0_18 = arith.constant 0 : index
    %c0_19 = arith.constant 0 : index
    %42 = vector.load %arg5[%c0_18, %c0_19] : memref<512x4xf32, #tpu.memory_space<vmem>>, vector<512x4xf32>
    tpu.vector_store %arg5[%c0_18, %c0_19], %41 {strides = array<i32>} : memref<512x4xf32, #tpu.memory_space<vmem>>, vector<512x4xf32>,
    %c0_20 = arith.constant 0 : index
    %c0_21 = arith.constant 0 : index
    %43 = vector.load %arg6[%c0_20, %c0_21] : memref<512x128xf32, #tpu.memory_space<vmem>>, vector<512x128xf32>
    tpu.vector_store %arg6[%c0_20, %c0_21], %38 {strides = array<i32>} : memref<512x128xf32, #tpu.memory_space<vmem>>, vector<512x128xf32>,
    return
  }
  func.func @transform_0(%arg0: i32) -> (i32, i32) {
    %c0_i32 = arith.constant 0 : i32
    %c0_i32_0 = arith.constant 0 : i32
    return %arg0, %c0_i32 : i32, i32
  }
  func.func @transform_1(%arg0: i32) -> (i32, i32) {
    %c0_i32 = arith.constant 0 : i32
    %c0_i32_0 = arith.constant 0 : i32
    %c0_i32_1 = arith.constant 0 : i32
    return %c0_i32, %c0_i32_0 : i32, i32
  }
  func.func @transform_2(%arg0: i32) -> (i32, i32) {
    %c0_i32 = arith.constant 0 : i32
    %c0_i32_0 = arith.constant 0 : i32
    %c0_i32_1 = arith.constant 0 : i32
    return %c0_i32, %c0_i32_0 : i32, i32
  }
  func.func @transform_3(%arg0: i32) -> (i32, i32) {
    %c0_i32 = arith.constant 0 : i32
    %c0_i32_0 = arith.constant 0 : i32
    return %arg0, %c0_i32 : i32, i32
  }
  func.func @transform_4(%arg0: i32) -> (i32, i32) {
    %c0_i32 = arith.constant 0 : i32
    %c0_i32_0 = arith.constant 0 : i32
    return %arg0, %c0_i32 : i32, i32
  }
  func.func @transform_5(%arg0: i32) -> (i32, i32) {
    %c0_i32 = arith.constant 0 : i32
    %c0_i32_0 = arith.constant 0 : i32
    return %arg0, %c0_i32 : i32, i32
  }
}

</mosaic_0001>

<bundles_post_ra>
// kernel: tpu_custom_call.1
= control target key start
LH: loop header
LB: loop body
LE: loop exit
PB: predicated region body
PF: predicated region fallthrough
CT: control target
= control target key end

     0   :  { %vm292_vm0 = vcmask 1043456   ;;  %vm99_vm1 = vcmask 31744   ;;  %s6858_s0 = inlined_call_operand.vmem [shape: f32[512,4], index: 0, kind: input, shape index: {}]   ;;  %s6859_s1 = inlined_call_operand.vmem [shape: f32[128,4], index: 1, kind: input, shape index: {}]   ;;  %s6860_s2 = inlined_call_operand.vmem [shape: f32[4,128], index: 2, kind: input, shape index: {}]   ;;  %s6861_s3 = inlined_call_operand.vmem [shape: f32[512,4], index: 3, kind: output, shape index: {0}]   ;;  %s6862_s4 = inlined_call_operand.vmem [shape: f32[512,4], index: 4, kind: output, shape index: {1}]   ;;  %s6863_s5 = inlined_call_operand.hbm [shape: f32[512,128], index: 5, kind: output, shape index: {2}]  }
   0x1   :  { %v98_v0 = vld [vmem:[%s6860_s2] sm:$0xf]  ;;  %v19_v3 = vld [vmem:[%s6858_s0 + $0x8] sm:$0xff]  ;;  %v20_v5 = vld [vmem:[%s6858_s0 + $0x10] sm:$0xff] }
   0x2   :  { %v18_v1 = vld [vmem:[%s6858_s0] sm:$0xff]  ;;  %3434 = vmatprep.subr.msk.mxu0 %vm292_vm0, %v98_v0  ;;  %3852 = vmatprep.subr.msk.mxu1 %vm292_vm0, %v98_v0  ;;  %v51_v4 = vld [vmem:[%s6858_s0 + $0x108] sm:$0xff]  ;;  %v52_v6 = vld [vmem:[%s6858_s0 + $0x110] sm:$0xff] }
   0x3   :  { %v50_v2 = vld [vmem:[%s6858_s0 + $0x100] sm:$0xff]  ;;  %3435 = vmatpush3.msk.msra.mxu0 %vm292_vm0, %v98_v0  ;;  %3853 = vmatpush3.msk.msra.mxu1 %vm292_vm0, %v98_v0  ;;  %v21_v7 = vld [vmem:[%s6858_s0 + $0x18] sm:$0xff]  ;;  %v23_v11 = vld [vmem:[%s6858_s0 + $0x28] sm:$0xff] }
   0x4   :  { %3436 = vmatprep.mubr.msk.f32.mxu0 %vm99_vm1, %v18_v1  ;;  %3484 = vmatprep.mubr.msk.f32.mxu1 %vm99_vm1, %v50_v2  ;;  %v53_v8 = vld [vmem:[%s6858_s0 + $0x118] sm:$0xff]  ;;  %v22_v9 = vld [vmem:[%s6858_s0 + $0x20] sm:$0xff]  ;;  %v55_v12 = vld [vmem:[%s6858_s0 + $0x128] sm:$0xff] }
   0x5   :  { %3437 = vmatmul.mubr.msk.f32.vlgmr.msra.gmra.mrb[0].mxu0 %vm99_vm1, %v19_v3  ;;  %3485 = vmatmul.mubr.msk.f32.vlgmr.msra.gmra.mrb[0].mxu1 %vm99_vm1, %v51_v4  ;;  %v54_v10 = vld [vmem:[%s6858_s0 + $0x120] sm:$0xff]  ;;  %v24_v13 = vld [vmem:[%s6858_s0 + $0x30] sm:$0xff]  ;;  %v25_v15 = vld [vmem:[%s6858_s0 + $0x38] sm:$0xff] }
   0x6   :  { %3439 = vmatprep.mubr.msk.f32.mxu0 %vm99_vm1, %v20_v5  ;;  %3487 = vmatprep.mubr.msk.f32.mxu1 %vm99_vm1, %v52_v6  ;;  %v56_v14 = vld [vmem:[%s6858_s0 + $0x130] sm:$0xff]  ;;  %v57_v16 = vld [vmem:[%s6858_s0 + $0x138] sm:$0xff]  ;;  %v26_v17 = vld [vmem:[%s6858_s0 + $0x40] sm:$0xff] }
   0x7   :  { %v58_v18 = vld [vmem:[%s6858_s0 + $0x140] sm:$0xff]  ;;  %v27_v19 = vld [vmem:[%s6858_s0 + $0x48] sm:$0xff]  ;;  %v28_v21 = vld [vmem:[%s6858_s0 + $0x50] sm:$0xff] }
   0x8   :  { %v59_v20 = vld [vmem:[%s6858_s0 + $0x148] sm:$0xff]  ;;  %v60_v22 = vld [vmem:[%s6858_s0 + $0x150] sm:$0xff]  ;;  %v29_v23 = vld [vmem:[%s6858_s0 + $0x58] sm:$0xff] }
   0x9   :  { %3440 = vmatmul.mubr.msk.f32.gmra.mrb[2].mxu0 %vm99_vm1, %v21_v7  ;;  %3488 = vmatmul.mubr.msk.f32.gmra.mrb[2].mxu1 %vm99_vm1, %v53_v8  ;;  %v61_v24 = vld [vmem:[%s6858_s0 + $0x158] sm:$0xff] }
   0xa   :  { %3442 = vmatprep.mubr.msk.f32.mxu0 %vm99_vm1, %v22_v9  ;;  %3490 = vmatprep.mubr.msk.f32.mxu1 %vm99_vm1, %v54_v10 }
   0xd   :  { %3443 = vmatmul.mubr.msk.f32.gmra.mrb[4].mxu0 %vm99_vm1, %v23_v11  ;;  %3491 = vmatmul.mubr.msk.f32.gmra.mrb[4].mxu1 %vm99_vm1, %v55_v12 }
   0xe   :  { %3445 = vmatprep.mubr.msk.f32.mxu0 %vm99_vm1, %v24_v13  ;;  %3493 = vmatprep.mubr.msk.f32.mxu1 %vm99_vm1, %v56_v14 }
  0x11   :  { %3446 = vmatmul.mubr.msk.f32.gmra.mrb[6].mxu0 %vm99_vm1, %v25_v15  ;;  %3494 = vmatmul.mubr.msk.f32.gmra.mrb[6].mxu1 %vm99_vm1, %v57_v16 }
  0x12   :  { %3448 = vmatprep.mubr.msk.f32.mxu0 %vm99_vm1, %v26_v17  ;;  %3496 = vmatprep.mubr.msk.f32.mxu1 %vm99_vm1, %v58_v18 }
  0x15   :  { %3449 = vmatmul.mubr.msk.f32.gmra.mrb[8].mxu0 %vm99_vm1, %v27_v19  ;;  %3497 = vmatmul.mubr.msk.f32.gmra.mrb[8].mxu1 %vm99_vm1, %v59_v20 }
  0x16   :  { %3451 = vmatprep.mubr.msk.f32.mxu0 %vm99_vm1, %v28_v21  ;;  %3499 = vmatprep.mubr.msk.f32.mxu1 %vm99_vm1, %v60_v22 }
  0x17   :  { %11 = vsyncpa [#allocation3], 0  ;;  %v30_v25 = vld [vmem:[%s6858_s0 + $0x60] sm:$0xff]  ;;  %v31_v27 = vld [vmem:[%s6858_s0 + $0x68] sm:$0xff]  ;;  %v681_v1 = vlaneseq  ;;  %s4393_s29 = smov [#allocation2]  }
  0x18   :  { %v62_v26 = vld [vmem:[%s6858_s0 + $0x160] sm:$0xff]  ;;  %v63_v28 = vld [vmem:[%s6858_s0 + $0x168] sm:$0xff]  ;;  %v32_v29 = vld [vmem:[%s6858_s0 + $0x70] sm:$0xff]  ;;  %s3065_s30 = sshll.u32 %s4393_s29, 4  ;;  %s3066_s30 = int_to_ptr.vmem [resolvable:$true] %s3065_s30 }
  0x19   :  { %3452 = vmatmul.mubr.msk.f32.gmra.mrb[10].mxu0 %vm99_vm1, %v29_v23  ;;  %3500 = vmatmul.mubr.msk.f32.gmra.mrb[10].mxu1 %vm99_vm1, %v61_v24  ;;  %v64_v30 = vld [vmem:[%s6858_s0 + $0x170] sm:$0xff]  ;;  %v33_v31 = vld [vmem:[%s6858_s0 + $0x78] sm:$0xff]  ;;  %v34_v33 = vld [vmem:[%s6858_s0 + $0x80] sm:$0xff]  ;;  %v4685_v2 = vand.u32 127, %v681_v1  ;;  %s4369_s8 = scalar_lea.vmem %s3066_s30, 8192  ;;  %p4374_p1 = scmp.lt.s32.totalorder %s3066_s30, %s3066_s30 }
  0x1a   :  { %3454 = vmatprep.mubr.msk.f32.mxu0 %vm99_vm1, %v30_v25  ;;  %3502 = vmatprep.mubr.msk.f32.mxu1 %vm99_vm1, %v62_v26  ;;  %v65_v32 = vld [vmem:[%s6858_s0 + $0x178] sm:$0xff]  ;;  %v66_v34 = vld [vmem:[%s6858_s0 + $0x180] sm:$0xff]  ;;  %v35_v35 = vld [vmem:[%s6858_s0 + $0x88] sm:$0xff]  ;;  %p4370_p0 = scmp.ne.s32.totalorder %s3066_s30, %s4369_s8  ;;  %p4375_p2 = scmp.lt.s32.totalorder %s4369_s8, %s4369_s8 }
  0x1b   :  { %v67_v36 = vld [vmem:[%s6858_s0 + $0x188] sm:$0xff]  ;;  %v36_v37 = vld [vmem:[%s6858_s0 + $0x90] sm:$0xff]  ;;  %v37_v39 = vld [vmem:[%s6858_s0 + $0x98] sm:$0xff]  ;;  %vm683_vm2 = vcmp.lt.s32.totalorder %v4685_v2, 64 }
  0x1c   :  { %v68_v38 = vld [vmem:[%s6858_s0 + $0x190] sm:$0xff]  ;;  %v69_v40 = vld [vmem:[%s6858_s0 + $0x198] sm:$0xff]  ;;  %v38_v41 = vld [vmem:[%s6858_s0 + $0xa0] sm:$0xff]  ;;  %p4376_p3 = por %p4375_p2, %p4374_p1 }
  0x1d   :  { %3455 = vmatmul.mubr.msk.f32.gmra.mrb[12].mxu0 %vm99_vm1, %v31_v27  ;;  %3503 = vmatmul.mubr.msk.f32.gmra.mrb[12].mxu1 %vm99_vm1, %v63_v28  ;;  %v70_v42 = vld [vmem:[%s6858_s0 + $0x1a0] sm:$0xff]  ;;  %v39_v43 = vld [vmem:[%s6858_s0 + $0xa8] sm:$0xff]  ;;  %v40_v45 = vld [vmem:[%s6858_s0 + $0xb0] sm:$0xff] }
  0x1e   :  { %3457 = vmatprep.mubr.msk.f32.mxu0 %vm99_vm1, %v32_v29  ;;  %3505 = vmatprep.mubr.msk.f32.mxu1 %vm99_vm1, %v64_v30  ;;  %v71_v44 = vld [vmem:[%s6858_s0 + $0x1a8] sm:$0xff]  ;;  %v72_v46 = vld [vmem:[%s6858_s0 + $0x1b0] sm:$0xff]  ;;  %v41_v47 = vld [vmem:[%s6858_s0 + $0xb8] sm:$0xff]  ;;  %p4377_p4 = pnand %p4376_p3, %p4370_p0 }
  0x1f   :  { %v73_v48 = vld [vmem:[%s6858_s0 + $0x1b8] sm:$0xff]  ;;  %v42_v49 = vld [vmem:[%s6858_s0 + $0xc0] sm:$0xff]  ;;  %v43_v51 = vld [vmem:[%s6858_s0 + $0xc8] sm:$0xff] }
  0x20   :  { %v74_v50 = vld [vmem:[%s6858_s0 + $0x1c0] sm:$0xff]  ;;  %v75_v52 = vld [vmem:[%s6858_s0 + $0x1c8] sm:$0xff]  ;;  %v44_v53 = vld [vmem:[%s6858_s0 + $0xd0] sm:$0xff] }
  0x21   :  { %3458 = vmatmul.mubr.msk.f32.gmra.mrb[14].mxu0 %vm99_vm1, %v33_v31  ;;  %3506 = vmatmul.mubr.msk.f32.gmra.mrb[14].mxu1 %vm99_vm1, %v65_v32  ;;  %v76_v54 = vld [vmem:[%s6858_s0 + $0x1d0] sm:$0xff]  ;;  %v45_v55 = vld [vmem:[%s6858_s0 + $0xd8] sm:$0xff]  ;;  %v46_v57 = vld [vmem:[%s6858_s0 + $0xe0] sm:$0xff] }
  0x22   :  { %3460 = vmatprep.mubr.msk.f32.mxu0 %vm99_vm1, %v34_v33  ;;  %3508 = vmatprep.mubr.msk.f32.mxu1 %vm99_vm1, %v66_v34  ;;  %v77_v56 = vld [vmem:[%s6858_s0 + $0x1d8] sm:$0xff]  ;;  %v78_v58 = vld [vmem:[%s6858_s0 + $0x1e0] sm:$0xff]  ;;  %v47_v59 = vld [vmem:[%s6858_s0 + $0xe8] sm:$0xff] }
  0x23   :  { %v79_v60 = vld [vmem:[%s6858_s0 + $0x1e8] sm:$0xff]  ;;  %v48_v61 = vld [vmem:[%s6858_s0 + $0xf0] sm:$0xff]  ;;  %v49_v63 = vld [vmem:[%s6858_s0 + $0xf8] sm:$0xff] }
  0x24   :  { %v80_v62 = vld [vmem:[%s6858_s0 + $0x1f0] sm:$0xff]  ;;  %v81_v0 = vld [vmem:[%s6858_s0 + $0x1f8] sm:$0xff] }
  0x25   :  { %3461 = vmatmul.mubr.msk.f32.gmra.mrb[16].mxu0 %vm99_vm1, %v35_v35  ;;  %3509 = vmatmul.mubr.msk.f32.gmra.mrb[16].mxu1 %vm99_vm1, %v67_v36 }
  0x26   :  { %3463 = vmatprep.mubr.msk.f32.mxu0 %vm99_vm1, %v36_v37  ;;  %3511 = vmatprep.mubr.msk.f32.mxu1 %vm99_vm1, %v68_v38 }
  0x29   :  { %3464 = vmatmul.mubr.msk.f32.gmra.mrb[18].mxu0 %vm99_vm1, %v37_v39  ;;  %3512 = vmatmul.mubr.msk.f32.gmra.mrb[18].mxu1 %vm99_vm1, %v69_v40 }
  0x2a   :  { %3466 = vmatprep.mubr.msk.f32.mxu0 %vm99_vm1, %v38_v41  ;;  %3514 = vmatprep.mubr.msk.f32.mxu1 %vm99_vm1, %v70_v42 }
  0x2d   :  { %3467 = vmatmul.mubr.msk.f32.gmra.mrb[20].mxu0 %vm99_vm1, %v39_v43  ;;  %3515 = vmatmul.mubr.msk.f32.gmra.mrb[20].mxu1 %vm99_vm1, %v71_v44 }
  0x2e   :  { %3469 = vmatprep.mubr.msk.f32.mxu0 %vm99_vm1, %v40_v45  ;;  %3517 = vmatprep.mubr.msk.f32.mxu1 %vm99_vm1, %v72_v46 }
  0x31   :  { %3470 = vmatmul.mubr.msk.f32.gmra.mrb[22].mxu0 %vm99_vm1, %v41_v47  ;;  %3518 = vmatmul.mubr.msk.f32.gmra.mrb[22].mxu1 %vm99_vm1, %v73_v48 }
  0x32   :  { %3472 = vmatprep.mubr.msk.f32.mxu0 %vm99_vm1, %v42_v49  ;;  %3520 = vmatprep.mubr.msk.f32.mxu1 %vm99_vm1, %v74_v50 }
  0x35   :  { %3473 = vmatmul.mubr.msk.f32.gmra.mrb[24].mxu0 %vm99_vm1, %v43_v51  ;;  %3521 = vmatmul.mubr.msk.f32.gmra.mrb[24].mxu1 %vm99_vm1, %v75_v52 }
  0x36   :  { %3475 = vmatprep.mubr.msk.f32.mxu0 %vm99_vm1, %v44_v53  ;;  %3523 = vmatprep.mubr.msk.f32.mxu1 %vm99_vm1, %v76_v54 }
  0x39   :  { %3476 = vmatmul.mubr.msk.f32.gmra.mrb[26].mxu0 %vm99_vm1, %v45_v55  ;;  %3524 = vmatmul.mubr.msk.f32.gmra.mrb[26].mxu1 %vm99_vm1, %v77_v56 }
  0x3a   :  { %3478 = vmatprep.mubr.msk.f32.mxu0 %vm99_vm1, %v46_v57  ;;  %3526 = vmatprep.mubr.msk.f32.mxu1 %vm99_vm1, %v78_v58 }
  0x3d   :  { %3479 = vmatmul.mubr.msk.f32.gmra.mrb[28].mxu0 %vm99_vm1, %v47_v59  ;;  %3527 = vmatmul.mubr.msk.f32.gmra.mrb[28].mxu1 %vm99_vm1, %v79_v60 }
  0x3e   :  { %3481 = vmatprep.mubr.msk.f32.mxu0 %vm99_vm1, %v48_v61  ;;  %3529 = vmatprep.mubr.msk.f32.mxu1 %vm99_vm1, %v80_v62 }
  0x41   :  { %3482 = vmatmul.mubr.msk.f32.gmra.mrb[30].mxu0 %vm99_vm1, %v49_v63  ;;  %3530 = vmatmul.mubr.msk.f32.gmra.mrb[30].mxu1 %vm99_vm1, %v81_v0 }
  0xd8   :  { %v3438_v3 = vpop.f32.mrb[0].mxu0  ;;  %v3486_v4 = vpop.f32.mrb[0].mxu1 }
  0xd9   :  { %v362_v5 = vpop.f32.mrb[1].mxu0  ;;  %v522_v6 = vpop.f32.mrb[1].mxu1  ;;  %v4690_v7 = vsel %vm683_vm2, %v3486_v4, -1e+30  ;;  %v4694_v8 = vsel %vm683_vm2, %v3438_v3, -1e+30 }
  0xda   :  { %816 = vmax.xlane.f32.xlu1 %v4690_v7  ;;  %752 = vmax.xlane.f32.xlu0 %v4694_v8  ;;  %v4700_v12 = vsel %vm683_vm2, %v362_v5, -1e+30  ;;  %v4714_v18 = vsel %vm683_vm2, %v522_v6, -1e+30 }
  0xdc   :  { %v3441_v9 = vpop.f32.mrb[2].mxu0  ;;  %v3489_v10 = vpop.f32.mrb[2].mxu1 }
  0xdd   :  { %v372_v11 = vpop.f32.mrb[3].mxu0  ;;  %v4704_v13 = vsel %vm683_vm2, %v3441_v9, -1e+30  ;;  %v532_v14 = vpop.f32.mrb[3].mxu1  ;;  %v4710_v15 = vsel %vm683_vm2, %v3489_v10, -1e+30 }
  0xde   :  { %750 = vmax.xlane.f32.xlu0 %v4700_v12  ;;  %756 = vmax.xlane.f32.xlu1 %v4704_v13  ;;  %v4720_v23 = vsel %vm683_vm2, %v532_v14, -1e+30  ;;  %v4724_v24 = vsel %vm683_vm2, %v372_v11, -1e+30 }
  0xe0   :  { %v3444_v16 = vpop.f32.mrb[4].mxu0  ;;  %v3492_v17 = vpop.f32.mrb[4].mxu1 }
  0xe1   :  { %v382_v19 = vpop.f32.mrb[5].mxu0  ;;  %v542_v20 = vpop.f32.mrb[5].mxu1  ;;  %v4730_v27 = vsel %vm683_vm2, %v3444_v16, -1e+30  ;;  %v4740_v33 = vsel %vm683_vm2, %v3492_v17, -1e+30 }
  0xe2   :  { %814 = vmax.xlane.f32.xlu0 %v4714_v18  ;;  %820 = vmax.xlane.f32.xlu1 %v4710_v15  ;;  %v4734_v28 = vsel %vm683_vm2, %v382_v19, -1e+30  ;;  %v4744_v34 = vsel %vm683_vm2, %v542_v20, -1e+30 }
  0xe4   :  { %v3447_v21 = vpop.f32.mrb[6].mxu0  ;;  %v3495_v22 = vpop.f32.mrb[6].mxu1 }
  0xe5   :  { %v392_v25 = vpop.f32.mrb[7].mxu0  ;;  %v552_v26 = vpop.f32.mrb[7].mxu1  ;;  %v4750_v39 = vsel %vm683_vm2, %v3447_v21, -1e+30  ;;  %v4764_v45 = vsel %vm683_vm2, %v3495_v22, -1e+30 }
  0xe6   :  { %818 = vmax.xlane.f32.xlu0 %v4720_v23  ;;  %754 = vmax.xlane.f32.xlu1 %v4724_v24  ;;  %v4754_v40 = vsel %vm683_vm2, %v392_v25, -1e+30  ;;  %v4768_v46 = vsel %vm683_vm2, %v552_v26, -1e+30 }
  0xe8   :  { %v3450_v29 = vpop.f32.mrb[8].mxu0  ;;  %v3498_v30 = vpop.f32.mrb[8].mxu1 }
  0xe9   :  { %v402_v31 = vpop.f32.mrb[9].mxu0  ;;  %v562_v32 = vpop.f32.mrb[9].mxu1  ;;  %v4786_v53 = vsel %vm683_vm2, %v3450_v29, -1e+30  ;;  %v4810_v62 = vsel %vm683_vm2, %v3498_v30, -1e+30 }
  0xea   :  { %760 = vmax.xlane.f32.xlu1 %v4730_v27  ;;  %758 = vmax.xlane.f32.xlu0 %v4734_v28  ;;  %v4790_v54 = vsel %vm683_vm2, %v402_v31, -1e+30  ;;  %v4814_v63 = vsel %vm683_vm2, %v562_v32, -1e+30 }
  0xec   :  { %v3453_v35 = vpop.f32.mrb[10].mxu0  ;;  %v3501_v36 = vpop.f32.mrb[10].mxu1 }
  0xed   :  { %v412_v37 = vpop.f32.mrb[11].mxu0  ;;  %v572_v38 = vpop.f32.mrb[11].mxu1  ;;  %v4834_v10 = vsel %vm683_vm2, %v3453_v35, -1e+30  ;;  %v4860_v26 = vsel %vm683_vm2, %v3501_v36, -1e+30 }
  0xee   :  { %824 = vmax.xlane.f32.xlu1 %v4740_v33  ;;  %822 = vmax.xlane.f32.xlu0 %v4744_v34  ;;  %v4838_v11 = vsel %vm683_vm2, %v412_v37, -1e+30  ;;  %v4864_v29 = vsel %vm683_vm2, %v572_v38, -1e+30 }
  0xf0   :  { %v3456_v41 = vpop.f32.mrb[12].mxu0  ;;  %v4756_v42 = vpop.f32.mrb[12].mxu1 }
  0xf1   :  { %v422_v43 = vpop.f32.mrb[13].mxu0  ;;  %v4758_v44 = vpop.f32.mrb[13].mxu1 }
  0xf2   :  { %764 = vmax.xlane.f32.xlu1 %v4750_v39  ;;  %762 = vmax.xlane.f32.xlu0 %v4754_v40 }
  0xf4   :  { %v4770_v47 = vpop.f32.mrb[14].mxu0  ;;  %v3507_v48 = vpop.f32.mrb[14].mxu1 }
  0xf5   :  { %v4772_v49 = vpop.f32.mrb[15].mxu0  ;;  %v592_v50 = vpop.f32.mrb[15].mxu1  ;;  %v4776_v51 = vsel %vm683_vm2, %v3507_v48, -1e+30 }
  0xf6   :  { %828 = vmax.xlane.f32.xlu1 %v4764_v45  ;;  %826 = vmax.xlane.f32.xlu0 %v4768_v46  ;;  %v4782_v52 = vsel %vm683_vm2, %v592_v50, -1e+30  ;;  %v4886_v50 = vsel %vm683_vm2, %v3456_v41, -1e+30 }
  0xf8   :  { %v3462_v55 = vpop.f32.mrb[16].mxu0  ;;  %v3510_v56 = vpop.f32.mrb[16].mxu1 }
  0xf9   :  { %v4792_v57 = vpop.f32.mrb[17].mxu0  ;;  %v4796_v58 = vsel %vm683_vm2, %v3462_v55, -1e+30  ;;  %v602_v59 = vpop.f32.mrb[17].mxu1  ;;  %v4800_v60 = vsel %vm683_vm2, %v3510_v56, -1e+30 }
  0xfa   :  { %768 = vmax.xlane.f32.xlu1 %v4786_v53  ;;  %766 = vmax.xlane.f32.xlu0 %v4790_v54  ;;  %v4806_v61 = vsel %vm683_vm2, %v602_v59, -1e+30  ;;  %v4890_v55 = vsel %vm683_vm2, %v422_v43, -1e+30 }
  0xfb   :  { %6935 = vst [vmem:[#allocation10_spill] sm:$0xff] %v4890_v55 }
  0xfc   :  { %v3465_v0 = vpop.f32.mrb[18].mxu0  ;;  %v3513_v1 = vpop.f32.mrb[18].mxu1 }
  0xfd   :  { %v4816_v3 = vpop.f32.mrb[19].mxu0  ;;  %v4820_v4 = vsel %vm683_vm2, %v3465_v0, -1e+30  ;;  %v612_v5 = vpop.f32.mrb[19].mxu1  ;;  %v4824_v6 = vsel %vm683_vm2, %v3513_v1, -1e+30 }
  0xfe   :  { %832 = vmax.xlane.f32.xlu1 %v4810_v62  ;;  %830 = vmax.xlane.f32.xlu0 %v4814_v63  ;;  %v4830_v9 = vsel %vm683_vm2, %v612_v5, -1e+30 }
  0xff   :  { %6930 = vst [vmem:[#allocation5_spill] sm:$0xff] %v4830_v9 }
 0x100   :  { %v3468_v14 = vpop.f32.mrb[20].mxu0  ;;  %v3516_v16 = vpop.f32.mrb[20].mxu1 }
 0x101   :  { %v462_v17 = vpop.f32.mrb[21].mxu0  ;;  %v4842_v19 = vsel %vm683_vm2, %v3468_v14, -1e+30  ;;  %v622_v20 = vpop.f32.mrb[21].mxu1  ;;  %v4846_v21 = vsel %vm683_vm2, %v3516_v16, -1e+30 }
 0x102   :  { %6931 = vst [vmem:[#allocation6_spill] sm:$0xff] %v4846_v21  ;;  %772 = vmax.xlane.f32.xlu1 %v4834_v10  ;;  %770 = vmax.xlane.f32.xlu0 %v4838_v11  ;;  %v4852_v22 = vsel %vm683_vm2, %v462_v17, -1e+30  ;;  %v4856_v25 = vsel %vm683_vm2, %v622_v20, -1e+30 }
 0x103   :  { %6932 = vst [vmem:[#allocation7_spill] sm:$0xff] %v4856_v25  ;;  %v4913_v16 = vsel %vm683_vm2, %v4756_v42, -1e+30  ;;  %v4918_v17 = vsel %vm683_vm2, %v4772_v49, -1e+30 }
 0x104   :  { %v3471_v30 = vpop.f32.mrb[22].mxu0  ;;  %v3519_v31 = vpop.f32.mrb[22].mxu1  ;;  %6938 = vst [vmem:[#allocation13_spill] sm:$0xff] %v4913_v16  ;;  %6939 = vst [vmem:[#allocation14_spill] sm:$0xff] %v4918_v17 }
 0x105   :  { %v472_v32 = vpop.f32.mrb[23].mxu0  ;;  %v4868_v35 = vsel %vm683_vm2, %v3471_v30, -1e+30  ;;  %v632_v37 = vpop.f32.mrb[23].mxu1  ;;  %v4872_v48 = vsel %vm683_vm2, %v3519_v31, -1e+30 }
 0x106   :  { %6933 = vst [vmem:[#allocation8_spill] sm:$0xff] %v4872_v48  ;;  %836 = vmax.xlane.f32.xlu1 %v4860_v26  ;;  %834 = vmax.xlane.f32.xlu0 %v4864_v29  ;;  %v4878_v36 = vsel %vm683_vm2, %v472_v32, -1e+30  ;;  %v4882_v38 = vsel %vm683_vm2, %v632_v37, -1e+30 }
 0x107   :  { %6934 = vst [vmem:[#allocation9_spill] sm:$0xff] %v4882_v38 }
 0x108   :  { %v3474_v56 = vpop.f32.mrb[24].mxu0  ;;  %v3522_v59 = vpop.f32.mrb[24].mxu1 }
 0x109   :  { %v482_v0 = vpop.f32.mrb[25].mxu0  ;;  %v4894_v1 = vsel %vm683_vm2, %v3474_v56, -1e+30  ;;  %v642_v5 = vpop.f32.mrb[25].mxu1  ;;  %v4898_v14 = vsel %vm683_vm2, %v3522_v59, -1e+30 }
 0x10a   :  { %6936 = vst [vmem:[#allocation11_spill] sm:$0xff] %v4898_v14  ;;  %776 = vmax.xlane.f32.xlu1 %v4886_v50  ;;  %774 = vmax.xlane.f32.xlu0 %v4890_v55  ;;  %v4904_v41 = vsel %vm683_vm2, %v482_v0, -1e+30  ;;  %v4908_v43 = vsel %vm683_vm2, %v642_v5, -1e+30 }
 0x10b   :  { %6937 = vst [vmem:[#allocation12_spill] sm:$0xff] %v4908_v43  ;;  %v4941_v59 = vsel %vm683_vm2, %v4792_v57, -1e+30  ;;  %v4946_v0 = vsel %vm683_vm2, %v4758_v44, -1e+30 }
 0x10c   :  { %v3477_v20 = vpop.f32.mrb[26].mxu0  ;;  %v3525_v30 = vpop.f32.mrb[26].mxu1  ;;  %6941 = vst [vmem:[#allocation16_spill] sm:$0xff] %v4941_v59  ;;  %6942 = vst [vmem:[#allocation17_spill] sm:$0xff] %v4946_v0 }
 0x10d   :  { %v492_v31 = vpop.f32.mrb[27].mxu0  ;;  %v4922_v32 = vsel %vm683_vm2, %v3477_v20, -1e+30  ;;  %v652_v37 = vpop.f32.mrb[27].mxu1  ;;  %v4926_v56 = vsel %vm683_vm2, %v3525_v30, -1e+30 }
 0x10e   :  { %840 = vmax.xlane.f32.xlu1 %v4913_v16  ;;  %778 = vmax.xlane.f32.xlu0 %v4918_v17  ;;  %v4932_v42 = vsel %vm683_vm2, %v492_v31, -1e+30  ;;  %v4936_v49 = vsel %vm683_vm2, %v652_v37, -1e+30 }
 0x10f   :  { %6940 = vst [vmem:[#allocation15_spill] sm:$0xff] %v4936_v49 }
 0x110   :  { %v3480_v5 = vpop.f32.mrb[28].mxu0  ;;  %v3528_v20 = vpop.f32.mrb[28].mxu1 }
 0x111   :  { %v502_v30 = vpop.f32.mrb[29].mxu0  ;;  %v4950_v31 = vsel %vm683_vm2, %v3480_v5, -1e+30  ;;  %v662_v16 = vpop.f32.mrb[29].mxu1  ;;  %v4954_v37 = vsel %vm683_vm2, %v3528_v20, -1e+30 }
 0x112   :  { %838 = vmax.xlane.f32.xlu1 %v4946_v0  ;;  %782 = vmax.xlane.f32.xlu0 %v4941_v59  ;;  %v4960_v44 = vsel %vm683_vm2, %v502_v30, -1e+30  ;;  %v4964_v57 = vsel %vm683_vm2, %v662_v16, -1e+30  ;;  %v4969_v5 = vsel %vm683_vm2, %v4770_v47, -1e+30 }
 0x113   :  { %v4974_v20 = vsel %vm683_vm2, %v4816_v3, -1e+30 }
 0x114   :  { %v3483_v0 = vpop.f32.mrb[30].mxu0  ;;  %v3531_v59 = vpop.f32.mrb[30].mxu1 }
 0x115   :  { %v512_v17 = vpop.f32.mrb[31].mxu0  ;;  %v4978_v30 = vsel %vm683_vm2, %v3483_v0, -1e+30  ;;  %v4982_v16 = vsel %vm683_vm2, %v3531_v59, -1e+30  ;;  %v672_v55 = vpop.f32.mrb[31].mxu1 }
 0x116   :  { %780 = vmax.xlane.f32.xlu1 %v4969_v5  ;;  %786 = vmax.xlane.f32.xlu0 %v4974_v20  ;;  %v4988_v47 = vsel %vm683_vm2, %v512_v17, -1e+30  ;;  %v4992_v3 = vsel %vm683_vm2, %v672_v55, -1e+30 }
 0x11a   :  { %844 = vmax.xlane.f32.xlu1 %v4776_v51  ;;  %790 = vmax.xlane.f32.xlu0 %v4852_v22 }
 0x11e   :  { %842 = vmax.xlane.f32.xlu1 %v4782_v52  ;;  %794 = vmax.xlane.f32.xlu0 %v4878_v36 }
 0x122   :  { %784 = vmax.xlane.f32.xlu1 %v4796_v58  ;;  %798 = vmax.xlane.f32.xlu0 %v4904_v41 }
 0x126   :  { %848 = vmax.xlane.f32.xlu1 %v4800_v60  ;;  %802 = vmax.xlane.f32.xlu0 %v4932_v42 }
 0x12a   :  { %846 = vmax.xlane.f32.xlu1 %v4806_v61  ;;  %806 = vmax.xlane.f32.xlu0 %v4960_v44 }
 0x12e   :  { %788 = vmax.xlane.f32.xlu1 %v4820_v4  ;;  %810 = vmax.xlane.f32.xlu0 %v4988_v47 }
 0x132   :  { %852 = vmax.xlane.f32.xlu1 %v4824_v6 }
 0x136   :  { %850 = vmax.xlane.f32.xlu1 %v4830_v9 }
 0x13a   :  { %792 = vmax.xlane.f32.xlu1 %v4842_v19 }
 0x13e   :  { %856 = vmax.xlane.f32.xlu1 %v4846_v21 }
 0x142   :  { %854 = vmax.xlane.f32.xlu1 %v4856_v25 }
 0x146   :  { %796 = vmax.xlane.f32.xlu1 %v4868_v35 }
 0x14a   :  { %800 = vmax.xlane.f32.xlu1 %v4894_v1 }
 0x14e   :  { %804 = vmax.xlane.f32.xlu1 %v4922_v32 }
 0x152   :  { %808 = vmax.xlane.f32.xlu1 %v4950_v31 }
 0x156   :  { %812 = vmax.xlane.f32.xlu1 %v4978_v30 }
 0x15a   :  { %858 = vmax.xlane.f32.xlu1 %v4882_v38 }
 0x15e   :  { %860 = vmax.xlane.f32.xlu1 %v4872_v48 }
 0x162   :  { %862 = vmax.xlane.f32.xlu1 %v4908_v43 }
 0x166   :  { %864 = vmax.xlane.f32.xlu1 %v4898_v14 }
 0x167   :  { %v817_v2 = vpop.xlane.xlu1 %816  ;;  %v753_v55 = vpop.xlane.xlu0 %752 }
 0x168   :  { %v879_v17 = vsub.f32 %v4694_v8, %v753_v55  ;;  %v911_v48 = vsub.f32 %v4690_v7, %v817_v2  ;;  %v82_v7 = vld [vmem:[%s6859_s1] sm:$0xff] }
 0x16a   :  { %v944_v59 = vmul.f32 1.442695, %v879_v17  ;;  %866 = vmax.xlane.f32.xlu1 %v4936_v49  ;;  %v1008_v17 = vmul.f32 1.442695, %v911_v48 }
 0x16b   :  { %v751_v0 = vpop.xlane.xlu0 %750  ;;  %v757_v21 = vpop.xlane.xlu1 %756 }
 0x16c   :  { %v878_v25 = vsub.f32 %v4700_v12, %v751_v0  ;;  %3857 = vpow2.f32 %v944_v59  ;;  %v881_v8 = vsub.f32 %v4704_v13, %v757_v21  ;;  %v83_v13 = vld [vmem:[%s6859_s1 + $0x8] sm:$0xff] }
 0x16e   :  { %v942_v9 = vmul.f32 1.442695, %v878_v25  ;;  %868 = vmax.xlane.f32.xlu1 %v4926_v56  ;;  %v948_v25 = vmul.f32 1.442695, %v881_v8 }
 0x16f   :  { %v815_v43 = vpop.xlane.xlu0 %814  ;;  %v821_v38 = vpop.xlane.xlu1 %820 }
 0x170   :  { %3859 = vpow2.f32 %v942_v9  ;;  %v910_v14 = vsub.f32 %v4714_v18, %v815_v43  ;;  %v913_v49 = vsub.f32 %v4710_v15, %v821_v38  ;;  %v3788_v18 = vpack.c.bf16 %v83_v13, %v82_v7  ;;  %v85_v43 = vld [vmem:[%s6859_s1 + $0x18] sm:$0xff] }
 0x172   :  { %v1006_v55 = vmul.f32 1.442695, %v910_v14  ;;  %870 = vmax.xlane.f32.xlu1 %v4964_v57  ;;  %v1012_v15 = vmul.f32 1.442695, %v913_v49  ;;  %3821 = vmatprep.subr.bf16.mxu0 %v3788_v18  ;;  %v84_v14 = vld [vmem:[%s6859_s1 + $0x10] sm:$0xff] }
 0x173   :  { %v819_v12 = vpop.xlane.xlu0 %818  ;;  %v755_v59 = vpop.xlane.xlu1 %754  ;;  %3823 = vmatpush3.bf16.msra.mxu0 %v3788_v18  ;;  %3789 = vmatprep.subr.bf16.mxu1 %v3788_v18  ;;  %v3792_v2 = vpack.c.bf16 %v85_v43, %v84_v14 }
 0x174   :  { %3861 = vpow2.f32 %v1006_v55  ;;  %v880_v0 = vsub.f32 %v4724_v24, %v755_v59  ;;  %v912_v24 = vsub.f32 %v4720_v23, %v819_v12  ;;  %3791 = vmatpush3.bf16.msra.mxu1 %v3788_v18  ;;  %v86_v12 = vld [vmem:[%s6859_s1 + $0x20] sm:$0xff]  ;;  %v87_v59 = vld [vmem:[%s6859_s1 + $0x28] sm:$0xff] }
 0x175   :  { %3863 = vpow2.f32 %v1008_v17  ;;  %3825 = vmatprep.subr.bf16.mxu0 %v3792_v2  ;;  %3793 = vmatprep.subr.bf16.mxu1 %v3792_v2  ;;  %v3796_v7 = vpack.c.bf16 %v87_v59, %v86_v12 }
 0x176   :  { %872 = vmax.xlane.f32.xlu1 %v4954_v37  ;;  %v5037_v9 = vpop.eup %3857  ;;  %3865 = vpow2.f32 %v948_v25  ;;  %v946_v38 = vmul.f32 1.442695, %v880_v0  ;;  %v1010_v55 = vmul.f32 1.442695, %v912_v24  ;;  %v89_v24 = vld [vmem:[%s6859_s1 + $0x38] sm:$0xff] }
 0x177   :  { %v761_v21 = vpop.xlane.xlu1 %760  ;;  %v759_v48 = vpop.xlane.xlu0 %758  ;;  %1072 = vadd.xlane.f32.xlu0 %v5037_v9  ;;  %3867 = vpow2.f32 %v1012_v15  ;;  %3827 = vmatpush3.bf16.msra.mxu0 %v3792_v2 }
 0x178   :  { %3869 = vpow2.f32 %v946_v38  ;;  %v883_v17 = vsub.f32 %v4730_v27, %v761_v21  ;;  %3795 = vmatpush3.bf16.msra.mxu1 %v3792_v2  ;;  %3829 = vmatprep.subr.bf16.mxu0 %v3796_v7  ;;  %v882_v15 = vsub.f32 %v4734_v28, %v759_v48  ;;  %v88_v21 = vld [vmem:[%s6859_s1 + $0x30] sm:$0xff] }
 0x179   :  { %3797 = vmatprep.subr.bf16.mxu1 %v3796_v7  ;;  %v3800_v38 = vpack.c.bf16 %v89_v24, %v88_v21 }
 0x17a   :  { %v5047_v49 = vpop.eup %3859  ;;  %876 = vmax.xlane.f32.xlu1 %v4982_v16  ;;  %v952_v18 = vmul.f32 1.442695, %v883_v17  ;;  %v91_v17 = vld [vmem:[%s6859_s1 + $0x48] sm:$0xff] }
 0x17b   :  { %v825_v8 = vpop.xlane.xlu1 %824  ;;  %1070 = vadd.xlane.f32.xlu0 %v5047_v49  ;;  %v823_v0 = vpop.xlane.xlu0 %822  ;;  %3831 = vmatpush3.bf16.msra.mxu0 %v3796_v7 }
 0x17c   :  { %v915_v23 = vsub.f32 %v4740_v33, %v825_v8  ;;  %3799 = vmatpush3.bf16.msra.mxu1 %v3796_v7  ;;  %3833 = vmatprep.subr.bf16.mxu0 %v3800_v38  ;;  %v950_v8 = vmul.f32 1.442695, %v882_v15  ;;  %v92_v7 = vld [vmem:[%s6859_s1 + $0x50] sm:$0xff] }
 0x17d   :  { %3801 = vmatprep.subr.bf16.mxu1 %v3800_v38 }
 0x17e   :  { %v5059_v25 = vpop.eup %3861  ;;  %v1016_v33 = vmul.f32 1.442695, %v915_v23  ;;  %874 = vmax.xlane.f32.xlu1 %v4992_v3  ;;  %v914_v23 = vsub.f32 %v4744_v34, %v823_v0 }
 0x17f   :  { %v765_v13 = vpop.xlane.xlu1 %764  ;;  %1134 = vadd.xlane.f32.xlu0 %v5059_v25  ;;  %v5063_v27 = vpop.eup %3863  ;;  %3835 = vmatpush3.bf16.msra.mxu0 %v3800_v38 }
 0x180   :  { %3871 = vpow2.f32 %v1016_v33  ;;  %v5073_v14 = vpop.eup %3865  ;;  %v763_v2 = vpop.xlane.xlu0 %762  ;;  %3803 = vmatpush3.bf16.msra.mxu1 %v3800_v38  ;;  %v1014_v34 = vmul.f32 1.442695, %v914_v23  ;;  %v885_v0 = vsub.f32 %v4750_v39, %v765_v13  ;;  %v95_v23 = vld [vmem:[%s6859_s1 + $0x68] sm:$0xff] }
 0x181   :  { %3873 = vpow2.f32 %v1010_v55  ;;  %v5077_v48 = vpop.eup %3867  ;;  %v90_v55 = vld [vmem:[%s6859_s1 + $0x40] sm:$0xff] }
 0x182   :  { %1136 = vadd.xlane.f32.xlu1 %v5063_v27  ;;  %6943 = vst [vmem:[#allocation18_spill] sm:$0xff] %v5077_v48  ;;  %3875 = vpow2.f32 %v952_v18  ;;  %v3804_v12 = vpack.c.bf16 %v91_v17, %v90_v55  ;;  %v5087_v59 = vpop.eup %3869  ;;  %v93_v18 = vld [vmem:[%s6859_s1 + $0x58] sm:$0xff]  ;;  %v956_v13 = vmul.f32 1.442695, %v885_v0 }
 0x183   :  { %v829_v43 = vpop.xlane.xlu1 %828  ;;  %1076 = vadd.xlane.f32.xlu0 %v5073_v14  ;;  %v3808_v24 = vpack.c.bf16 %v93_v18, %v92_v7  ;;  %v97_v0 = vld [vmem:[%s6859_s1 + $0x78] sm:$0xff] }
 0x184   :  { %v917_v28 = vsub.f32 %v4764_v45, %v829_v43  ;;  %3837 = vmatprep.subr.bf16.mxu0 %v3804_v12  ;;  %3805 = vmatprep.subr.bf16.mxu1 %v3804_v12  ;;  %v827_v21 = vpop.xlane.xlu0 %826 }
 0x185   :  { %3839 = vmatpush3.bf16.msra.mxu0 %v3804_v12  ;;  %3807 = vmatpush3.bf16.msra.mxu1 %v3804_v12 }
 0x186   :  { %v1020_v45 = vmul.f32 1.442695, %v917_v28  ;;  %1140 = vadd.xlane.f32.xlu1 %v5077_v48  ;;  %3841 = vmatprep.subr.bf16.mxu0 %v3808_v24  ;;  %v884_v28 = vsub.f32 %v4754_v40, %v763_v2  ;;  %v916_v2 = vsub.f32 %v4768_v46, %v827_v21 }
 0x187   :  { %v5089_v33 = vpop.xlane.xlu1 %768  ;;  %1074 = vadd.xlane.f32.xlu0 %v5087_v59  ;;  %3809 = vmatprep.subr.bf16.mxu1 %v3808_v24 }
 0x188   :  { %3877 = vpow2.f32 %v1020_v45  ;;  %v767_v12 = vpop.xlane.xlu0 %766  ;;  %v954_v40 = vmul.f32 1.442695, %v884_v28  ;;  %v1018_v21 = vmul.f32 1.442695, %v916_v2 }
 0x189   :  { %3879 = vpow2.f32 %v950_v8  ;;  %3843 = vmatpush3.bf16.msra.mxu0 %v3808_v24  ;;  %v94_v8 = vld [vmem:[%s6859_s1 + $0x60] sm:$0xff]  ;;  %3811 = vmatpush3.bf16.msra.mxu1 %v3808_v24 }
 0x18a   :  { %v5099_v15 = vpop.eup %3871  ;;  %3881 = vpow2.f32 %v1014_v34  ;;  %v3812_v17 = vpack.c.bf16 %v95_v23, %v94_v8  ;;  %v96_v34 = vld [vmem:[%s6859_s1 + $0x70] sm:$0xff] }
 0x18b   :  { %6944 = vst [vmem:[#allocation19_spill] sm:$0xff] %v5099_v15  ;;  %v5101_v38 = vpop.eup %3873  ;;  %v833_v43 = vpop.xlane.xlu1 %832  ;;  %1144 = vadd.xlane.f32.xlu1 %v5099_v15  ;;  %v3816_v18 = vpack.c.bf16 %v97_v0, %v96_v34 }
 0x18c   :  { %6945 = vst [vmem:[#allocation20_spill] sm:$0xff] %v5101_v38  ;;  %v919_v39 = vsub.f32 %v4810_v62, %v833_v43  ;;  %1138 = vadd.xlane.f32.xlu0 %v5101_v38  ;;  %v5113_v62 = vpop.eup %3875  ;;  %3845 = vmatprep.subr.bf16.mxu0 %v3812_v17 }
 0x18d   :  { %3847 = vmatpush3.bf16.msra.mxu0 %v3812_v17  ;;  %3813 = vmatprep.subr.bf16.mxu1 %v3812_v17 }
 0x18e   :  { %v1024_v55 = vmul.f32 1.442695, %v919_v39  ;;  %3815 = vmatpush3.bf16.msra.mxu1 %v3812_v17  ;;  %3849 = vmatprep.subr.bf16.mxu0 %v3816_v18  ;;  %v887_v39 = vsub.f32 %v4786_v53, %v5089_v33 }
 0x18f   :  { %v773_v45 = vpop.xlane.xlu1 %772  ;;  %3817 = vmatprep.subr.bf16.mxu1 %v3816_v18 }
 0x190   :  { %3883 = vpow2.f32 %v1024_v55  ;;  %1080 = vadd.xlane.f32.xlu0 %v5113_v62  ;;  %v886_v55 = vsub.f32 %v4790_v54, %v767_v12  ;;  %v889_v12 = vsub.f32 %v4834_v10, %v773_v45 }
 0x191   :  { %3885 = vpow2.f32 %v956_v13  ;;  %3851 = vmatpush3.bf16.msra.mxu0 %v3816_v18  ;;  %v831_v13 = vpop.xlane.xlu0 %830 }
 0x192   :  { %v5123_v7 = vpop.eup %3877  ;;  %3887 = vpow2.f32 %v954_v40  ;;  %3819 = vmatpush3.bf16.msra.mxu1 %v3816_v18  ;;  %v958_v2 = vmul.f32 1.442695, %v886_v55  ;;  %v918_v34 = vsub.f32 %v4814_v63, %v831_v13  ;;  %v964_v63 = vmul.f32 1.442695, %v889_v12 }
 0x193   :  { %6946 = vst [vmem:[#allocation21_spill] sm:$0xff] %v5123_v7  ;;  %v5125_v24 = vpop.eup %3879  ;;  %v837_v43 = vpop.xlane.xlu1 %836  ;;  %1148 = vadd.xlane.f32.xlu1 %v5123_v7 }
 0x194   :  { %v921_v46 = vsub.f32 %v4860_v26, %v837_v43  ;;  %1078 = vadd.xlane.f32.xlu0 %v5125_v24  ;;  %v5132_v8 = vpop.eup %3881  ;;  %v960_v26 = vmul.f32 1.442695, %v887_v39  ;;  %v1022_v54 = vmul.f32 1.442695, %v918_v34 }
 0x195   :  { %6947 = vst [vmem:[#allocation22_spill] sm:$0xff] %v5132_v8  ;;  %v771_v33 = vpop.xlane.xlu0 %770 }
 0x196   :  { %v1028_v28 = vmul.f32 1.442695, %v921_v46  ;;  %v888_v13 = vsub.f32 %v4838_v11, %v771_v33 }
 0x197   :  { %v777_v23 = vpop.xlane.xlu1 %776 }
 0x198   :  { %3889 = vpow2.f32 %v1028_v28  ;;  %1142 = vadd.xlane.f32.xlu0 %v5132_v8  ;;  %v962_v10 = vmul.f32 1.442695, %v888_v13  ;;  %v891_v11 = vsub.f32 %v4886_v50, %v777_v23  ;;  %v6952_v13 = vld [vmem:[#allocation10_spill] sm:$0xff] }
 0x199   :  { %3891 = vpow2.f32 %v1018_v21  ;;  %v835_v46 = vpop.xlane.xlu0 %834 }
 0x19a   :  { %v5136_v17 = vpop.eup %3883  ;;  %3893 = vpow2.f32 %v960_v26  ;;  %v920_v45 = vsub.f32 %v4864_v29, %v835_v46 }
 0x19b   :  { %6948 = vst [vmem:[#allocation23_spill] sm:$0xff] %v5136_v17  ;;  %v5138_v40 = vpop.eup %3885  ;;  %v5140_v53 = vpop.xlane.xlu1 %840  ;;  %1152 = vadd.xlane.f32.xlu1 %v5136_v17  ;;  %3895 = vpow2.f32 %v958_v2 }
 0x19c   :  { %1084 = vadd.xlane.f32.xlu0 %v5138_v40  ;;  %v5145_v0 = vpop.eup %3887  ;;  %3897 = vpow2.f32 %v1022_v54  ;;  %v1026_v54 = vmul.f32 1.442695, %v920_v45 }
 0x19d   :  { %v775_v55 = vpop.xlane.xlu0 %774  ;;  %3899 = vpow2.f32 %v964_v63  ;;  %v968_v63 = vmul.f32 1.442695, %v891_v11 }
 0x19e   :  { %3901 = vpow2.f32 %v962_v10  ;;  %v890_v29 = vsub.f32 %v6952_v13, %v775_v55 }
 0x19f   :  { %v5147_v18 = vpop.xlane.xlu1 %838  ;;  %3903 = vpow2.f32 %v1026_v54  ;;  %v6953_v54 = vld [vmem:[#allocation14_spill] sm:$0xff] }
 0x1a0   :  { %1082 = vadd.xlane.f32.xlu0 %v5145_v0  ;;  %3905 = vpow2.f32 %v968_v63  ;;  %v966_v10 = vmul.f32 1.442695, %v890_v29 }
 0x1a1   :  { %v779_v33 = vpop.xlane.xlu0 %778 }
 0x1a2   :  { %v5151_v43 = vpop.eup %3889  ;;  %3907 = vpow2.f32 %v966_v10  ;;  %v892_v55 = vsub.f32 %v6953_v54, %v779_v33  ;;  %v6955_v33 = vld [vmem:[#allocation16_spill] sm:$0xff] }
 0x1a3   :  { %6949 = vst [vmem:[#allocation24_spill] sm:$0xff] %v5151_v43  ;;  %v5153_v21 = vpop.eup %3891  ;;  %v781_v39 = vpop.xlane.xlu1 %780  ;;  %1156 = vadd.xlane.f32.xlu1 %v5151_v43 }
 0x1a4   :  { %6950 = vst [vmem:[#allocation25_spill] sm:$0xff] %v5153_v21  ;;  %1146 = vadd.xlane.f32.xlu0 %v5153_v21  ;;  %v5158_v28 = vpop.eup %3893  ;;  %v893_v50 = vsub.f32 %v4969_v5, %v781_v39  ;;  %v970_v63 = vmul.f32 1.442695, %v892_v55 }
 0x1a5   :  { %v5164_v2 = vpop.eup %3895  ;;  %v783_v17 = vpop.xlane.xlu0 %782 }
 0x1a6   :  { %v5170_v12 = vpop.eup %3897  ;;  %v972_v11 = vmul.f32 1.442695, %v893_v50  ;;  %v894_v10 = vsub.f32 %v6955_v33, %v783_v17 }
 0x1a7   :  { %v5160_v26 = vpop.xlane.xlu1 %844  ;;  %6951 = vst [vmem:[#allocation26_spill] sm:$0xff] %v5170_v12  ;;  %v5174_v46 = vpop.eup %3899 }
 0x1a8   :  { %1088 = vadd.xlane.f32.xlu0 %v5158_v28  ;;  %v5180_v23 = vpop.eup %3901  ;;  %3909 = vpow2.f32 %v972_v11  ;;  %v974_v55 = vmul.f32 1.442695, %v894_v10 }
 0x1a9   :  { %v787_v13 = vpop.xlane.xlu0 %786  ;;  %3911 = vpow2.f32 %v970_v63 }
 0x1aa   :  { %v896_v17 = vsub.f32 %v4974_v20, %v787_v13 }
 0x1ab   :  { %v5166_v34 = vpop.xlane.xlu1 %842 }
 0x1ac   :  { %1086 = vadd.xlane.f32.xlu0 %v5164_v2 }
 0x1ad   :  { %v791_v7 = vpop.xlane.xlu0 %790 }
 0x1af   :  { %v785_v43 = vpop.xlane.xlu1 %784 }
 0x1b0   :  { %1150 = vadd.xlane.f32.xlu0 %v5170_v12  ;;  %v5186_v12 = vpop.eup %3903  ;;  %v895_v5 = vsub.f32 %v4796_v58, %v785_v43 }
 0x1b1   :  { %6954 = vst [vmem:[#allocation10_spill] sm:$0xff] %v5186_v12  ;;  %v5190_v39 = vpop.eup %3905  ;;  %v795_v43 = vpop.xlane.xlu0 %794 }
 0x1b2   :  { %v976_v50 = vmul.f32 1.442695, %v895_v5  ;;  %v5196_v54 = vpop.eup %3907 }
 0x1b3   :  { %v5176_v21 = vpop.xlane.xlu1 %848  ;;  %v5202_v11 = vpop.eup %3909 }
 0x1b4   :  { %1092 = vadd.xlane.f32.xlu0 %v5174_v46  ;;  %3913 = vpow2.f32 %v976_v50  ;;  %v5207_v33 = vpop.eup %3911 }
 0x1b5   :  { %3915 = vpow2.f32 %v974_v55  ;;  %v799_v10 = vpop.xlane.xlu0 %798 }
 0x1b7   :  { %v5182_v45 = vpop.xlane.xlu1 %846 }
 0x1b8   :  { %1090 = vadd.xlane.f32.xlu0 %v5180_v23 }
 0x1b9   :  { %v803_v13 = vpop.xlane.xlu0 %802 }
 0x1bb   :  { %v789_v8 = vpop.xlane.xlu1 %788 }
 0x1bc   :  { %1154 = vadd.xlane.f32.xlu0 %v5186_v12  ;;  %v897_v58 = vsub.f32 %v4820_v4, %v789_v8  ;;  %v978_v4 = vmul.f32 1.442695, %v896_v17  ;;  %v898_v8 = vsub.f32 %v4852_v22, %v791_v7  ;;  %v902_v7 = vsub.f32 %v4904_v41, %v799_v10 }
 0x1be   :  { %v980_v63 = vmul.f32 1.442695, %v897_v58  ;;  %v982_v20 = vmul.f32 1.442695, %v898_v8  ;;  %v904_v8 = vsub.f32 %v4932_v42, %v803_v13 }
 0x1bf   :  { %v5192_v29 = vpop.xlane.xlu1 %852 }
 0x1c0   :  { %1096 = vadd.xlane.f32.xlu0 %v5190_v39 }
 0x1c3   :  { %v5198_v15 = vpop.xlane.xlu1 %850 }
 0x1c4   :  { %1094 = vadd.xlane.f32.xlu0 %v5196_v54 }
 0x1c7   :  { %v793_v12 = vpop.xlane.xlu1 %792 }
 0x1c8   :  { %v899_v38 = vsub.f32 %v4842_v19, %v793_v12  ;;  %1100 = vadd.xlane.f32.xlu0 %v5202_v11  ;;  %v5213_v19 = vpop.eup %3913 }
 0x1c9   :  { %v5219_v50 = vpop.eup %3915 }
 0x1ca   :  { %v984_v5 = vmul.f32 1.442695, %v899_v38  ;;  %v900_v38 = vsub.f32 %v4878_v36, %v795_v43  ;;  %v807_v36 = vpop.xlane.xlu0 %806 }
 0x1cb   :  { %v5209_v48 = vpop.xlane.xlu1 %856 }
 0x1cc   :  { %3917 = vpow2.f32 %v984_v5  ;;  %1098 = vadd.xlane.f32.xlu0 %v5207_v33  ;;  %v986_v22 = vmul.f32 1.442695, %v900_v38 }
 0x1cd   :  { %3919 = vpow2.f32 %v980_v63 }
 0x1ce   :  { %3921 = vpow2.f32 %v978_v4 }
 0x1cf   :  { %v5215_v12 = vpop.xlane.xlu1 %854  ;;  %3923 = vpow2.f32 %v982_v20 }
 0x1d0   :  { %1104 = vadd.xlane.f32.xlu0 %v5213_v19 }
 0x1d3   :  { %v797_v55 = vpop.xlane.xlu1 %796 }
 0x1d4   :  { %v901_v58 = vsub.f32 %v4868_v35, %v797_v55  ;;  %1102 = vadd.xlane.f32.xlu0 %v5219_v50  ;;  %v990_v35 = vmul.f32 1.442695, %v902_v7  ;;  %v994_v55 = vmul.f32 1.442695, %v904_v8 }
 0x1d6   :  { %v5224_v17 = vpop.eup %3917  ;;  %v988_v63 = vmul.f32 1.442695, %v901_v58  ;;  %v906_v58 = vsub.f32 %v4960_v44, %v807_v36  ;;  %v6956_v36 = vld [vmem:[#allocation13_spill] sm:$0xff] }
 0x1d7   :  { %v5226_v5 = vpop.eup %3919  ;;  %v801_v4 = vpop.xlane.xlu1 %800  ;;  %1112 = vadd.xlane.f32.xlu1 %v5224_v17  ;;  %v923_v8 = vsub.f32 %v6956_v36, %v5140_v53  ;;  %v925_v53 = vsub.f32 %v4776_v51, %v5160_v26  ;;  %v926_v26 = vsub.f32 %v4806_v61, %v5182_v45  ;;  %v929_v36 = vsub.f32 %v4824_v6, %v5192_v29 }
 0x1d8   :  { %3925 = vpow2.f32 %v988_v63  ;;  %v903_v43 = vsub.f32 %v4894_v1, %v801_v4  ;;  %1108 = vadd.xlane.f32.xlu0 %v5226_v5  ;;  %v5232_v41 = vpop.eup %3921  ;;  %v811_v1 = vpop.xlane.xlu0 %810  ;;  %v998_v13 = vmul.f32 1.442695, %v906_v58 }
 0x1d9   :  { %3927 = vpow2.f32 %v986_v22  ;;  %v5237_v4 = vpop.eup %3923 }
 0x1da   :  { %v992_v20 = vmul.f32 1.442695, %v903_v43 }
 0x1db   :  { %v805_v10 = vpop.xlane.xlu1 %804 }
 0x1dc   :  { %3929 = vpow2.f32 %v992_v20  ;;  %v905_v38 = vsub.f32 %v4922_v32, %v805_v10  ;;  %1106 = vadd.xlane.f32.xlu0 %v5232_v41  ;;  %v908_v32 = vsub.f32 %v4988_v47, %v811_v1  ;;  %v6957_v20 = vld [vmem:[#allocation17_spill] sm:$0xff] }
 0x1dd   :  { %3931 = vpow2.f32 %v990_v35  ;;  %v922_v10 = vsub.f32 %v6957_v20, %v5147_v18  ;;  %v924_v18 = vsub.f32 %v4782_v52, %v5166_v34  ;;  %v1044_v20 = vmul.f32 1.442695, %v929_v36 }
 0x1de   :  { %v996_v63 = vmul.f32 1.442695, %v905_v38  ;;  %v1002_v47 = vmul.f32 1.442695, %v908_v32  ;;  %v927_v32 = vsub.f32 %v4800_v60, %v5176_v21  ;;  %v1038_v60 = vmul.f32 1.442695, %v926_v26 }
 0x1df   :  { %v809_v22 = vpop.xlane.xlu1 %808  ;;  %v1034_v51 = vmul.f32 1.442695, %v924_v18  ;;  %v6958_v21 = vld [vmem:[#allocation5_spill] sm:$0xff] }
 0x1e0   :  { %3933 = vpow2.f32 %v996_v63  ;;  %v907_v42 = vsub.f32 %v4950_v31, %v809_v22  ;;  %1110 = vadd.xlane.f32.xlu0 %v5237_v4  ;;  %v1032_v63 = vmul.f32 1.442695, %v923_v8  ;;  %v928_v8 = vsub.f32 %v6958_v21, %v5198_v15  ;;  %v6960_v15 = vld [vmem:[#allocation6_spill] sm:$0xff] }
 0x1e1   :  { %3935 = vpow2.f32 %v994_v55 }
 0x1e2   :  { %v5242_v7 = vpop.eup %3925  ;;  %v1000_v43 = vmul.f32 1.442695, %v907_v42  ;;  %v1042_v6 = vmul.f32 1.442695, %v928_v8 }
 0x1e3   :  { %v5244_v35 = vpop.eup %3927  ;;  %1116 = vadd.xlane.f32.xlu1 %v5242_v7  ;;  %v813_v44 = vpop.xlane.xlu1 %812 }
 0x1e4   :  { %3937 = vpow2.f32 %v1000_v43  ;;  %v909_v31 = vsub.f32 %v4978_v30, %v813_v44  ;;  %1114 = vadd.xlane.f32.xlu0 %v5244_v35  ;;  %v1030_v30 = vmul.f32 1.442695, %v922_v10  ;;  %v1040_v44 = vmul.f32 1.442695, %v927_v32  ;;  %v6959_v10 = vld [vmem:[#allocation7_spill] sm:$0xff]  ;;  %v6961_v32 = vld [vmem:[#allocation9_spill] sm:$0xff] }
 0x1e5   :  { %3939 = vpow2.f32 %v998_v13  ;;  %v1036_v13 = vmul.f32 1.442695, %v925_v53 }
 0x1e6   :  { %v5253_v38 = vpop.eup %3929  ;;  %v1004_v55 = vmul.f32 1.442695, %v909_v31 }
 0x1e7   :  { %v5255_v58 = vpop.eup %3931  ;;  %1120 = vadd.xlane.f32.xlu1 %v5253_v38  ;;  %v859_v1 = vpop.xlane.xlu1 %858 }
 0x1e8   :  { %3941 = vpow2.f32 %v1004_v55  ;;  %1118 = vadd.xlane.f32.xlu0 %v5255_v58 }
 0x1e9   :  { %3943 = vpow2.f32 %v1002_v47  ;;  %v930_v47 = vsub.f32 %v6959_v10, %v5215_v12  ;;  %v6967_v10 = vld [vmem:[#allocation12_spill] sm:$0xff] }
 0x1ea   :  { %v5263_v22 = vpop.eup %3933  ;;  %3945 = vpow2.f32 %v1032_v63  ;;  %v931_v63 = vsub.f32 %v6960_v15, %v5209_v48 }
 0x1eb   :  { %v5265_v42 = vpop.eup %3935  ;;  %1124 = vadd.xlane.f32.xlu1 %v5263_v22  ;;  %3947 = vpow2.f32 %v1030_v30  ;;  %v861_v52 = vpop.xlane.xlu1 %860  ;;  %v1046_v53 = vmul.f32 1.442695, %v930_v47 }
 0x1ec   :  { %1122 = vadd.xlane.f32.xlu0 %v5265_v42  ;;  %3949 = vpow2.f32 %v1036_v13  ;;  %v1048_v13 = vmul.f32 1.442695, %v931_v63 }
 0x1ed   :  { %3951 = vpow2.f32 %v1034_v51  ;;  %v932_v51 = vsub.f32 %v6961_v32, %v859_v1 }
 0x1ee   :  { %v5273_v34 = vpop.eup %3937  ;;  %3953 = vpow2.f32 %v1040_v44 }
 0x1ef   :  { %v5275_v43 = vpop.eup %3939  ;;  %1128 = vadd.xlane.f32.xlu1 %v5273_v34  ;;  %v863_v31 = vpop.xlane.xlu1 %862  ;;  %3955 = vpow2.f32 %v1038_v60  ;;  %v1050_v36 = vmul.f32 1.442695, %v932_v51  ;;  %v6964_v60 = vld [vmem:[#allocation8_spill] sm:$0xff] }
 0x1f0   :  { %1126 = vadd.xlane.f32.xlu0 %v5275_v43  ;;  %3957 = vpow2.f32 %v1044_v20  ;;  %v933_v21 = vsub.f32 %v6964_v60, %v861_v52  ;;  %v934_v47 = vsub.f32 %v6967_v10, %v863_v31  ;;  %v6971_v60 = vld [vmem:[#allocation15_spill] sm:$0xff] }
 0x1f1   :  { %3959 = vpow2.f32 %v1042_v6 }
 0x1f2   :  { %v5283_v61 = vpop.eup %3941  ;;  %3961 = vpow2.f32 %v1046_v53  ;;  %v1052_v1 = vmul.f32 1.442695, %v933_v21  ;;  %v1054_v52 = vmul.f32 1.442695, %v934_v47  ;;  %v6969_v53 = vld [vmem:[#allocation11_spill] sm:$0xff] }
 0x1f3   :  { %v5285_v45 = vpop.eup %3943  ;;  %1132 = vadd.xlane.f32.xlu1 %v5283_v61  ;;  %v865_v30 = vpop.xlane.xlu1 %864  ;;  %3963 = vpow2.f32 %v1048_v13 }
 0x1f4   :  { %1130 = vadd.xlane.f32.xlu0 %v5285_v45  ;;  %v5291_v29 = vpop.eup %3945  ;;  %3965 = vpow2.f32 %v1050_v36  ;;  %v935_v13 = vsub.f32 %v6969_v53, %v865_v30 }
 0x1f5   :  { %v5293_v55 = vpop.eup %3947 }
 0x1f6   :  { %v5299_v12 = vpop.eup %3949  ;;  %v1056_v31 = vmul.f32 1.442695, %v935_v13 }
 0x1f7   :  { %1160 = vadd.xlane.f32.xlu1 %v5291_v29  ;;  %v5301_v18 = vpop.eup %3951  ;;  %v867_v44 = vpop.xlane.xlu1 %866 }
 0x1f8   :  { %1158 = vadd.xlane.f32.xlu0 %v5293_v55  ;;  %v5306_v26 = vpop.eup %3953  ;;  %v936_v21 = vsub.f32 %v6971_v60, %v867_v44 }
 0x1f9   :  { %6962 = vst [vmem:[#allocation14_spill] sm:$0xff] %v5306_v26  ;;  %v5308_v48 = vpop.eup %3955 }
 0x1fa   :  { %6963 = vst [vmem:[#allocation16_spill] sm:$0xff] %v5308_v48  ;;  %v5313_v8 = vpop.eup %3957  ;;  %v1058_v30 = vmul.f32 1.442695, %v936_v21 }
 0x1fb   :  { %1164 = vadd.xlane.f32.xlu1 %v5299_v12  ;;  %6965 = vst [vmem:[#allocation13_spill] sm:$0xff] %v5313_v8  ;;  %v5315_v20 = vpop.eup %3959  ;;  %v869_v6 = vpop.xlane.xlu1 %868 }
 0x1fc   :  { %1162 = vadd.xlane.f32.xlu0 %v5301_v18  ;;  %6966 = vst [vmem:[#allocation17_spill] sm:$0xff] %v5315_v20  ;;  %v5320_v63 = vpop.eup %3961  ;;  %v937_v47 = vsub.f32 %v4926_v56, %v869_v6 }
 0x1fd   :  { %6968 = vst [vmem:[#allocation5_spill] sm:$0xff] %v5320_v63  ;;  %v5324_v51 = vpop.eup %3963 }
 0x1fe   :  { %6970 = vst [vmem:[#allocation7_spill] sm:$0xff] %v5324_v51  ;;  %v1060_v13 = vmul.f32 1.442695, %v937_v47 }
 0x1ff   :  { %1168 = vadd.xlane.f32.xlu1 %v5306_v26  ;;  %v871_v36 = vpop.xlane.xlu1 %870 }
 0x200   :  { %1166 = vadd.xlane.f32.xlu0 %v5308_v48  ;;  %v938_v60 = vsub.f32 %v4964_v57, %v871_v36 }
 0x203   :  { %1172 = vadd.xlane.f32.xlu1 %v5313_v8  ;;  %v873_v53 = vpop.xlane.xlu1 %872  ;;  %v7004_v8 = vld [vmem:[#allocation22_spill] sm:$0xff] }
 0x204   :  { %1170 = vadd.xlane.f32.xlu0 %v5315_v20  ;;  %v1073_v15 = vpop.xlane.xlu0 %1072 }
 0x205   :  { %3967 = vrcp.f32 %v1073_v15  ;;  %v5330_v15 = vpop.eup %3965 }
 0x206   :  { %3969 = vpow2.f32 %v1052_v1  ;;  %6972 = vst [vmem:[#allocation6_spill] sm:$0xff] %v5330_v15 }
 0x207   :  { %1174 = vadd.xlane.f32.xlu1 %v5320_v63  ;;  %v877_v6 = vpop.xlane.xlu1 %876 }
 0x208   :  { %v1071_v32 = vpop.xlane.xlu0 %1070 }
 0x209   :  { %3971 = vrcp.f32 %v1071_v32 }
 0x20a   :  { %3973 = vpow2.f32 %v1054_v52 }
 0x20b   :  { %1176 = vadd.xlane.f32.xlu1 %v5324_v51  ;;  %3975 = vpow2.f32 %v1056_v31 }
 0x20c   :  { %v5328_v10 = vpop.xlane.xlu0 %1134 }
 0x20f   :  { %1178 = vadd.xlane.f32.xlu1 %v5330_v15  ;;  %v3968_v1 = vpop.eup %3967 }
 0x210   :  { %v1077_v32 = vpop.xlane.xlu0 %1076  ;;  %v1263_v63 = vmul.f32 %v3968_v1, %v5037_v9  ;;  %v5335_v51 = vpop.eup %3969  ;;  %v1062_v1 = vmul.f32 1.442695, %v938_v60 }
 0x211   :  { %6973 = vst [vmem:[#allocation9_spill] sm:$0xff] %v5335_v51  ;;  %3977 = vrcp.f32 %v1077_v32  ;;  %v941_v32 = vsub.f32 %v4982_v16, %v877_v6 }
 0x212   :  { %v3146_v44 = vadd.f32 -0.0025, %v1263_v63  ;;  %3979 = vpow2.f32 %v1058_v30  ;;  %v939_v30 = vsub.f32 %v4954_v37, %v873_v53 }
 0x213   :  { %1180 = vadd.xlane.f32.xlu1 %v5335_v51  ;;  %v3972_v52 = vpop.eup %3971 }
 0x214   :  { %v1075_v15 = vpop.xlane.xlu0 %1074  ;;  %v1262_v31 = vmul.f32 %v3972_v52, %v5047_v49  ;;  %v1455_v21 = vadd.f32 1e-12, %v3146_v44  ;;  %v5340_v56 = vpop.eup %3973  ;;  %vm1647_vm3 = vcmp.gt.f32.partialorder %v3146_v44, 0.0 }
 0x215   :  { %6974 = vst [vmem:[#allocation8_spill] sm:$0xff] %v5340_v56  ;;  %3981 = vrcp.f32 %v1075_v15  ;;  %v5346_v36 = vpop.eup %3975  ;;  %v1064_v15 = vmul.f32 1.442695, %v939_v30  ;;  %v875_v52 = vpop.xlane.xlu1 %874 }
 0x216   :  { %3692 = vmatprep.mubr.f32.mxu0 %v1262_v31  ;;  %3983 = vrcp.f32 %v1455_v21  ;;  %v3145_v9 = vadd.f32 -0.0025, %v1262_v31  ;;  %6975 = vst [vmem:[#allocation12_spill] sm:$0xff] %v5346_v36 }
 0x217   :  { %1182 = vadd.xlane.f32.xlu1 %v5340_v56  ;;  %3985 = vpow2.f32 %v1060_v13  ;;  %3693 = vmatmul.mubr.f32.vlgmr.msra.gmra.mrb[32].mxu0 %v1263_v63  ;;  %v1068_v56 = vmul.f32 1.442695, %v941_v32 }
 0x218   :  { %v1454_v57 = vadd.f32 1e-12, %v3145_v9  ;;  %vm1646_vm4 = vcmp.gt.f32.partialorder %v3145_v9, 0.0 }
 0x219   :  { %v5344_v47 = vpop.xlane.xlu0 %1138 }
 0x21a   :  { %3987 = vrcp.f32 %v1454_v57  ;;  %v940_v57 = vsub.f32 %v4992_v3, %v875_v52 }
 0x21b   :  { %1184 = vadd.xlane.f32.xlu1 %v5346_v36  ;;  %v3978_v49 = vpop.eup %3977  ;;  %3989 = vpow2.f32 %v1062_v1  ;;  %v1391_v36 = vmul.f32 %v3146_v44, %v1263_v63  ;;  %v1390_v63 = vmul.f32 %v3145_v9, %v1262_v31 }
 0x21c   :  { %v1265_v13 = vmul.f32 %v3978_v49, %v5073_v14  ;;  %v5351_v60 = vpop.eup %3979 }
 0x21d   :  { %v1081_v21 = vpop.xlane.xlu0 %1080  ;;  %6976 = vst [vmem:[#allocation11_spill] sm:$0xff] %v5351_v60 }
 0x21e   :  { %3991 = vrcp.f32 %v1081_v21  ;;  %v3148_v37 = vadd.f32 -0.0025, %v1265_v13 }
 0x21f   :  { %1186 = vadd.xlane.f32.xlu1 %v5351_v60  ;;  %v3982_v53 = vpop.eup %3981  ;;  %3993 = vpow2.f32 %v1064_v15  ;;  %v1066_v15 = vmul.f32 1.442695, %v940_v57 }
 0x220   :  { %v3984_v1 = vpop.eup %3983  ;;  %v1264_v16 = vmul.f32 %v3982_v53, %v5087_v59  ;;  %v1457_v6 = vadd.f32 1e-12, %v3148_v37  ;;  %vm1649_vm5 = vcmp.gt.f32.partialorder %v3148_v37, 0.0 }
 0x221   :  { %v1079_v30 = vpop.xlane.xlu0 %1078  ;;  %v5356_v51 = vpop.eup %3985  ;;  %v1583_v14 = vmul.f32 %v3984_v1, %v1391_v36 }
 0x222   :  { %6977 = vst [vmem:[#allocation15_spill] sm:$0xff] %v5356_v51  ;;  %3995 = vrcp.f32 %v1079_v30  ;;  %3695 = vmatprep.mubr.f32.mxu0 %v1264_v16  ;;  %v3147_v49 = vadd.f32 -0.0025, %v1264_v16 }
 0x223   :  { %1188 = vadd.xlane.f32.xlu1 %v5356_v51  ;;  %3997 = vrcp.f32 %v1457_v6  ;;  %3696 = vmatmul.mubr.f32.gmra.mrb[34].mxu0 %v1265_v13  ;;  %v5359_v3 = vsel %vm1647_vm3, %v1583_v14, 0.0  ;;  %v1393_v6 = vmul.f32 %v3148_v37, %v1265_v13 }
 0x224   :  { %3999 = vpow2.f32 %v1068_v56  ;;  %6978 = vst [vmem:[#allocation27_spill] sm:$0xff] %v5359_v3  ;;  %v3988_v32 = vpop.eup %3987  ;;  %1776 = vadd.xlane.f32.xlu0 %v5359_v3  ;;  %v1456_v52 = vadd.f32 1e-12, %v3147_v49  ;;  %vm1648_vm6 = vcmp.gt.f32.partialorder %v3147_v49, 0.0 }
 0x225   :  { %v5362_v59 = vpop.xlane.xlu0 %1142  ;;  %v5364_v21 = vpop.eup %3989  ;;  %v1582_v36 = vmul.f32 %v3988_v32, %v1390_v63 }
 0x226   :  { %6979 = vst [vmem:[#allocation28_spill] sm:$0xff] %v5364_v21  ;;  %4001 = vrcp.f32 %v1456_v52 }
 0x227   :  { %1190 = vadd.xlane.f32.xlu1 %v5364_v21  ;;  %4003 = vpow2.f32 %v1066_v15  ;;  %v5367_v56 = vsel %vm1646_vm4, %v1582_v36, 0.0 }
 0x228   :  { %v3992_v44 = vpop.eup %3991  ;;  %6980 = vst [vmem:[#allocation29_spill] sm:$0xff] %v5367_v56  ;;  %1774 = vadd.xlane.f32.xlu0 %v5367_v56 }
 0x229   :  { %v1085_v31 = vpop.xlane.xlu0 %1084  ;;  %v1267_v53 = vmul.f32 %v3992_v44, %v5113_v62  ;;  %v5371_v57 = vpop.eup %3993  ;;  %v1392_v44 = vmul.f32 %v3147_v49, %v1264_v16 }
 0x22a   :  { %6981 = vst [vmem:[#allocation30_spill] sm:$0xff] %v5371_v57  ;;  %4005 = vrcp.f32 %v1085_v31 }
 0x22b   :  { %1192 = vadd.xlane.f32.xlu1 %v5371_v57  ;;  %v3150_v1 = vadd.f32 -0.0025, %v1267_v53 }
 0x22c   :  { %v3996_v30 = vpop.eup %3995 }
 0x22d   :  { %v3998_v14 = vpop.eup %3997  ;;  %v1083_v9 = vpop.xlane.xlu0 %1082  ;;  %v1266_v63 = vmul.f32 %v3996_v30, %v5125_v24  ;;  %v1459_v15 = vadd.f32 1e-12, %v3150_v1  ;;  %vm1651_vm7 = vcmp.gt.f32.partialorder %v3150_v1, 0.0 }
 0x22e   :  { %v5375_v32 = vpop.eup %3999  ;;  %4007 = vrcp.f32 %v1083_v9  ;;  %v1585_v52 = vmul.f32 %v3998_v14, %v1393_v6 }
 0x22f   :  { %6982 = vst [vmem:[#allocation31_spill] sm:$0xff] %v5375_v32  ;;  %3698 = vmatprep.mubr.f32.mxu0 %v1266_v63  ;;  %1196 = vadd.xlane.f32.xlu1 %v5375_v32  ;;  %4009 = vrcp.f32 %v1459_v15  ;;  %v3149_v62 = vadd.f32 -0.0025, %v1266_v63 }
 0x230   :  { %3699 = vmatmul.mubr.f32.gmra.mrb[36].mxu0 %v1267_v53  ;;  %v5378_v36 = vsel %vm1649_vm5, %v1585_v52, 0.0  ;;  %v4002_v13 = vpop.eup %4001 }
 0x231   :  { %6983 = vst [vmem:[#allocation32_spill] sm:$0xff] %v5378_v36  ;;  %1780 = vadd.xlane.f32.xlu0 %v5378_v36  ;;  %v5381_v31 = vpop.xlane.xlu0 %1146  ;;  %v1458_v24 = vadd.f32 1e-12, %v3149_v62  ;;  %v5383_v30 = vpop.eup %4003  ;;  %v1584_v9 = vmul.f32 %v4002_v13, %v1392_v44  ;;  %v1395_v36 = vmul.f32 %v3150_v1, %v1267_v53  ;;  %vm1650_vm8 = vcmp.gt.f32.partialorder %v3149_v62, 0.0 }
 0x232   :  { %6984 = vst [vmem:[#allocation33_spill] sm:$0xff] %v5383_v30 }
 0x233   :  { %1194 = vadd.xlane.f32.xlu1 %v5383_v30  ;;  %4011 = vrcp.f32 %v1458_v24  ;;  %v5386_v6 = vsel %vm1648_vm6, %v1584_v9, 0.0 }
 0x234   :  { %v4006_v37 = vpop.eup %4005  ;;  %6985 = vst [vmem:[#allocation34_spill] sm:$0xff] %v5386_v6 }
 0x235   :  { %1778 = vadd.xlane.f32.xlu0 %v5386_v6  ;;  %v1089_v14 = vpop.xlane.xlu0 %1088  ;;  %v1269_v16 = vmul.f32 %v4006_v37, %v5138_v40  ;;  %v1394_v6 = vmul.f32 %v3149_v62, %v1266_v63 }
 0x236   :  { %4013 = vrcp.f32 %v1089_v14 }
 0x237   :  { %v3152_v15 = vadd.f32 -0.0025, %v1269_v16 }
 0x238   :  { %v4008_v52 = vpop.eup %4007 }
 0x239   :  { %v4010_v32 = vpop.eup %4009  ;;  %v1087_v57 = vpop.xlane.xlu0 %1086  ;;  %v1268_v44 = vmul.f32 %v4008_v52, %v5145_v0  ;;  %v1461_v13 = vadd.f32 1e-12, %v3152_v15  ;;  %v1397_v52 = vmul.f32 %v3152_v15, %v1269_v16  ;;  %vm1653_vm9 = vcmp.gt.f32.partialorder %v3152_v15, 0.0 }
 0x23a   :  { %4015 = vrcp.f32 %v1087_v57  ;;  %v1587_v49 = vmul.f32 %v4010_v32, %v1395_v36 }
 0x23b   :  { %3701 = vmatprep.mubr.f32.mxu0 %v1268_v44  ;;  %4017 = vrcp.f32 %v1461_v13  ;;  %v3151_v24 = vadd.f32 -0.0025, %v1268_v44 }
 0x23c   :  { %3702 = vmatmul.mubr.f32.gmra.mrb[38].mxu0 %v1269_v16  ;;  %v5391_v9 = vsel %vm1651_vm7, %v1587_v49, 0.0 }
 0x23d   :  { %6986 = vst [vmem:[#allocation35_spill] sm:$0xff] %v5391_v9  ;;  %v4012_v40 = vpop.eup %4011  ;;  %1784 = vadd.xlane.f32.xlu0 %v5391_v9  ;;  %v5394_v37 = vpop.xlane.xlu0 %1150  ;;  %v1460_v53 = vadd.f32 1e-12, %v3151_v24  ;;  %vm1652_vm10 = vcmp.gt.f32.partialorder %v3151_v24, 0.0 }
 0x23e   :  { %v1586_v14 = vmul.f32 %v4012_v40, %v1394_v6  ;;  %v1137_v40 = vpop.xlane.xlu1 %1136 }
 0x23f   :  { %4019 = vrcp.f32 %v1460_v53  ;;  %v1396_v53 = vmul.f32 %v3151_v24, %v1268_v44 }
 0x240   :  { %v4014_v0 = vpop.eup %4013  ;;  %v5396_v57 = vsel %vm1650_vm8, %v1586_v14, 0.0 }
 0x241   :  { %6987 = vst [vmem:[#allocation36_spill] sm:$0xff] %v5396_v57  ;;  %1782 = vadd.xlane.f32.xlu0 %v5396_v57  ;;  %v1093_v1 = vpop.xlane.xlu0 %1092  ;;  %v1271_v32 = vmul.f32 %v4014_v0, %v5158_v28 }
 0x242   :  { %4021 = vrcp.f32 %v1093_v1 }
 0x243   :  { %v3154_v36 = vadd.f32 -0.0025, %v1271_v32 }
 0x244   :  { %v4016_v63 = vpop.eup %4015 }
 0x245   :  { %v4018_v13 = vpop.eup %4017  ;;  %v1091_v49 = vpop.xlane.xlu0 %1090  ;;  %v1270_v9 = vmul.f32 %v4016_v63, %v5164_v2  ;;  %v1463_v30 = vadd.f32 1e-12, %v3154_v36  ;;  %vm1655_vm11 = vcmp.gt.f32.partialorder %v3154_v36, 0.0 }
 0x246   :  { %4023 = vrcp.f32 %v1091_v49  ;;  %v1589_v62 = vmul.f32 %v4018_v13, %v1397_v52  ;;  %v1141_v63 = vpop.xlane.xlu1 %1140  ;;  %v1399_v13 = vmul.f32 %v3154_v36, %v1271_v32 }
 0x247   :  { %3704 = vmatprep.mubr.f32.mxu0 %v1270_v9  ;;  %4025 = vrcp.f32 %v1463_v30  ;;  %v3153_v6 = vadd.f32 -0.0025, %v1270_v9 }
 0x248   :  { %4027 = vrcp.f32 %v5328_v10  ;;  %3705 = vmatmul.mubr.f32.gmra.mrb[40].mxu0 %v1271_v32  ;;  %v5402_v28 = vsel %vm1653_vm9, %v1589_v62, 0.0 }
 0x249   :  { %6988 = vst [vmem:[#allocation37_spill] sm:$0xff] %v5402_v28  ;;  %v4020_v14 = vpop.eup %4019  ;;  %1788 = vadd.xlane.f32.xlu0 %v5402_v28  ;;  %v5405_v16 = vpop.xlane.xlu0 %1154  ;;  %v1462_v2 = vadd.f32 1e-12, %v3153_v6  ;;  %vm1654_vm12 = vcmp.gt.f32.partialorder %v3153_v6, 0.0 }
 0x24a   :  { %v1588_v0 = vmul.f32 %v4020_v14, %v1396_v53 }
 0x24b   :  { %4029 = vrcp.f32 %v1462_v2 }
 0x24c   :  { %v4022_v1 = vpop.eup %4021  ;;  %v5407_v15 = vsel %vm1652_vm10, %v1588_v0, 0.0  ;;  %4031 = vrcp.f32 %v1137_v40 }
 0x24d   :  { %6989 = vst [vmem:[#allocation38_spill] sm:$0xff] %v5407_v15  ;;  %1786 = vadd.xlane.f32.xlu0 %v5407_v15  ;;  %v1097_v10 = vpop.xlane.xlu0 %1096  ;;  %v1273_v30 = vmul.f32 %v4022_v1, %v5174_v46  ;;  %v1145_v46 = vpop.xlane.xlu1 %1144  ;;  %v1398_v1 = vmul.f32 %v3153_v6, %v1270_v9 }
 0x24e   :  { %4033 = vrcp.f32 %v1097_v10 }
 0x24f   :  { %v3156_v44 = vadd.f32 -0.0025, %v1273_v30  ;;  %4035 = vrcp.f32 %v1141_v63 }
 0x250   :  { %v4024_v52 = vpop.eup %4023 }
 0x251   :  { %v4026_v49 = vpop.eup %4025  ;;  %v1095_v62 = vpop.xlane.xlu0 %1094  ;;  %v1272_v24 = vmul.f32 %v4024_v52, %v5180_v23  ;;  %v1465_v53 = vadd.f32 1e-12, %v3156_v44  ;;  %vm1657_vm13 = vcmp.gt.f32.partialorder %v3156_v44, 0.0 }
 0x252   :  { %v4028_v14 = vpop.eup %4027  ;;  %4037 = vrcp.f32 %v1095_v62  ;;  %v1591_v2 = vmul.f32 %v4026_v49, %v1399_v13  ;;  %v1149_v49 = vpop.xlane.xlu1 %1148 }
 0x253   :  { %3707 = vmatprep.mubr.f32.mxu0 %v1272_v24  ;;  %4039 = vrcp.f32 %v1465_v53  ;;  %v5412_v40 = vadd.f32 -0.0025, %v1272_v24  ;;  %v5420_v63 = vmul.f32 %v4028_v14, %v5059_v25 }
 0x254   :  { %3708 = vmatmul.mubr.f32.gmra.mrb[42].mxu0 %v1273_v30  ;;  %v5414_v0 = vsel %vm1655_vm11, %v1591_v2, 0.0  ;;  %4041 = vrcp.f32 %v5344_v47 }
 0x255   :  { %6990 = vst [vmem:[#allocation39_spill] sm:$0xff] %v5414_v0  ;;  %v4030_v32 = vpop.eup %4029  ;;  %1792 = vadd.xlane.f32.xlu0 %v5414_v0  ;;  %v1101_v23 = vpop.xlane.xlu0 %1100  ;;  %v1464_v10 = vadd.f32 1e-12, %v5412_v40  ;;  %v5427_v53 = vadd.f32 -0.0025, %v5420_v63  ;;  %vm1656_vm14 = vcmp.gt.f32.partialorder %v5412_v40, 0.0 }
 0x256   :  { %4043 = vrcp.f32 %v1101_v23  ;;  %v1590_v36 = vmul.f32 %v4030_v32, %v1398_v1  ;;  %v4032_v52 = vpop.eup %4031  ;;  %v5434_v1 = vpop.xlane.xlu1 %1152  ;;  %v1401_v32 = vmul.f32 %v3156_v44, %v1273_v30 }
 0x257   :  { %4045 = vrcp.f32 %v1464_v10  ;;  %v5432_v6 = vmul.f32 %v4032_v52, %v5063_v27  ;;  %vm1678_vm10 = vcmp.gt.f32.partialorder %v5427_v53, 0.0 }
 0x258   :  { %v4034_v13 = vpop.eup %4033  ;;  %v5422_v62 = vsel %vm1654_vm12, %v1590_v36, 0.0  ;;  %4047 = vrcp.f32 %v1145_v46  ;;  %v1486_v36 = vadd.f32 1e-12, %v5427_v53 }
 0x259   :  { %6991 = vst [vmem:[#allocation40_spill] sm:$0xff] %v5422_v62  ;;  %1790 = vadd.xlane.f32.xlu0 %v5422_v62  ;;  %v1099_v47 = vpop.xlane.xlu0 %1098  ;;  %v1275_v9 = vmul.f32 %v4034_v13, %v5190_v39  ;;  %v4036_v25 = vpop.eup %4035  ;;  %v5446_v30 = vadd.f32 -0.0025, %v5432_v6 }
 0x25a   :  { %4049 = vrcp.f32 %v1099_v47 }
 0x25b   :  { %v5429_v14 = vadd.f32 -0.0025, %v1275_v9 }
 0x25c   :  { %v4038_v2 = vpop.eup %4037 }
 0x25d   :  { %v4040_v46 = vpop.eup %4039  ;;  %v1105_v23 = vpop.xlane.xlu0 %1104  ;;  %v5437_v10 = vmul.f32 %v4038_v2, %v5196_v54  ;;  %v1467_v39 = vadd.f32 1e-12, %v5429_v14  ;;  %vm1659_vm15 = vcmp.gt.f32.partialorder %v5429_v14, 0.0 }
 0x25e   :  { %4051 = vrcp.f32 %v1105_v23  ;;  %v1593_v13 = vmul.f32 %v4040_v46, %v1401_v32  ;;  %v4042_v47 = vpop.eup %4041  ;;  %v5448_v54 = vpop.xlane.xlu1 %1156  ;;  %v1400_v23 = vmul.f32 %v5412_v40, %v1272_v24  ;;  %v6993_v32 = vld [vmem:[#allocation18_spill] sm:$0xff] }
 0x25f   :  { %3710 = vmatprep.mubr.f32.mxu0 %v5437_v10  ;;  %4053 = vrcp.f32 %v1467_v39  ;;  %v5443_v27 = vadd.f32 -0.0025, %v5437_v10  ;;  %v5454_v46 = vmul.f32 %v4036_v25, %v6993_v32  ;;  %v1487_v25 = vadd.f32 1e-12, %v5446_v30 }
 0x260   :  { %v4044_v52 = vpop.eup %4043  ;;  %3711 = vmatmul.mubr.f32.gmra.mrb[44].mxu0 %v1275_v9  ;;  %v5450_v2 = vsel %vm1657_vm13, %v1593_v13, 0.0  ;;  %4055 = vrcp.f32 %v1486_v36 }
 0x261   :  { %6992 = vst [vmem:[#allocation41_spill] sm:$0xff] %v5450_v2  ;;  %v4046_v62 = vpop.eup %4045  ;;  %1796 = vadd.xlane.f32.xlu0 %v5450_v2  ;;  %v1103_v44 = vpop.xlane.xlu0 %1102  ;;  %v5458_v39 = vmul.f32 %v4044_v52, %v5202_v11  ;;  %v1466_v0 = vadd.f32 1e-12, %v5443_v27  ;;  %v6995_v11 = vld [vmem:[#allocation20_spill] sm:$0xff]  ;;  %v5472_v36 = vadd.f32 -0.0025, %v5454_v46 }
 0x262   :  { %4057 = vrcp.f32 %v1103_v44  ;;  %v1592_v15 = vmul.f32 %v4046_v62, %v1400_v23  ;;  %v4048_v28 = vpop.eup %4047  ;;  %v5469_v52 = vmul.f32 %v4042_v47, %v6995_v11  ;;  %v1403_v44 = vmul.f32 %v5429_v14, %v1275_v9 }
 0x263   :  { %4059 = vrcp.f32 %v1466_v0  ;;  %v5463_v24 = vadd.f32 -0.0025, %v5458_v39  ;;  %vm1658_vm0 = vcmp.gt.f32.partialorder %v5443_v27, 0.0 }
 0x264   :  { %v4050_v13 = vpop.eup %4049  ;;  %4061 = vrcp.f32 %v1149_v49  ;;  %v1113_v32 = vpop.xlane.xlu1 %1112  ;;  %v5466_v2 = vsel %vm1656_vm14, %v1592_v15, 0.0  ;;  %v6996_v49 = vld [vmem:[#allocation19_spill] sm:$0xff] }
 0x265   :  { %6994 = vst [vmem:[#allocation18_spill] sm:$0xff] %v5466_v2  ;;  %4063 = vrcp.f32 %v1113_v32  ;;  %1794 = vadd.xlane.f32.xlu0 %v5466_v2  ;;  %v1109_v40 = vpop.xlane.xlu0 %1108  ;;  %v5476_v0 = vmul.f32 %v4050_v13, %v5207_v33  ;;  %v1469_v62 = vadd.f32 1e-12, %v5463_v24  ;;  %v5484_v47 = vmul.f32 %v4048_v28, %v6996_v49 }
 0x266   :  { %4065 = vrcp.f32 %v1109_v40  ;;  %v1489_v33 = vadd.f32 1e-12, %v5472_v36  ;;  %v5490_v13 = vadd.f32 -0.0025, %v5469_v52  ;;  %vm1661_vm2 = vcmp.gt.f32.partialorder %v5463_v24, 0.0 }
 0x267   :  { %3713 = vmatprep.mubr.f32.mxu0 %v5476_v0  ;;  %4067 = vrcp.f32 %v1469_v62  ;;  %v5481_v15 = vadd.f32 -0.0025, %v5476_v0 }
 0x268   :  { %v4052_v23 = vpop.eup %4051  ;;  %3714 = vmatmul.mubr.f32.gmra.mrb[46].mxu0 %v5458_v39  ;;  %4069 = vrcp.f32 %v1487_v25  ;;  %v5504_v25 = vadd.f32 -0.0025, %v5484_v47 }
 0x269   :  { %v4054_v32 = vpop.eup %4053  ;;  %4071 = vrcp.f32 %v5362_v59  ;;  %v1107_v11 = vpop.xlane.xlu0 %1106  ;;  %v5494_v40 = vmul.f32 %v4052_v23, %v5213_v19  ;;  %v1468_v28 = vadd.f32 1e-12, %v5481_v15  ;;  %v1402_v19 = vmul.f32 %v5443_v27, %v5437_v10 }
 0x26a   :  { %4073 = vrcp.f32 %v1107_v11  ;;  %v1595_v62 = vmul.f32 %v4054_v32, %v1403_v44  ;;  %v5497_v49 = vpop.eup %4055  ;;  %v1488_v23 = vadd.f32 1e-12, %v5490_v13  ;;  %v1491_v10 = vadd.f32 1e-12, %v5504_v25 }
 0x26b   :  { %4075 = vrcp.f32 %v1468_v28  ;;  %v5501_v9 = vadd.f32 -0.0025, %v5494_v40  ;;  %vm1660_vm3 = vcmp.gt.f32.partialorder %v5481_v15, 0.0 }
 0x26c   :  { %v4058_v59 = vpop.eup %4057  ;;  %v5506_v2 = vsel %vm1659_vm15, %v1595_v62, 0.0  ;;  %4077 = vrcp.f32 %v1489_v33 }
 0x26d   :  { %6997 = vst [vmem:[#allocation20_spill] sm:$0xff] %v5506_v2  ;;  %v4060_v44 = vpop.eup %4059  ;;  %4079 = vrcp.f32 %v5434_v1  ;;  %1800 = vadd.xlane.f32.xlu1 %v5506_v2  ;;  %v1111_v14 = vpop.xlane.xlu0 %1110  ;;  %v5514_v32 = vmul.f32 %v4058_v59, %v5219_v50  ;;  %v1471_v11 = vadd.f32 1e-12, %v5501_v9  ;;  %vm1663_vm4 = vcmp.gt.f32.partialorder %v5501_v9, 0.0 }
 0x26e   :  { %v5517_v28 = vpop.eup %4061  ;;  %4081 = vrcp.f32 %v1111_v14  ;;  %v1594_v62 = vmul.f32 %v4060_v44, %v1402_v19  ;;  %v1405_v19 = vmul.f32 %v5463_v24, %v5458_v39 }
 0x26f   :  { %v4064_v57 = vpop.eup %4063  ;;  %3716 = vmatprep.mubr.f32.mxu0 %v5514_v32  ;;  %4083 = vrcp.f32 %v1471_v11  ;;  %v5522_v1 = vadd.f32 -0.0025, %v5514_v32 }
 0x270   :  { %v4066_v33 = vpop.eup %4065  ;;  %3717 = vmatmul.mubr.f32.gmra.mrb[48].mxu0 %v5494_v40  ;;  %v1117_v50 = vpop.xlane.xlu1 %1116  ;;  %v5526_v59 = vsel %vm1658_vm0, %v1594_v62, 0.0  ;;  %v5531_v44 = vmul.f32 %v4064_v57, %v5224_v17  ;;  %4085 = vrcp.f32 %v1488_v23  ;;  %vm1679_vm0 = vcmp.gt.f32.partialorder %v5446_v30, 0.0 }
 0x271   :  { %6998 = vst [vmem:[#allocation19_spill] sm:$0xff] %v5526_v59  ;;  %v4068_v27 = vpop.eup %4067  ;;  %4087 = vrcp.f32 %v1117_v50  ;;  %1798 = vadd.xlane.f32.xlu0 %v5526_v59  ;;  %v1115_v14 = vpop.xlane.xlu0 %1114  ;;  %v5535_v11 = vmul.f32 %v4066_v33, %v5226_v5  ;;  %v1470_v2 = vadd.f32 1e-12, %v5522_v1  ;;  %v1404_v50 = vmul.f32 %v5481_v15, %v5476_v0 }
 0x272   :  { %v5538_v56 = vpop.eup %4069  ;;  %4089 = vrcp.f32 %v1115_v14  ;;  %v1597_v62 = vmul.f32 %v4068_v27, %v1405_v19  ;;  %v5541_v39 = vadd.f32 -0.0025, %v5531_v44  ;;  %vm1662_vm5 = vcmp.gt.f32.partialorder %v5522_v1, 0.0 }
 0x273   :  { %v5543_v17 = vpop.eup %4071  ;;  %4091 = vrcp.f32 %v1470_v2  ;;  %v5547_v57 = vadd.f32 -0.0025, %v5535_v11 }
 0x274   :  { %v4074_v23 = vpop.eup %4073  ;;  %v1121_v5 = vpop.xlane.xlu1 %1120  ;;  %v5549_v33 = vsel %vm1661_vm2, %v1597_v62, 0.0  ;;  %v1475_v19 = vadd.f32 1e-12, %v5541_v39  ;;  %4093 = vrcp.f32 %v1491_v10  ;;  %vm1667_vm7 = vcmp.gt.f32.partialorder %v5541_v39, 0.0 }
 0x275   :  { %6999 = vst [vmem:[#allocation42_spill] sm:$0xff] %v5549_v33  ;;  %v4076_v27 = vpop.eup %4075  ;;  %4095 = vrcp.f32 %v1121_v5  ;;  %1804 = vadd.xlane.f32.xlu1 %v5549_v33  ;;  %v1119_v14 = vpop.xlane.xlu0 %1118  ;;  %v5556_v2 = vmul.f32 %v4074_v23, %v5232_v41  ;;  %v1473_v24 = vadd.f32 1e-12, %v5547_v57  ;;  %v1407_v5 = vmul.f32 %v5501_v9, %v5494_v40 }
 0x276   :  { %v5559_v59 = vpop.eup %4077  ;;  %4097 = vrcp.f32 %v1119_v14  ;;  %v1596_v62 = vmul.f32 %v4076_v27, %v1404_v50  ;;  %v5586_v40 = vmul.f32 %v5427_v53, %v5420_v63  ;;  %v1406_v9 = vmul.f32 %v5522_v1, %v5514_v32 }
 0x277   :  { %v5561_v21 = vpop.eup %4079  ;;  %3719 = vmatprep.mubr.f32.mxu0 %v5556_v2  ;;  %4099 = vrcp.f32 %v1473_v24  ;;  %v5566_v0 = vadd.f32 -0.0025, %v5556_v2  ;;  %v1409_v60 = vmul.f32 %v5547_v57, %v5535_v11  ;;  %vm1665_vm6 = vcmp.gt.f32.partialorder %v5547_v57, 0.0 }
 0x278   :  { %v4082_v10 = vpop.eup %4081  ;;  %3720 = vmatmul.mubr.f32.gmra.mrb[50].mxu0 %v5535_v11  ;;  %v1125_v41 = vpop.xlane.xlu1 %1124  ;;  %v5569_v23 = vsel %vm1660_vm3, %v1596_v62, 0.0  ;;  %4101 = vrcp.f32 %v1475_v19  ;;  %v5582_v62 = vmul.f32 %v5446_v30, %v5432_v6 }
 0x279   :  { %7000 = vst [vmem:[#allocation43_spill] sm:$0xff] %v5569_v23  ;;  %v4084_v50 = vpop.eup %4083  ;;  %4103 = vrcp.f32 %v1125_v41  ;;  %1802 = vadd.xlane.f32.xlu0 %v5569_v23  ;;  %v1123_v27 = vpop.xlane.xlu0 %1122  ;;  %v5575_v15 = vmul.f32 %v4082_v10, %v5237_v4  ;;  %v1472_v14 = vadd.f32 1e-12, %v5566_v0  ;;  %v7001_v10 = vld [vmem:[#allocation21_spill] sm:$0xff]  ;;  %v1408_v57 = vmul.f32 %v5566_v0, %v5556_v2 }
 0x27a   :  { %v5578_v24 = vpop.eup %4085  ;;  %4105 = vrcp.f32 %v1123_v27  ;;  %v1599_v33 = vmul.f32 %v4084_v50, %v1407_v5  ;;  %v5595_v41 = vmul.f32 %v5517_v28, %v7001_v10  ;;  %vm1664_vm8 = vcmp.gt.f32.partialorder %v5566_v0, 0.0 }
 0x27b   :  { %v4088_v19 = vpop.eup %4087  ;;  %3722 = vmatprep.mubr.f32.mxu0 %v5575_v15  ;;  %4107 = vrcp.f32 %v1472_v14  ;;  %v5591_v4 = vadd.f32 -0.0025, %v5575_v15 }
 0x27c   :  { %v4090_v5 = vpop.eup %4089  ;;  %4109 = vrcp.f32 %v5381_v31  ;;  %3723 = vmatmul.mubr.f32.gmra.mrb[52].mxu0 %v5531_v44  ;;  %v1129_v50 = vpop.xlane.xlu1 %1128  ;;  %v5599_v27 = vsel %vm1663_vm4, %v1599_v33, 0.0  ;;  %v5602_v23 = vmul.f32 %v4088_v19, %v5242_v7  ;;  %v5613_v33 = vmul.f32 %v5472_v36, %v5454_v46 }
 0x27d   :  { %7002 = vst [vmem:[#allocation21_spill] sm:$0xff] %v5599_v27  ;;  %v4092_v14 = vpop.eup %4091  ;;  %4111 = vrcp.f32 %v1129_v50  ;;  %1808 = vadd.xlane.f32.xlu1 %v5599_v27  ;;  %v1127_v28 = vpop.xlane.xlu0 %1126  ;;  %v5608_v10 = vmul.f32 %v4090_v5, %v5244_v35  ;;  %v1474_v31 = vadd.f32 1e-12, %v5591_v4  ;;  %v5622_v19 = vmul.f32 %v5490_v13, %v5469_v52 }
 0x27e   :  { %v5615_v3 = vpop.eup %4093  ;;  %4113 = vrcp.f32 %v1127_v28  ;;  %v1598_v7 = vmul.f32 %v4092_v14, %v1406_v9  ;;  %v5618_v32 = vadd.f32 -0.0025, %v5602_v23  ;;  %v5630_v5 = vadd.f32 -0.0025, %v5595_v41 }
 0x27f   :  { %v4096_v50 = vpop.eup %4095  ;;  %3725 = vmatprep.mubr.f32.mxu0 %v5608_v10  ;;  %4115 = vrcp.f32 %v1474_v31  ;;  %v5627_v35 = vadd.f32 -0.0025, %v5608_v10  ;;  %vm1666_vm9 = vcmp.gt.f32.partialorder %v5591_v4, 0.0  ;;  %vm1681_vm4 = vcmp.gt.f32.partialorder %v5472_v36, 0.0 }
 0x280   :  { %v4098_v9 = vpop.eup %4097  ;;  %3726 = vmatmul.mubr.f32.gmra.mrb[54].mxu0 %v5602_v23  ;;  %v1133_v14 = vpop.xlane.xlu1 %1132  ;;  %v5633_v28 = vsel %vm1662_vm5, %v1598_v7, 0.0  ;;  %v5636_v27 = vmul.f32 %v4096_v50, %v5253_v38  ;;  %v1477_v1 = vadd.f32 1e-12, %v5618_v32  ;;  %v1411_v7 = vmul.f32 %v5541_v39, %v5531_v44 }
 0x281   :  { %7003 = vst [vmem:[#allocation44_spill] sm:$0xff] %v5633_v28  ;;  %v4100_v31 = vpop.eup %4099  ;;  %4117 = vrcp.f32 %v1133_v14  ;;  %1806 = vadd.xlane.f32.xlu0 %v5633_v28  ;;  %v1131_v51 = vpop.xlane.xlu0 %1130  ;;  %v5643_v20 = vmul.f32 %v4098_v9, %v5255_v58  ;;  %v5649_v38 = vmul.f32 %v5543_v17, %v7004_v8  ;;  %v1476_v14 = vadd.f32 1e-12, %v5627_v35 }
 0x282   :  { %v4102_v50 = vpop.eup %4101  ;;  %4119 = vrcp.f32 %v1131_v51  ;;  %v1601_v11 = vmul.f32 %v4100_v31, %v1409_v60  ;;  %v5655_v58 = vadd.f32 -0.0025, %v5636_v27  ;;  %vm1669_vm11 = vcmp.gt.f32.partialorder %v5618_v32, 0.0 }
 0x283   :  { %v4104_v48 = vpop.eup %4103  ;;  %3728 = vmatprep.mubr.f32.mxu0 %v5643_v20  ;;  %v1603_v28 = vmul.f32 %v4102_v50, %v1411_v7  ;;  %4121 = vrcp.f32 %v1477_v1  ;;  %v5658_v44 = vadd.f32 -0.0025, %v5643_v20  ;;  %v5676_v31 = vadd.f32 -0.0025, %v5649_v38 }
 0x284   :  { %v4106_v8 = vpop.eup %4105  ;;  %3729 = vmatmul.mubr.f32.gmra.mrb[56].mxu0 %v5636_v27  ;;  %v5661_v51 = vpop.xlane.xlu1 %1160  ;;  %v5663_v60 = vsel %vm1665_vm6, %v1601_v11, 0.0  ;;  %v5666_v17 = vmul.f32 %v4104_v48, %v5263_v22  ;;  %4123 = vrcp.f32 %v1476_v14  ;;  %v1493_v7 = vadd.f32 1e-12, %v5630_v5 }
 0x285   :  { %7005 = vst [vmem:[#allocation22_spill] sm:$0xff] %v5663_v60  ;;  %v4108_v9 = vpop.eup %4107  ;;  %4125 = vrcp.f32 %v5448_v54  ;;  %1812 = vadd.xlane.f32.xlu1 %v5663_v60  ;;  %v5673_v1 = vmul.f32 %v4106_v8, %v5265_v42  ;;  %v1479_v48 = vadd.f32 1e-12, %v5655_v58  ;;  %v5685_v2 = vsel %vm1667_vm7, %v1603_v28, 0.0  ;;  %v7008_v60 = vld [vmem:[#allocation23_spill] sm:$0xff] }
 0x286   :  { %v5679_v50 = vpop.eup %4109  ;;  %v1600_v22 = vmul.f32 %v4108_v9, %v1408_v57  ;;  %7006 = vst [vmem:[#allocation45_spill] sm:$0xff] %v5685_v2  ;;  %v1410_v42 = vmul.f32 %v5591_v4, %v5575_v15  ;;  %v1478_v11 = vadd.f32 1e-12, %v5658_v44  ;;  %v5691_v14 = vadd.f32 -0.0025, %v5666_v17 }
 0x287   :  { %v4112_v54 = vpop.eup %4111  ;;  %3731 = vmatprep.mubr.f32.mxu0 %v5673_v1  ;;  %4127 = vrcp.f32 %v1479_v48  ;;  %v5702_v28 = vadd.f32 -0.0025, %v5673_v1  ;;  %v1159_v48 = vpop.xlane.xlu0 %1158  ;;  %vm1668_vm12 = vcmp.gt.f32.partialorder %v5627_v35, 0.0  ;;  %vm1671_vm13 = vcmp.gt.f32.partialorder %v5655_v58, 0.0 }
 0x288   :  { %v4114_v8 = vpop.eup %4113  ;;  %3732 = vmatmul.mubr.f32.gmra.mrb[58].mxu0 %v5666_v17  ;;  %v5694_v39 = vpop.xlane.xlu1 %1164  ;;  %v5696_v0 = vsel %vm1664_vm8, %v1600_v22, 0.0  ;;  %v5699_v57 = vmul.f32 %v4112_v54, %v5273_v34  ;;  %4129 = vrcp.f32 %v5394_v37  ;;  %v1481_v22 = vadd.f32 1e-12, %v5691_v14 }
 0x289   :  { %7007 = vst [vmem:[#allocation46_spill] sm:$0xff] %v5696_v0  ;;  %v4116_v15 = vpop.eup %4115  ;;  %1816 = vadd.xlane.f32.xlu1 %v5685_v2  ;;  %1810 = vadd.xlane.f32.xlu0 %v5696_v0  ;;  %v5708_v9 = vmul.f32 %v4114_v8, %v5275_v43  ;;  %v5713_v34 = vmul.f32 %v5561_v21, %v7008_v60  ;;  %4131 = vrcp.f32 %v5405_v16  ;;  %v1490_v37 = vadd.f32 1e-12, %v5676_v31 }
 0x28a   :  { %v1602_v54 = vmul.f32 %v4116_v15, %v1410_v42  ;;  %v1413_v43 = vmul.f32 %v5618_v32, %v5602_v23  ;;  %4133 = vrcp.f32 %v1478_v11  ;;  %v1480_v8 = vadd.f32 1e-12, %v5702_v28 }
 0x28b   :  { %v4118_v2 = vpop.eup %4117  ;;  %3734 = vmatprep.mubr.f32.mxu0 %v5708_v9  ;;  %v5723_v21 = vadd.f32 -0.0025, %v5699_v57  ;;  %4135 = vrcp.f32 %v1481_v22  ;;  %v5734_v15 = vadd.f32 -0.0025, %v5708_v9  ;;  %v1412_v0 = vmul.f32 %v5627_v35, %v5608_v10 }
 0x28c   :  { %v4120_v60 = vpop.eup %4119  ;;  %3735 = vmatmul.mubr.f32.gmra.mrb[60].mxu0 %v5699_v57  ;;  %v5726_v16 = vpop.xlane.xlu1 %1168  ;;  %v5728_v4 = vsel %vm1666_vm9, %v1602_v54, 0.0  ;;  %v5731_v42 = vmul.f32 %v4118_v2, %v5283_v61  ;;  %4137 = vrcp.f32 %v1493_v7  ;;  %v5746_v22 = vadd.f32 -0.0025, %v5713_v34 }
 0x28d   :  { %v4122_v23 = vpop.eup %4121  ;;  %1814 = vadd.xlane.f32.xlu0 %v5728_v4  ;;  %v5738_v11 = vmul.f32 %v4120_v60, %v5285_v45  ;;  %v1483_v26 = vadd.f32 1e-12, %v5723_v21  ;;  %4139 = vrcp.f32 %v1490_v37  ;;  %v1482_v10 = vadd.f32 1e-12, %v5734_v15  ;;  %v1163_v60 = vpop.xlane.xlu0 %1162 }
 0x28e   :  { %v4124_v61 = vpop.eup %4123  ;;  %v1605_v2 = vmul.f32 %v4122_v23, %v1413_v43  ;;  %4141 = vrcp.f32 %v1480_v8  ;;  %v5757_v32 = vadd.f32 -0.0025, %v5731_v42  ;;  %v7011_v8 = vld [vmem:[#allocation25_spill] sm:$0xff]  ;;  %vm1670_vm14 = vcmp.gt.f32.partialorder %v5658_v44, 0.0 }
 0x28f   :  { %v4126_v54 = vpop.eup %4125  ;;  %3737 = vmatprep.mubr.f32.mxu0 %v5738_v11  ;;  %v1604_v45 = vmul.f32 %v4124_v61, %v1412_v0  ;;  %4143 = vrcp.f32 %v1483_v26  ;;  %v5760_v37 = vadd.f32 -0.0025, %v5738_v11  ;;  %v1415_v0 = vmul.f32 %v5655_v58, %v5636_v27 }
 0x290   :  { %3738 = vmatmul.mubr.f32.gmra.mrb[62].mxu0 %v5731_v42  ;;  %v5752_v7 = vpop.xlane.xlu1 %1172  ;;  %v5754_v43 = vsel %vm1669_vm11, %v1605_v2, 0.0  ;;  %4145 = vrcp.f32 %v5661_v51  ;;  %v5771_v26 = vmul.f32 %v5679_v50, %v7011_v8  ;;  %v1485_v61 = vadd.f32 1e-12, %v5757_v32  ;;  %v7012_v50 = vld [vmem:[#allocation24_spill] sm:$0xff] }
 0x291   :  { %7009 = vst [vmem:[#allocation23_spill] sm:$0xff] %v5754_v43  ;;  %1820 = vadd.xlane.f32.xlu1 %v5754_v43  ;;  %v5764_v35 = vsel %vm1668_vm12, %v1604_v45, 0.0  ;;  %3740 = vmatprep.mubr.f32.mxu0 %v5420_v63  ;;  %v4128_v23 = vpop.eup %4127  ;;  %4147 = vrcp.f32 %v1159_v48  ;;  %v1614_v51 = vmul.f32 %v5497_v49, %v5586_v40  ;;  %v5779_v2 = vmul.f32 %v5504_v25, %v5484_v47 }
 0x292   :  { %7010 = vst [vmem:[#allocation47_spill] sm:$0xff] %v5764_v35  ;;  %1818 = vadd.xlane.f32.xlu0 %v5764_v35  ;;  %v4130_v63 = vpop.eup %4129  ;;  %v1607_v45 = vmul.f32 %v4128_v23, %v1415_v0  ;;  %4149 = vrcp.f32 %v1482_v10  ;;  %v1484_v27 = vadd.f32 1e-12, %v5760_v37  ;;  %v5783_v8 = vmul.f32 %v4126_v54, %v7012_v50  ;;  %v1167_v23 = vpop.xlane.xlu0 %1166 }
 0x293   :  { %v4132_v48 = vpop.eup %4131  ;;  %v1414_v49 = vmul.f32 %v5658_v44, %v5643_v20  ;;  %4151 = vrcp.f32 %v1485_v61  ;;  %v1495_v40 = vadd.f32 1e-12, %v5746_v22  ;;  %v5799_v54 = vadd.f32 -0.0025, %v5771_v26  ;;  %v7013_v61 = vld [vmem:[#allocation26_spill] sm:$0xff] }
 0x294   :  { %3741 = vmatmul.mubr.f32.gmra.mrb[64].mxu0 %v5432_v6  ;;  %v5786_v35 = vpop.xlane.xlu1 %1174  ;;  %v4134_v0 = vpop.eup %4133  ;;  %4153 = vrcp.f32 %v5694_v39  ;;  %v5793_v10 = vsel %vm1671_vm13, %v1607_v45, 0.0  ;;  %v1417_v6 = vmul.f32 %v5691_v14, %v5666_v17  ;;  %v5803_v50 = vmul.f32 %v4130_v63, %v7013_v61 }
 0x295   :  { %3743 = vmatprep.mubr.f32.mxu0 %v5469_v52  ;;  %v4136_v58 = vpop.eup %4135  ;;  %1824 = vadd.xlane.f32.xlu1 %v5793_v10  ;;  %v1606_v20 = vmul.f32 %v4134_v0, %v1414_v49  ;;  %4155 = vrcp.f32 %v1484_v27  ;;  %v5807_v39 = vsel %vm1678_vm10, %v1614_v51, 0.0  ;;  %v5813_v45 = vadd.f32 -0.0025, %v5783_v8 }
 0x296   :  { %v5809_v52 = vpop.eup %4137  ;;  %4157 = vrcp.f32 %v1163_v60  ;;  %v1609_v17 = vmul.f32 %v4136_v58, %v1417_v6  ;;  %vm1673_vm15 = vcmp.gt.f32.partialorder %v5691_v14, 0.0  ;;  %v1416_v53 = vmul.f32 %v5702_v28, %v5673_v1  ;;  %v7014_v60 = vld [vmem:[#allocation10_spill] sm:$0xff] }
 0x297   :  { %v5815_v43 = vpop.eup %4139  ;;  %v5817_v49 = vsel %vm1670_vm14, %v1606_v20, 0.0  ;;  %v5826_v51 = vmul.f32 %v4132_v48, %v7014_v60  ;;  %v1492_v0 = vadd.f32 1e-12, %v5799_v54  ;;  %4159 = vrcp.f32 %v1495_v40  ;;  %v1171_v20 = vpop.xlane.xlu0 %1170 }
 0x298   :  { %3744 = vmatmul.mubr.f32.gmra.mrb[66].mxu0 %v5454_v46  ;;  %v5820_v63 = vpop.xlane.xlu1 %1176  ;;  %v4142_v44 = vpop.eup %4141  ;;  %1822 = vadd.xlane.f32.xlu0 %v5817_v49  ;;  %v5829_v27 = vsel %vm1673_vm15, %v1609_v17, 0.0  ;;  %v1419_v46 = vmul.f32 %v5723_v21, %v5699_v57  ;;  %4161 = vrcp.f32 %v5726_v16  ;;  %v1615_v48 = vmul.f32 %v5538_v56, %v5582_v62 }
 0x299   :  { %3746 = vmatprep.mubr.f32.mxu0 %v5649_v38  ;;  %v4144_v14 = vpop.eup %4143  ;;  %1828 = vadd.xlane.f32.xlu1 %v5829_v27  ;;  %v1608_v1 = vmul.f32 %v4142_v44, %v1416_v53  ;;  %v5841_v6 = vadd.f32 -0.0025, %v5803_v50  ;;  %4163 = vrcp.f32 %v1167_v23  ;;  %vm1672_vm2 = vcmp.gt.f32.partialorder %v5702_v28, 0.0 }
 0x29a   :  { %v4146_v58 = vpop.eup %4145  ;;  %v1611_v57 = vmul.f32 %v4144_v14, %v1419_v46  ;;  %v5846_v40 = vmul.f32 %v5630_v5, %v5595_v41  ;;  %vm1675_vm3 = vcmp.gt.f32.partialorder %v5723_v21, 0.0  ;;  %v1418_v62 = vmul.f32 %v5734_v15, %v5708_v9 }
 0x29b   :  { %v4148_v16 = vpop.eup %4147  ;;  %v5848_v61 = vsel %vm1672_vm2, %v1608_v1, 0.0  ;;  %v5856_v28 = vadd.f32 -0.0025, %v5826_v51  ;;  %vm1680_vm5 = vcmp.gt.f32.partialorder %v5490_v13, 0.0  ;;  %4165 = vrcp.f32 %v1492_v0 }
 0x29c   :  { %3747 = vmatmul.mubr.f32.gmra.mrb[68].mxu0 %v5484_v47  ;;  %v1179_v56 = vpop.xlane.xlu1 %1178  ;;  %v4150_v23 = vpop.eup %4149  ;;  %1826 = vadd.xlane.f32.xlu0 %v5848_v61  ;;  %v5859_v17 = vsel %vm1675_vm3, %v1611_v57, 0.0  ;;  %v1421_v47 = vmul.f32 %v5757_v32, %v5731_v42  ;;  %v1497_v9 = vadd.f32 1e-12, %v5813_v45  ;;  %4167 = vrcp.f32 %v5752_v7 }
 0x29d   :  { %3749 = vmatprep.mubr.f32.mxu0 %v5771_v26  ;;  %v4152_v21 = vpop.eup %4151  ;;  %1832 = vadd.xlane.f32.xlu1 %v5859_v17  ;;  %v1610_v53 = vmul.f32 %v4150_v23, %v1418_v62  ;;  %v1617_v60 = vmul.f32 %v5559_v59, %v5613_v33  ;;  %v1494_v44 = vadd.f32 1e-12, %v5841_v6  ;;  %4169 = vrcp.f32 %v1171_v20 }
 0x29e   :  { %v4154_v46 = vpop.eup %4153  ;;  %vm1674_vm6 = vcmp.gt.f32.partialorder %v5734_v15, 0.0  ;;  %v1613_v42 = vmul.f32 %v4152_v21, %v1421_v47  ;;  %v1420_v0 = vmul.f32 %v5760_v37, %v5738_v11  ;;  %vm1683_vm7 = vcmp.gt.f32.partialorder %v5504_v25, 0.0 }
 0x29f   :  { %v4156_v14 = vpop.eup %4155  ;;  %v5875_v7 = vsel %vm1674_vm6, %v1610_v53, 0.0  ;;  %vm1677_vm8 = vcmp.gt.f32.partialorder %v5757_v32, 0.0  ;;  %v5880_v59 = vmul.f32 %v4146_v58, %v5291_v29  ;;  %v1496_v33 = vadd.f32 1e-12, %v5856_v28 }
 0x2a0   :  { %3750 = vmatmul.mubr.f32.gmra.mrb[70].mxu0 %v5595_v41  ;;  %v1181_v1 = vpop.xlane.xlu1 %1180  ;;  %v4158_v15 = vpop.eup %4157  ;;  %1830 = vadd.xlane.f32.xlu0 %v5875_v7  ;;  %v5884_v57 = vsel %vm1677_vm8, %v1613_v42, 0.0  ;;  %v1612_v11 = vmul.f32 %v4156_v14, %v1420_v0  ;;  %v5888_v20 = vmul.f32 %v4148_v16, %v5293_v55  ;;  %4171 = vrcp.f32 %v1497_v9  ;;  %v7017_v0 = vld [vmem:[#allocation13_spill] sm:$0xff] }
 0x2a1   :  { %3752 = vmatprep.mubr.f32.mxu0 %v5803_v50  ;;  %1836 = vadd.xlane.f32.xlu1 %v5884_v57  ;;  %vm1676_vm9 = vcmp.gt.f32.partialorder %v5760_v37, 0.0  ;;  %v1616_v29 = vmul.f32 %v5578_v24, %v5622_v19  ;;  %vm1685_vm10 = vcmp.gt.f32.partialorder %v5630_v5, 0.0  ;;  %4173 = vrcp.f32 %v1494_v44  ;;  %v4160_v41 = vpop.eup %4159 }
 0x2a2   :  { %4175 = vrcp.f32 %v5820_v63  ;;  %v5896_v32 = vsel %vm1676_vm9, %v1612_v11, 0.0  ;;  %v5900_v55 = vsel %vm1679_vm0, %v1615_v48, 0.0  ;;  %v5903_v58 = vmul.f32 %v4154_v46, %v5299_v12  ;;  %v4162_v16 = vpop.eup %4161  ;;  %v7015_v48 = vld [vmem:[#allocation14_spill] sm:$0xff] }
 0x2a3   :  { %v1619_v24 = vmul.f32 %v5615_v3, %v5779_v2  ;;  %v5909_v19 = vmul.f32 %v4158_v15, %v5301_v18  ;;  %4177 = vrcp.f32 %v1496_v33  ;;  %v5912_v63 = vadd.f32 -0.0025, %v5880_v59  ;;  %v4164_v30 = vpop.eup %4163 }
 0x2a4   :  { %3753 = vmatmul.mubr.f32.gmra.mrb[72].mxu0 %v5713_v34  ;;  %v1183_v37 = vpop.xlane.xlu1 %1182  ;;  %4179 = vrcp.f32 %v5786_v35  ;;  %1834 = vadd.xlane.f32.xlu0 %v5896_v32  ;;  %v5919_v12 = vsel %vm1681_vm4, %v1617_v60, 0.0  ;;  %v1426_v3 = vmul.f32 %v5676_v31, %v5649_v38  ;;  %v5924_v18 = vadd.f32 -0.0025, %v5888_v20 }
 0x2a5   :  { %3755 = vmatprep.mubr.f32.mxu0 %v5826_v51  ;;  %4181 = vrcp.f32 %v1179_v56  ;;  %1840 = vadd.xlane.f32.xlu1 %v5900_v55  ;;  %v5929_v35 = vsel %vm1680_vm5, %v1616_v29, 0.0  ;;  %vm1682_vm11 = vcmp.gt.f32.partialorder %v5676_v31, 0.0  ;;  %v1621_v36 = vmul.f32 %v5809_v52, %v5846_v40  ;;  %v4166_v2 = vpop.eup %4165  ;;  %v7016_v52 = vld [vmem:[#allocation16_spill] sm:$0xff] }
 0x2a6   :  { %4183 = vrcp.f32 %v1181_v1  ;;  %v5935_v62 = vmul.f32 %v4162_v16, %v7015_v48  ;;  %v1431_v38 = vmul.f32 %v5746_v22, %v5713_v34  ;;  %v5940_v56 = vadd.f32 -0.0025, %v5903_v58  ;;  %v4168_v23 = vpop.eup %4167 }
 0x2a7   :  { %v5945_v47 = vsel %vm1683_vm7, %v1619_v24, 0.0  ;;  %v5948_v40 = vmul.f32 %v4164_v30, %v7016_v52  ;;  %v1499_v9 = vadd.f32 1e-12, %v5912_v63  ;;  %v5952_v21 = vadd.f32 -0.0025, %v5909_v19  ;;  %v4170_v34 = vpop.eup %4169 }
 0x2a8   :  { %3756 = vmatmul.mubr.f32.gmra.mrb[74].mxu0 %v5783_v8  ;;  %v1185_v13 = vpop.xlane.xlu1 %1184  ;;  %1838 = vadd.xlane.f32.xlu0 %v5807_v39  ;;  %v1618_v53 = vmul.f32 %v5815_v43, %v1426_v3  ;;  %v1623_v60 = vmul.f32 %v4160_v41, %v1431_v38  ;;  %vm1687_vm12 = vcmp.gt.f32.partialorder %v5746_v22, 0.0  ;;  %v1498_v25 = vadd.f32 1e-12, %v5924_v18 }
 0x2a9   :  { %3758 = vmatprep.mubr.f32.mxu0 %v5888_v20  ;;  %1844 = vadd.xlane.f32.xlu1 %v5919_v12  ;;  %v5962_v44 = vsel %vm1685_vm10, %v1621_v36, 0.0  ;;  %v1428_v46 = vmul.f32 %v5799_v54, %v5771_v26  ;;  %vm1684_vm13 = vcmp.gt.f32.partialorder %v5799_v54, 0.0  ;;  %v1433_v42 = vmul.f32 %v5813_v45, %v5783_v8  ;;  %v7018_v26 = vld [vmem:[#allocation17_spill] sm:$0xff] }
 0x2aa   :  { %v4172_v43 = vpop.eup %4171  ;;  %4185 = vrcp.f32 %v1185_v13  ;;  %v5970_v14 = vmul.f32 %v4168_v23, %v7017_v0  ;;  %v1501_v1 = vadd.f32 1e-12, %v5940_v56  ;;  %v5974_v33 = vadd.f32 -0.0025, %v5935_v62 }
 0x2ab   :  { %v4174_v5 = vpop.eup %4173  ;;  %v5978_v11 = vmul.f32 %v4170_v34, %v7018_v26  ;;  %4187 = vrcp.f32 %v1499_v9  ;;  %v1500_v8 = vadd.f32 1e-12, %v5952_v21  ;;  %v5982_v29 = vadd.f32 -0.0025, %v5948_v40  ;;  %v7021_v26 = vld [vmem:[#allocation6_spill] sm:$0xff] }
 0x2ac   :  { %3759 = vmatmul.mubr.f32.gmra.mrb[76].mxu0 %v5880_v59  ;;  %v1187_v15 = vpop.xlane.xlu1 %1186  ;;  %v4176_v41 = vpop.eup %4175  ;;  %1842 = vadd.xlane.f32.xlu0 %v5929_v35  ;;  %v5987_v16 = vsel %vm1682_vm11, %v1618_v53, 0.0  ;;  %v5992_v24 = vsel %vm1687_vm12, %v1623_v60, 0.0  ;;  %vm1689_vm14 = vcmp.gt.f32.partialorder %v5813_v45, 0.0  ;;  %4189 = vrcp.f32 %v1498_v25 }
 0x2ad   :  { %3761 = vmatprep.mubr.f32.mxu0 %v5909_v19  ;;  %v4178_v30 = vpop.eup %4177  ;;  %4191 = vrcp.f32 %v1183_v37  ;;  %1848 = vadd.xlane.f32.xlu1 %v5945_v47  ;;  %v1620_v3 = vmul.f32 %v4166_v2, %v1428_v46  ;;  %v1430_v36 = vmul.f32 %v5841_v6, %v5803_v50  ;;  %vm1686_vm15 = vcmp.gt.f32.partialorder %v5841_v6, 0.0  ;;  %v7019_v2 = vld [vmem:[#allocation7_spill] sm:$0xff]  ;;  %v7020_v46 = vld [vmem:[#allocation5_spill] sm:$0xff] }
 0x2ae   :  { %v4180_v31 = vpop.eup %4179  ;;  %v1432_v48 = vmul.f32 %v5856_v28, %v5826_v51  ;;  %4193 = vrcp.f32 %v1501_v1  ;;  %v1503_v22 = vadd.f32 1e-12, %v5974_v33  ;;  %v6003_v38 = vadd.f32 -0.0025, %v5970_v14 }
 0x2af   :  { %v4182_v23 = vpop.eup %4181  ;;  %v6007_v13 = vmul.f32 %v4176_v41, %v7019_v2  ;;  %4195 = vrcp.f32 %v1500_v8  ;;  %v1502_v50 = vadd.f32 1e-12, %v5982_v29  ;;  %v6011_v52 = vadd.f32 -0.0025, %v5978_v11 }
 0x2b0   :  { %3762 = vmatmul.mubr.f32.gmra.mrb[78].mxu0 %v5903_v58  ;;  %v1189_v37 = vpop.xlane.xlu1 %1188  ;;  %v4184_v51 = vpop.eup %4183  ;;  %1846 = vadd.xlane.f32.xlu0 %v5987_v16  ;;  %v1622_v9 = vmul.f32 %v4174_v5, %v1430_v36  ;;  %v1625_v34 = vmul.f32 %v4172_v43, %v1433_v42  ;;  %v1624_v53 = vmul.f32 %v4178_v30, %v1432_v48  ;;  %v6018_v60 = vsel %vm1684_vm13, %v1620_v3, 0.0  ;;  %v7022_v5 = vld [vmem:[#allocation9_spill] sm:$0xff] }
 0x2b1   :  { %4197 = vrcp.f32 %v1189_v37  ;;  %3764 = vmatprep.mubr.f32.mxu0 %v5948_v40  ;;  %1852 = vadd.xlane.f32.xlu1 %v5962_v44  ;;  %v1777_v25 = vpop.xlane.xlu0 %1776  ;;  %vm1688_vm0 = vcmp.gt.f32.partialorder %v5856_v28, 0.0  ;;  %v6022_v0 = vmul.f32 %v4180_v31, %v7020_v46  ;;  %v6025_v8 = vmul.f32 %v4182_v23, %v7021_v26 }
 0x2b2   :  { %4199 = vrcp.f32 %v1187_v15  ;;  %v1903_v1 = vmax.f32 %v1777_v25, 1e-12  ;;  %v1505_v42 = vadd.f32 1e-12, %v6003_v38  ;;  %v6030_v54 = vmul.f32 %v4184_v51, %v7022_v5 }
 0x2b3   :  { %4201 = vrcp.f32 %v1503_v22  ;;  %v1504_v15 = vadd.f32 1e-12, %v6011_v52  ;;  %v6034_v41 = vadd.f32 -0.0025, %v6007_v13  ;;  %v6039_v3 = vsel %vm1686_vm15, %v1622_v9, 0.0  ;;  %v7024_v9 = vld [vmem:[#allocation12_spill] sm:$0xff] }
 0x2b4   :  { %3765 = vmatmul.mubr.f32.gmra.mrb[80].mxu0 %v5935_v62  ;;  %v1191_v43 = vpop.xlane.xlu1 %1190  ;;  %4203 = vrcp.f32 %v1502_v50  ;;  %v4186_v30 = vpop.eup %4185  ;;  %1850 = vadd.xlane.f32.xlu0 %v6018_v60  ;;  %v6044_v36 = vsel %vm1689_vm14, %v1625_v34, 0.0  ;;  %v6048_v31 = vsel %vm1688_vm0, %v1624_v53, 0.0  ;;  %v1435_v6 = vmul.f32 %v5912_v63, %v5880_v59 }
 0x2b5   :  { %4205 = vrcp.f32 %v1903_v1  ;;  %3767 = vmatprep.mubr.f32.mxu0 %v5978_v11  ;;  %7023 = vst [vmem:[#allocation25_spill] sm:$0xff] %v6048_v31  ;;  %v4188_v48 = vpop.eup %4187  ;;  %1856 = vadd.xlane.f32.xlu1 %v5992_v24  ;;  %v1775_v22 = vpop.xlane.xlu0 %1774  ;;  %vm1691_vm2 = vcmp.gt.f32.partialorder %v5912_v63, 0.0  ;;  %v6055_v23 = vadd.f32 -0.0025, %v6022_v0  ;;  %v1434_v28 = vmul.f32 %v5924_v18, %v5888_v20 }
 0x2b6   :  { %4207 = vrcp.f32 %v1191_v43  ;;  %v4190_v45 = vpop.eup %4189  ;;  %v1902_v37 = vmax.f32 %v1775_v22, 1e-12  ;;  %v6060_v2 = vadd.f32 -0.0025, %v6025_v8  ;;  %v6064_v59 = vmul.f32 %v4186_v30, %v7024_v9 }
 0x2b7   :  { %4209 = vrcp.f32 %v1505_v42  ;;  %v4192_v50 = vpop.eup %4191  ;;  %v1507_v34 = vadd.f32 1e-12, %v6034_v41  ;;  %v6068_v53 = vadd.f32 -0.0025, %v6030_v54  ;;  %v1627_v20 = vmul.f32 %v4188_v48, %v1435_v6  ;;  %v7026_v6 = vld [vmem:[#allocation15_spill] sm:$0xff] }
 0x2b8   :  { %3768 = vmatmul.mubr.f32.gmra.mrb[82].mxu0 %v5970_v14  ;;  %v1193_v51 = vpop.xlane.xlu1 %1192  ;;  %4211 = vrcp.f32 %v1504_v15  ;;  %v4194_v25 = vpop.eup %4193  ;;  %1854 = vadd.xlane.f32.xlu0 %v6039_v3  ;;  %vm1690_vm3 = vcmp.gt.f32.partialorder %v5924_v18, 0.0  ;;  %v1437_v46 = vmul.f32 %v5940_v56, %v5903_v58  ;;  %v1626_v26 = vmul.f32 %v4190_v45, %v1434_v28  ;;  %v7025_v15 = vld [vmem:[#allocation8_spill] sm:$0xff] }
 0x2b9   :  { %4213 = vrcp.f32 %v1902_v37  ;;  %3770 = vmatprep.mubr.f32.mxu0 %v6022_v0  ;;  %v4196_v1 = vpop.eup %4195  ;;  %1860 = vadd.xlane.f32.xlu1 %v6044_v36  ;;  %vm1693_vm4 = vcmp.gt.f32.partialorder %v5940_v56, 0.0  ;;  %v1506_v42 = vadd.f32 1e-12, %v6055_v23  ;;  %v1436_v5 = vmul.f32 %v5952_v21, %v5909_v19 }
 0x2ba   :  { %4215 = vrcp.f32 %v1193_v51  ;;  %vm1692_vm5 = vcmp.gt.f32.partialorder %v5952_v21, 0.0  ;;  %v6082_v30 = vmul.f32 %v4192_v50, %v7025_v15  ;;  %v1508_v58 = vadd.f32 1e-12, %v6060_v2 }
 0x2bb   :  { %v4198_v43 = vpop.eup %4197  ;;  %4217 = vrcp.f32 %v1507_v34  ;;  %v1509_v37 = vadd.f32 1e-12, %v6068_v53  ;;  %v6091_v28 = vadd.f32 -0.0025, %v6064_v59  ;;  %v6096_v50 = vsel %vm1691_vm2, %v1627_v20, 0.0 }
 0x2bc   :  { %v4200_v48 = vpop.eup %4199  ;;  %3771 = vmatmul.mubr.f32.gmra.mrb[84].mxu0 %v6007_v13  ;;  %v1197_v22 = vpop.xlane.xlu1 %1196  ;;  %v6087_v45 = vmul.f32 %v4198_v43, %v7026_v6  ;;  %1858 = vadd.xlane.f32.xlu0 %v6048_v31  ;;  %7027 = vst [vmem:[#allocation24_spill] sm:$0xff] %v6096_v50  ;;  %v1629_v51 = vmul.f32 %v4194_v25, %v1437_v46  ;;  %v6104_v43 = vsel %vm1690_vm3, %v1626_v26, 0.0  ;;  %vm1695_vm6 = vcmp.gt.f32.partialorder %v5974_v33, 0.0  ;;  %v7030_v46 = vld [vmem:[#allocation27_spill] sm:$0xff] }
 0x2bd   :  { %v4202_v19 = vpop.eup %4201  ;;  %4219 = vrcp.f32 %v1197_v22  ;;  %3773 = vmatprep.mubr.f32.mxu0 %v6025_v8  ;;  %v1439_v9 = vmul.f32 %v5974_v33, %v5935_v62  ;;  %1864 = vadd.xlane.f32.xlu1 %v6096_v50  ;;  %7028 = vst [vmem:[#allocation26_spill] sm:$0xff] %v6104_v43  ;;  %v1628_v6 = vmul.f32 %v4196_v1, %v1436_v5  ;;  %v7029_v22 = vld [vmem:[#allocation11_spill] sm:$0xff]  ;;  %v6111_v62 = vadd.f32 -0.0025, %v6082_v30 }
 0x2be   :  { %v4204_v34 = vpop.eup %4203  ;;  %v1781_v15 = vpop.xlane.xlu0 %1780  ;;  %4221 = vrcp.f32 %v1506_v42  ;;  %v6108_v31 = vmul.f32 %v4200_v48, %v7029_v22  ;;  %v1511_v1 = vadd.f32 1e-12, %v6091_v28  ;;  %v6117_v42 = vadd.f32 -0.0025, %v6087_v45 }
 0x2bf   :  { %v4206_v63 = vpop.eup %4205  ;;  %v1905_v20 = vmax.f32 %v1781_v15, 1e-12  ;;  %4223 = vrcp.f32 %v1508_v58  ;;  %v6122_v58 = vsel %vm1693_vm4, %v1629_v51, 0.0  ;;  %v1631_v48 = vmul.f32 %v4202_v19, %v1439_v9 }
 0x2c0   :  { %v4208_v25 = vpop.eup %4207  ;;  %3774 = vmatmul.mubr.f32.gmra.mrb[86].mxu0 %v6030_v54  ;;  %v1195_v18 = vpop.xlane.xlu1 %1194  ;;  %v2031_v26 = vmul.f32 %v4206_v63, %v7030_v46  ;;  %4225 = vrcp.f32 %v1509_v37  ;;  %1862 = vadd.xlane.f32.xlu0 %v6104_v43  ;;  %7031 = vst [vmem:[#allocation10_spill] sm:$0xff] %v6122_v58  ;;  %v1438_v15 = vmul.f32 %v5982_v29, %v5948_v40  ;;  %v6130_v63 = vsel %vm1692_vm5, %v1628_v6, 0.0 }
 0x2c1   :  { %v4210_v5 = vpop.eup %4209  ;;  %4227 = vrcp.f32 %v1905_v20  ;;  %3776 = vmatprep.mubr.f32.mxu0 %v6082_v30  ;;  %1868 = vadd.xlane.f32.xlu1 %v6122_v58  ;;  %v1441_v56 = vmul.f32 %v6003_v38, %v5970_v14  ;;  %v1440_v51 = vmul.f32 %v6011_v52, %v5978_v11  ;;  %v7032_v20 = vld [vmem:[#allocation28_spill] sm:$0xff]  ;;  %v6141_v46 = vadd.f32 -0.0025, %v6108_v31  ;;  %v7033_v58 = vld [vmem:[#allocation29_spill] sm:$0xff] }
 0x2c2   :  { %v4212_v37 = vpop.eup %4211  ;;  %4229 = vrcp.f32 %v1195_v18  ;;  %v1779_v22 = vpop.xlane.xlu0 %1778  ;;  %2993 = vst [vmem:[#allocation2 + $0x8] sm:$0xff] %v2031_v26  ;;  %v6137_v40 = vmul.f32 %v4208_v25, %v7032_v20  ;;  %v1510_v18 = vadd.f32 1e-12, %v6111_v62  ;;  %v1630_v6 = vmul.f32 %v4204_v34, %v1438_v15 }
 0x2c3   :  { %v4214_v19 = vpop.eup %4213  ;;  %v1904_v9 = vmax.f32 %v1779_v22, 1e-12  ;;  %4231 = vrcp.f32 %v1511_v1  ;;  %v1513_v14 = vadd.f32 1e-12, %v6117_v42  ;;  %v6149_v11 = vsel %vm1695_vm6, %v1631_v48, 0.0  ;;  %v7034_v22 = vld [vmem:[#allocation30_spill] sm:$0xff] }
 0x2c4   :  { %v4216_v21 = vpop.eup %4215  ;;  %3777 = vmatmul.mubr.f32.gmra.mrb[88].mxu0 %v6064_v59  ;;  %v2030_v43 = vmul.f32 %v4214_v19, %v7033_v58  ;;  %1866 = vadd.xlane.f32.xlu0 %v6130_v63  ;;  %v1633_v25 = vmul.f32 %v4210_v5, %v1441_v56  ;;  %vm1694_vm7 = vcmp.gt.f32.partialorder %v5982_v29, 0.0  ;;  %v1632_v34 = vmul.f32 %v4212_v37, %v1440_v51  ;;  %v7035_v29 = vld [vmem:[#allocation31_spill] sm:$0xff] }
 0x2c5   :  { %4233 = vrcp.f32 %v1904_v9  ;;  %3779 = vmatprep.mubr.f32.mxu0 %v6108_v31  ;;  %v6153_v20 = vmul.f32 %v4216_v21, %v7034_v22  ;;  %v4218_v50 = vpop.eup %4217  ;;  %1872 = vadd.xlane.f32.xlu1 %v6149_v11  ;;  %v1443_v1 = vmul.f32 %v6034_v41, %v6007_v13  ;;  %v1512_v58 = vadd.f32 1e-12, %v6141_v46 }
 0x2c6   :  { %3564 = vmatprep.mubr.f32.mxu1 %v2030_v43  ;;  %2992 = vst [vmem:[#allocation2] sm:$0xff] %v2030_v43  ;;  %4235 = vrcp.f32 %v1510_v18  ;;  %v6164_v48 = vadd.f32 -0.0025, %v6137_v40  ;;  %v6166_v56 = vsel %vm1694_vm7, %v1630_v6, 0.0  ;;  %vm1697_vm8 = vcmp.gt.f32.partialorder %v6003_v38, 0.0 }
 0x2c7   :  { %v4220_v33 = vpop.eup %4219  ;;  %3565 = vmatmul.mubr.f32.vlgmr.msra.gmra.mrb[32].mxu1 %v2031_v26  ;;  %v6161_v5 = vadd.f32 -0.0025, %v6153_v20  ;;  %4237 = vrcp.f32 %v1513_v14  ;;  %v6174_v26 = vsel %vm1697_vm8, %v1633_v25, 0.0  ;;  %vm1696_vm9 = vcmp.gt.f32.partialorder %v6011_v52, 0.0 }
 0x2c8   :  { %v4222_v15 = vpop.eup %4221  ;;  %3780 = vmatmul.mubr.f32.gmra.mrb[90].mxu0 %v6087_v45  ;;  %v6171_v13 = vmul.f32 %v4220_v33, %v7035_v29  ;;  %1870 = vadd.xlane.f32.xlu0 %v6166_v56  ;;  %v1635_v37 = vmul.f32 %v4218_v50, %v1443_v1  ;;  %vm1699_vm10 = vcmp.gt.f32.partialorder %v6034_v41, 0.0  ;;  %v1442_v9 = vmul.f32 %v6055_v23, %v6022_v0  ;;  %v7036_v1 = vld [vmem:[#allocation32_spill] sm:$0xff] }
 0x2c9   :  { %v4224_v43 = vpop.eup %4223  ;;  %3782 = vmatprep.mubr.f32.mxu0 %v6137_v40  ;;  %v1515_v51 = vadd.f32 1e-12, %v6161_v5  ;;  %1876 = vadd.xlane.f32.xlu1 %v6174_v26  ;;  %v1445_v18 = vmul.f32 %v6068_v53, %v6030_v54  ;;  %v6188_v52 = vsel %vm1696_vm9, %v1632_v34, 0.0  ;;  %4239 = vrcp.f32 %v1512_v58  ;;  %v7037_v34 = vld [vmem:[#allocation33_spill] sm:$0xff] }
 0x2ca   :  { %v4226_v19 = vpop.eup %4225  ;;  %v1785_v38 = vpop.xlane.xlu0 %1784  ;;  %v6186_v21 = vadd.f32 -0.0025, %v6171_v13  ;;  %v1514_v14 = vadd.f32 1e-12, %v6164_v48  ;;  %v1634_v22 = vmul.f32 %v4222_v15, %v1442_v9  ;;  %v6197_v54 = vsel %vm1699_vm10, %v1635_v37, 0.0 }
 0x2cb   :  { %v4228_v6 = vpop.eup %4227  ;;  %v1907_v50 = vmax.f32 %v1785_v38, 1e-12  ;;  %4241 = vrcp.f32 %v1515_v51  ;;  %v1637_v29 = vmul.f32 %v4226_v19, %v1445_v18  ;;  %vm1698_vm11 = vcmp.gt.f32.partialorder %v6055_v23, 0.0 }
 0x2cc   :  { %v4230_v25 = vpop.eup %4229  ;;  %3783 = vmatmul.mubr.f32.gmra.mrb[92].mxu0 %v6153_v20  ;;  %v2033_v33 = vmul.f32 %v4228_v6, %v7036_v1  ;;  %v1517_v0 = vadd.f32 1e-12, %v6186_v21  ;;  %1874 = vadd.xlane.f32.xlu0 %v6188_v52  ;;  %vm1701_vm12 = vcmp.gt.f32.partialorder %v6068_v53, 0.0  ;;  %v1444_v51 = vmul.f32 %v6060_v2, %v6025_v8  ;;  %v7038_v6 = vld [vmem:[#allocation34_spill] sm:$0xff] }
 0x2cd   :  { %4243 = vrcp.f32 %v1907_v50  ;;  %v6200_v58 = vmul.f32 %v4230_v25, %v7037_v34  ;;  %v4232_v38 = vpop.eup %4231  ;;  %1880 = vadd.xlane.f32.xlu1 %v6197_v54  ;;  %v1447_v37 = vmul.f32 %v6091_v28, %v6064_v59  ;;  %v6213_v18 = vsel %vm1698_vm11, %v1634_v22, 0.0 }
 0x2ce   :  { %v1783_v15 = vpop.xlane.xlu0 %1782  ;;  %2995 = vst [vmem:[#allocation2 + $0x18] sm:$0xff] %v2033_v33  ;;  %4245 = vrcp.f32 %v1514_v14  ;;  %v1636_v23 = vmul.f32 %v4224_v43, %v1444_v51  ;;  %v6220_v25 = vsel %vm1701_vm12, %v1637_v29, 0.0  ;;  %v1446_v43 = vmul.f32 %v6111_v62, %v6082_v30 }
 0x2cf   :  { %v4234_v9 = vpop.eup %4233  ;;  %v1906_v41 = vmax.f32 %v1783_v15, 1e-12  ;;  %3785 = vmatprep.mubr.f32.mxu0 %v6200_v58  ;;  %v6211_v19 = vadd.f32 -0.0025, %v6200_v58  ;;  %4247 = vrcp.f32 %v1517_v0  ;;  %v1639_v59 = vmul.f32 %v4232_v38, %v1447_v37 }
 0x2d0   :  { %3786 = vmatmul.mubr.f32.gmra.mrb[94].mxu0 %v6171_v13  ;;  %v2032_v50 = vmul.f32 %v4234_v9, %v7038_v6  ;;  %v4236_v8 = vpop.eup %4235  ;;  %1878 = vadd.xlane.f32.xlu0 %v6213_v18  ;;  %vm1700_vm13 = vcmp.gt.f32.partialorder %v6060_v2, 0.0  ;;  %v1449_v22 = vmul.f32 %v6117_v42, %v6087_v45  ;;  %vm1703_vm14 = vcmp.gt.f32.partialorder %v6091_v28, 0.0 }
 0x2d1   :  { %4249 = vrcp.f32 %v1906_v41  ;;  %v1516_v14 = vadd.f32 1e-12, %v6211_v19  ;;  %v4238_v1 = vpop.eup %4237  ;;  %1884 = vadd.xlane.f32.xlu1 %v6220_v25  ;;  %v6229_v53 = vsel %vm1700_vm13, %v1636_v23, 0.0  ;;  %v1638_v0 = vmul.f32 %v4236_v8, %v1446_v43  ;;  %v7039_v41 = vld [vmem:[#allocation35_spill] sm:$0xff]  ;;  %v7040_v43 = vld [vmem:[#allocation36_spill] sm:$0xff] }
 0x2d2   :  { %3567 = vmatprep.mubr.f32.mxu1 %v2032_v50  ;;  %2994 = vst [vmem:[#allocation2 + $0x10] sm:$0xff] %v2032_v50  ;;  %v6233_v29 = vsel %vm1703_vm14, %v1639_v59, 0.0  ;;  %v1641_v38 = vmul.f32 %v4238_v1, %v1449_v22  ;;  %v1448_v30 = vmul.f32 %v6141_v46, %v6108_v31  ;;  %vm1702_vm15 = vcmp.gt.f32.partialorder %v6111_v62, 0.0 }
 0x2d3   :  { %3568 = vmatmul.mubr.f32.gmra.mrb[34].mxu1 %v2033_v33  ;;  %4251 = vrcp.f32 %v1516_v14  ;;  %v4240_v34 = vpop.eup %4239  ;;  %v1451_v28 = vmul.f32 %v6161_v5, %v6153_v20  ;;  %v6241_v51 = vsel %vm1702_vm15, %v1638_v0, 0.0  ;;  %vm1705_vm0 = vcmp.gt.f32.partialorder %v6117_v42, 0.0 }
 0x2d4   :  { %1882 = vadd.xlane.f32.xlu0 %v6229_v53  ;;  %v1640_v9 = vmul.f32 %v4240_v34, %v1448_v30  ;;  %v6246_v6 = vsel %vm1705_vm0, %v1641_v38, 0.0  ;;  %v1450_v20 = vmul.f32 %v6164_v48, %v6137_v40  ;;  %vm1704_vm2 = vcmp.gt.f32.partialorder %v6141_v46, 0.0 }
 0x2d5   :  { %v4242_v15 = vpop.eup %4241  ;;  %1888 = vadd.xlane.f32.xlu1 %v6233_v29  ;;  %vm1707_vm3 = vcmp.gt.f32.partialorder %v6161_v5, 0.0  ;;  %v1453_v59 = vmul.f32 %v6186_v21, %v6171_v13  ;;  %v1452_v0 = vmul.f32 %v6211_v19, %v6200_v58  ;;  %vm1706_vm4 = vcmp.gt.f32.partialorder %v6164_v48, 0.0 }
 0x2d6   :  { %v1789_v2 = vpop.xlane.xlu0 %1788  ;;  %v1643_v31 = vmul.f32 %v4242_v15, %v1451_v28  ;;  %v6255_v14 = vsel %vm1704_vm2, %v1640_v9, 0.0  ;;  %vm1709_vm5 = vcmp.gt.f32.partialorder %v6186_v21, 0.0  ;;  %vm1708_vm6 = vcmp.gt.f32.partialorder %v6211_v19, 0.0  ;;  %v7042_v9 = vld [vmem:[#allocation38_spill] sm:$0xff] }
 0x2d7   :  { %v4244_v45 = vpop.eup %4243  ;;  %v1909_v33 = vmax.f32 %v1789_v2, 1e-12 }
 0x2d8   :  { %v2035_v37 = vmul.f32 %v4244_v45, %v7039_v41  ;;  %v4246_v23 = vpop.eup %4245  ;;  %1886 = vadd.xlane.f32.xlu0 %v6241_v51  ;;  %v6261_v40 = vsel %vm1707_vm3, %v1643_v31, 0.0  ;;  %v7041_v45 = vld [vmem:[#allocation37_spill] sm:$0xff] }
 0x2d9   :  { %4253 = vrcp.f32 %v1909_v33  ;;  %v4248_v50 = vpop.eup %4247  ;;  %1892 = vadd.xlane.f32.xlu1 %v6246_v6  ;;  %v1642_v1 = vmul.f32 %v4246_v23, %v1450_v20 }
 0x2da   :  { %v1787_v62 = vpop.xlane.xlu0 %1786  ;;  %2997 = vst [vmem:[#allocation2 + $0x28] sm:$0xff] %v2035_v37  ;;  %v1645_v46 = vmul.f32 %v4248_v50, %v1453_v59 }
 0x2db   :  { %v4250_v8 = vpop.eup %4249  ;;  %v1908_v42 = vmax.f32 %v1787_v62, 1e-12  ;;  %v6265_v13 = vsel %vm1706_vm4, %v1642_v1, 0.0  ;;  %v7043_v62 = vld [vmem:[#allocation39_spill] sm:$0xff]  ;;  %v7044_v1 = vld [vmem:[#allocation40_spill] sm:$0xff] }
 0x2dc   :  { %v2034_v22 = vmul.f32 %v4250_v8, %v7040_v43  ;;  %1890 = vadd.xlane.f32.xlu0 %v6255_v14  ;;  %v6269_v58 = vsel %vm1709_vm5, %v1645_v46, 0.0 }
 0x2dd   :  { %v4252_v34 = vpop.eup %4251  ;;  %4255 = vrcp.f32 %v1908_v42  ;;  %1896 = vadd.xlane.f32.xlu1 %v6261_v40 }
 0x2de   :  { %3570 = vmatprep.mubr.f32.mxu1 %v2034_v22  ;;  %2996 = vst [vmem:[#allocation2 + $0x20] sm:$0xff] %v2034_v22  ;;  %v1644_v5 = vmul.f32 %v4252_v34, %v1452_v0 }
 0x2df   :  { %3571 = vmatmul.mubr.f32.gmra.mrb[36].mxu1 %v2035_v37 }
 0x2e0   :  { %1894 = vadd.xlane.f32.xlu0 %v6265_v13  ;;  %v6273_v38 = vsel %vm1708_vm6, %v1644_v5, 0.0 }
 0x2e1   :  { %1900 = vadd.xlane.f32.xlu1 %v6269_v58 }
 0x2e2   :  { %v1793_v15 = vpop.xlane.xlu0 %1792 }
 0x2e3   :  { %v4254_v2 = vpop.eup %4253  ;;  %v1911_v30 = vmax.f32 %v1793_v15, 1e-12  ;;  %v7045_v15 = vld [vmem:[#allocation41_spill] sm:$0xff] }
 0x2e4   :  { %v2037_v48 = vmul.f32 %v4254_v2, %v7041_v45  ;;  %1898 = vadd.xlane.f32.xlu0 %v6273_v38 }
 0x2e5   :  { %4257 = vrcp.f32 %v1911_v30 }
 0x2e6   :  { %v1791_v33 = vpop.xlane.xlu0 %1790  ;;  %2999 = vst [vmem:[#allocation2 + $0x38] sm:$0xff] %v2037_v48 }
 0x2e7   :  { %v4256_v21 = vpop.eup %4255  ;;  %v1910_v28 = vmax.f32 %v1791_v33, 1e-12  ;;  %v7046_v33 = vld [vmem:[#allocation18_spill] sm:$0xff] }
 0x2e8   :  { %v2036_v41 = vmul.f32 %v4256_v21, %v7042_v9 }
 0x2e9   :  { %4259 = vrcp.f32 %v1910_v28 }
 0x2ea   :  { %3573 = vmatprep.mubr.f32.mxu1 %v2036_v41  ;;  %2998 = vst [vmem:[#allocation2 + $0x30] sm:$0xff] %v2036_v41  ;;  %v3694_v19 = vpop.f32.mrb[32].mxu0 }
 0x2eb   :  { %3574 = vmatmul.mubr.f32.gmra.mrb[38].mxu1 %v2037_v48  ;;  %2929 = vst.msk [vmem:[%s6862_s4 + $0x8] sm:$0xff] %vm99_vm1, %v3694_v19  ;;  %v2609_v37 = vpop.f32.mrb[33].mxu0 }
 0x2ec   :  { %2928 = vst.msk [vmem:[%s6862_s4] sm:$0xff] %vm99_vm1, %v2609_v37 }
 0x2ee   :  { %v1797_v23 = vpop.xlane.xlu0 %1796 }
 0x2ef   :  { %v4258_v31 = vpop.eup %4257  ;;  %v1913_v50 = vmax.f32 %v1797_v23, 1e-12 }
 0x2f0   :  { %v2039_v20 = vmul.f32 %v4258_v31, %v7043_v62 }
 0x2f1   :  { %4261 = vrcp.f32 %v1913_v50  ;;  %v7047_v50 = vld [vmem:[#allocation20_spill] sm:$0xff] }
 0x2f2   :  { %v1795_v8 = vpop.xlane.xlu0 %1794  ;;  %3001 = vst [vmem:[#allocation2 + $0x48] sm:$0xff] %v2039_v20 }
 0x2f3   :  { %v4260_v42 = vpop.eup %4259  ;;  %v1912_v59 = vmax.f32 %v1795_v8, 1e-12 }
 0x2f4   :  { %v2038_v43 = vmul.f32 %v4260_v42, %v7044_v1 }
 0x2f5   :  { %4263 = vrcp.f32 %v1912_v59  ;;  %v7048_v59 = vld [vmem:[#allocation19_spill] sm:$0xff] }
 0x2f6   :  { %3576 = vmatprep.mubr.f32.mxu1 %v2038_v43  ;;  %3000 = vst [vmem:[#allocation2 + $0x40] sm:$0xff] %v2038_v43  ;;  %v3697_v22 = vpop.f32.mrb[34].mxu0 }
 0x2f7   :  { %3577 = vmatmul.mubr.f32.gmra.mrb[40].mxu1 %v2039_v20  ;;  %2931 = vst.msk [vmem:[%s6862_s4 + $0x18] sm:$0xff] %vm99_vm1, %v3697_v22  ;;  %v2619_v0 = vpop.f32.mrb[35].mxu0 }
 0x2f8   :  { %2930 = vst.msk [vmem:[%s6862_s4 + $0x10] sm:$0xff] %vm99_vm1, %v2619_v0 }
 0x2fa   :  { %v1801_v34 = vpop.xlane.xlu1 %1800 }
 0x2fb   :  { %v4262_v46 = vpop.eup %4261  ;;  %v1915_v5 = vmax.f32 %v1801_v34, 1e-12 }
 0x2fc   :  { %v2041_v2 = vmul.f32 %v4262_v46, %v7045_v15 }
 0x2fd   :  { %4265 = vrcp.f32 %v1915_v5  ;;  %v7049_v5 = vld [vmem:[#allocation42_spill] sm:$0xff] }
 0x2fe   :  { %v1799_v30 = vpop.xlane.xlu0 %1798  ;;  %3003 = vst [vmem:[#allocation2 + $0x58] sm:$0xff] %v2041_v2 }
 0x2ff   :  { %v4264_v45 = vpop.eup %4263  ;;  %v1914_v48 = vmax.f32 %v1799_v30, 1e-12 }
 0x300   :  { %v2040_v21 = vmul.f32 %v4264_v45, %v7046_v33 }
 0x301   :  { %4267 = vrcp.f32 %v1914_v48  ;;  %v7050_v48 = vld [vmem:[#allocation43_spill] sm:$0xff] }
 0x302   :  { %v1805_v28 = vpop.xlane.xlu1 %1804  ;;  %3579 = vmatprep.mubr.f32.mxu1 %v2040_v21  ;;  %3002 = vst [vmem:[#allocation2 + $0x50] sm:$0xff] %v2040_v21 }
 0x303   :  { %v1917_v9 = vmax.f32 %v1805_v28, 1e-12  ;;  %3580 = vmatmul.mubr.f32.gmra.mrb[42].mxu1 %v2041_v2  ;;  %v3700_v41 = vpop.f32.mrb[36].mxu0 }
 0x304   :  { %2933 = vst.msk [vmem:[%s6862_s4 + $0x28] sm:$0xff] %vm99_vm1, %v3700_v41  ;;  %v2629_v19 = vpop.f32.mrb[37].mxu0 }
 0x305   :  { %4269 = vrcp.f32 %v1917_v9  ;;  %2932 = vst.msk [vmem:[%s6862_s4 + $0x20] sm:$0xff] %vm99_vm1, %v2629_v19 }
 0x306   :  { %v1803_v37 = vpop.xlane.xlu0 %1802 }
 0x307   :  { %v4266_v23 = vpop.eup %4265  ;;  %v1916_v31 = vmax.f32 %v1803_v37, 1e-12  ;;  %v7051_v37 = vld [vmem:[#allocation21_spill] sm:$0xff] }
 0x308   :  { %v2043_v62 = vmul.f32 %v4266_v23, %v7047_v50 }
 0x309   :  { %4271 = vrcp.f32 %v1916_v31 }
 0x30a   :  { %v1809_v20 = vpop.xlane.xlu1 %1808  ;;  %3005 = vst [vmem:[#allocation2 + $0x68] sm:$0xff] %v2043_v62 }
 0x30b   :  { %v4268_v8 = vpop.eup %4267  ;;  %v1919_v42 = vmax.f32 %v1809_v20, 1e-12 }
 0x30c   :  { %v2042_v1 = vmul.f32 %v4268_v8, %v7048_v59 }
 0x30d   :  { %4273 = vrcp.f32 %v1919_v42  ;;  %v7052_v42 = vld [vmem:[#allocation44_spill] sm:$0xff] }
 0x30e   :  { %3582 = vmatprep.mubr.f32.mxu1 %v2042_v1  ;;  %3004 = vst [vmem:[#allocation2 + $0x60] sm:$0xff] %v2042_v1  ;;  %v1807_v43 = vpop.xlane.xlu0 %1806 }
 0x30f   :  { %v4270_v22 = vpop.eup %4269  ;;  %v1918_v0 = vmax.f32 %v1807_v43, 1e-12  ;;  %3583 = vmatmul.mubr.f32.gmra.mrb[44].mxu1 %v2043_v62  ;;  %v3703_v34 = vpop.f32.mrb[38].mxu0 }
 0x310   :  { %2935 = vst.msk [vmem:[%s6862_s4 + $0x38] sm:$0xff] %vm99_vm1, %v3703_v34  ;;  %v2639_v46 = vpop.f32.mrb[39].mxu0  ;;  %v2045_v15 = vmul.f32 %v4270_v22, %v7049_v5 }
 0x311   :  { %4275 = vrcp.f32 %v1918_v0  ;;  %2934 = vst.msk [vmem:[%s6862_s4 + $0x30] sm:$0xff] %vm99_vm1, %v2639_v46  ;;  %v7053_v46 = vld [vmem:[#allocation22_spill] sm:$0xff] }
 0x312   :  { %v1813_v2 = vpop.xlane.xlu1 %1812  ;;  %3007 = vst [vmem:[#allocation2 + $0x78] sm:$0xff] %v2045_v15 }
 0x313   :  { %v4272_v30 = vpop.eup %4271  ;;  %v1921_v45 = vmax.f32 %v1813_v2, 1e-12 }
 0x314   :  { %v2044_v33 = vmul.f32 %v4272_v30, %v7050_v48  ;;  %v7054_v48 = vld [vmem:[#allocation45_spill] sm:$0xff] }
 0x315   :  { %4277 = vrcp.f32 %v1921_v45 }
 0x316   :  { %v1817_v21 = vpop.xlane.xlu1 %1816  ;;  %3585 = vmatprep.mubr.f32.mxu1 %v2044_v33  ;;  %3006 = vst [vmem:[#allocation2 + $0x70] sm:$0xff] %v2044_v33  ;;  %v1811_v28 = vpop.xlane.xlu0 %1810 }
 0x317   :  { %v4274_v9 = vpop.eup %4273  ;;  %v1923_v41 = vmax.f32 %v1817_v21, 1e-12  ;;  %v1920_v19 = vmax.f32 %v1811_v28, 1e-12  ;;  %3586 = vmatmul.mubr.f32.gmra.mrb[46].mxu1 %v2045_v15  ;;  %v7055_v21 = vld [vmem:[#allocation46_spill] sm:$0xff] }
 0x318   :  { %v2047_v23 = vmul.f32 %v4274_v9, %v7051_v37 }
 0x319   :  { %4279 = vrcp.f32 %v1923_v41 }
 0x31a   :  { %4281 = vrcp.f32 %v1920_v19  ;;  %v1815_v31 = vpop.xlane.xlu0 %1814  ;;  %3009 = vst [vmem:[#allocation2 + $0x88] sm:$0xff] %v2047_v23 }
 0x31b   :  { %v4276_v50 = vpop.eup %4275  ;;  %v1922_v62 = vmax.f32 %v1815_v31, 1e-12  ;;  %v3706_v20 = vpop.f32.mrb[40].mxu0 }
 0x31c   :  { %2937 = vst.msk [vmem:[%s6862_s4 + $0x48] sm:$0xff] %vm99_vm1, %v3706_v20  ;;  %v2649_v8 = vpop.f32.mrb[41].mxu0  ;;  %v2046_v59 = vmul.f32 %v4276_v50, %v7052_v42 }
 0x31d   :  { %4283 = vrcp.f32 %v1922_v62  ;;  %2936 = vst.msk [vmem:[%s6862_s4 + $0x40] sm:$0xff] %vm99_vm1, %v2649_v8 }
 0x31e   :  { %v1821_v1 = vpop.xlane.xlu1 %1820  ;;  %3588 = vmatprep.mubr.f32.mxu1 %v2046_v59  ;;  %3008 = vst [vmem:[#allocation2 + $0x80] sm:$0xff] %v2046_v59 }
 0x31f   :  { %v4278_v43 = vpop.eup %4277  ;;  %v1925_v22 = vmax.f32 %v1821_v1, 1e-12  ;;  %v1819_v0 = vpop.xlane.xlu0 %1818  ;;  %3589 = vmatmul.mubr.f32.gmra.mrb[48].mxu1 %v2047_v23 }
 0x320   :  { %v1924_v34 = vmax.f32 %v1819_v0, 1e-12  ;;  %v2049_v5 = vmul.f32 %v4278_v43, %v7053_v46 }
 0x321   :  { %4285 = vrcp.f32 %v1925_v22  ;;  %v7056_v22 = vld [vmem:[#allocation23_spill] sm:$0xff] }
 0x322   :  { %4287 = vrcp.f32 %v1924_v34  ;;  %3011 = vst [vmem:[#allocation2 + $0x98] sm:$0xff] %v2049_v5  ;;  %v1825_v2 = vpop.xlane.xlu1 %1824 }
 0x323   :  { %v4280_v15 = vpop.eup %4279  ;;  %v1927_v45 = vmax.f32 %v1825_v2, 1e-12 }
 0x324   :  { %v4282_v30 = vpop.eup %4281  ;;  %v2051_v33 = vmul.f32 %v4280_v15, %v7054_v48 }
 0x325   :  { %v2048_v28 = vmul.f32 %v4282_v30, %v7055_v21  ;;  %4289 = vrcp.f32 %v1927_v45  ;;  %v1823_v9 = vpop.xlane.xlu0 %1822 }
 0x326   :  { %3013 = vst [vmem:[#allocation2 + $0xa8] sm:$0xff] %v2051_v33  ;;  %v1926_v19 = vmax.f32 %v1823_v9, 1e-12  ;;  %v1829_v37 = vpop.xlane.xlu1 %1828 }
 0x327   :  { %v4284_v41 = vpop.eup %4283  ;;  %3591 = vmatprep.mubr.f32.mxu1 %v2048_v28  ;;  %3010 = vst [vmem:[#allocation2 + $0x90] sm:$0xff] %v2048_v28  ;;  %v3709_v23 = vpop.f32.mrb[42].mxu0  ;;  %v1929_v31 = vmax.f32 %v1829_v37, 1e-12 }
 0x328   :  { %3592 = vmatmul.mubr.f32.gmra.mrb[50].mxu1 %v2049_v5  ;;  %2939 = vst.msk [vmem:[%s6862_s4 + $0x58] sm:$0xff] %vm99_vm1, %v3709_v23  ;;  %v2659_v50 = vpop.f32.mrb[43].mxu0  ;;  %v2050_v62 = vmul.f32 %v4284_v41, %v5728_v4  ;;  %4291 = vrcp.f32 %v1926_v19  ;;  %v7057_v4 = vld [vmem:[#allocation47_spill] sm:$0xff] }
 0x329   :  { %2938 = vst.msk [vmem:[%s6862_s4 + $0x50] sm:$0xff] %vm99_vm1, %v2659_v50  ;;  %4293 = vrcp.f32 %v1929_v31  ;;  %v1827_v20 = vpop.xlane.xlu0 %1826 }
 0x32a   :  { %3594 = vmatprep.mubr.f32.mxu1 %v2050_v62  ;;  %3012 = vst [vmem:[#allocation2 + $0xa0] sm:$0xff] %v2050_v62  ;;  %v1928_v42 = vmax.f32 %v1827_v20, 1e-12  ;;  %v1833_v59 = vpop.xlane.xlu1 %1832 }
 0x32b   :  { %v4286_v8 = vpop.eup %4285  ;;  %v1931_v43 = vmax.f32 %v1833_v59, 1e-12 }
 0x32c   :  { %v4288_v1 = vpop.eup %4287  ;;  %3595 = vmatmul.mubr.f32.gmra.mrb[52].mxu1 %v2051_v33  ;;  %v2053_v0 = vmul.f32 %v4286_v8, %v7056_v22  ;;  %4295 = vrcp.f32 %v1928_v42 }
 0x32d   :  { %v2052_v34 = vmul.f32 %v4288_v1, %v7057_v4  ;;  %4297 = vrcp.f32 %v1931_v43  ;;  %v1831_v46 = vpop.xlane.xlu0 %1830 }
 0x32e   :  { %3015 = vst [vmem:[#allocation2 + $0xb8] sm:$0xff] %v2053_v0  ;;  %v1930_v5 = vmax.f32 %v1831_v46, 1e-12  ;;  %v1837_v15 = vpop.xlane.xlu1 %1836 }
 0x32f   :  { %3597 = vmatprep.mubr.f32.mxu1 %v2052_v34  ;;  %3014 = vst [vmem:[#allocation2 + $0xb0] sm:$0xff] %v2052_v34  ;;  %v4290_v2 = vpop.eup %4289  ;;  %v1933_v30 = vmax.f32 %v1837_v15, 1e-12 }
 0x330   :  { %3598 = vmatmul.mubr.f32.gmra.mrb[54].mxu1 %v2053_v0  ;;  %4299 = vrcp.f32 %v1930_v5  ;;  %v2055_v45 = vmul.f32 %v4290_v2, %v5793_v10 }
 0x331   :  { %4301 = vrcp.f32 %v1933_v30  ;;  %v1835_v48 = vpop.xlane.xlu0 %1834 }
 0x332   :  { %v4292_v33 = vpop.eup %4291  ;;  %v1932_v21 = vmax.f32 %v1835_v48, 1e-12  ;;  %v1841_v28 = vpop.xlane.xlu1 %1840  ;;  %3017 = vst [vmem:[#allocation2 + $0xc8] sm:$0xff] %v2055_v45 }
 0x333   :  { %v3712_v9 = vpop.f32.mrb[44].mxu0  ;;  %v4294_v41 = vpop.eup %4293  ;;  %v1935_v19 = vmax.f32 %v1841_v28, 1e-12  ;;  %v2054_v37 = vmul.f32 %v4292_v33, %v5817_v49 }
 0x334   :  { %2941 = vst.msk [vmem:[%s6862_s4 + $0x68] sm:$0xff] %vm99_vm1, %v3712_v9  ;;  %v2669_v23 = vpop.f32.mrb[45].mxu0  ;;  %4303 = vrcp.f32 %v1932_v21  ;;  %v2057_v10 = vmul.f32 %v4294_v41, %v5829_v27 }
 0x335   :  { %2940 = vst.msk [vmem:[%s6862_s4 + $0x60] sm:$0xff] %vm99_vm1, %v2669_v23  ;;  %4305 = vrcp.f32 %v1935_v19  ;;  %3600 = vmatprep.mubr.f32.mxu1 %v2054_v37  ;;  %3016 = vst [vmem:[#allocation2 + $0xc0] sm:$0xff] %v2054_v37  ;;  %v1839_v31 = vpop.xlane.xlu0 %1838 }
 0x336   :  { %v4296_v50 = vpop.eup %4295  ;;  %v1934_v49 = vmax.f32 %v1839_v31, 1e-12  ;;  %3601 = vmatmul.mubr.f32.gmra.mrb[56].mxu1 %v2055_v45  ;;  %v1845_v62 = vpop.xlane.xlu1 %1844  ;;  %3019 = vst [vmem:[#allocation2 + $0xd8] sm:$0xff] %v2057_v10 }
 0x337   :  { %v4298_v20 = vpop.eup %4297  ;;  %v1937_v8 = vmax.f32 %v1845_v62, 1e-12  ;;  %v2056_v42 = vmul.f32 %v4296_v50, %v5848_v61 }
 0x338   :  { %4307 = vrcp.f32 %v1934_v49  ;;  %v2059_v59 = vmul.f32 %v4298_v20, %v5859_v17 }
 0x339   :  { %4309 = vrcp.f32 %v1937_v8  ;;  %3603 = vmatprep.mubr.f32.mxu1 %v2056_v42  ;;  %3018 = vst [vmem:[#allocation2 + $0xd0] sm:$0xff] %v2056_v42  ;;  %v1843_v27 = vpop.xlane.xlu0 %1842 }
 0x33a   :  { %v4300_v1 = vpop.eup %4299  ;;  %v1936_v43 = vmax.f32 %v1843_v27, 1e-12  ;;  %3604 = vmatmul.mubr.f32.gmra.mrb[58].mxu1 %v2057_v10  ;;  %v1849_v22 = vpop.xlane.xlu1 %1848  ;;  %3021 = vst [vmem:[#allocation2 + $0xe8] sm:$0xff] %v2059_v59 }
 0x33b   :  { %v3715_v0 = vpop.f32.mrb[46].mxu0  ;;  %v4302_v4 = vpop.eup %4301  ;;  %v1939_v34 = vmax.f32 %v1849_v22, 1e-12  ;;  %v2058_v46 = vmul.f32 %v4300_v1, %v5875_v7 }
 0x33c   :  { %2943 = vst.msk [vmem:[%s6862_s4 + $0x78] sm:$0xff] %vm99_vm1, %v3715_v0  ;;  %v2679_v61 = vpop.f32.mrb[47].mxu0  ;;  %4311 = vrcp.f32 %v1936_v43  ;;  %v2061_v17 = vmul.f32 %v4302_v4, %v5884_v57 }
 0x33d   :  { %2942 = vst.msk [vmem:[%s6862_s4 + $0x70] sm:$0xff] %vm99_vm1, %v2679_v61  ;;  %4313 = vrcp.f32 %v1939_v34  ;;  %3606 = vmatprep.mubr.f32.mxu1 %v2058_v46  ;;  %3020 = vst [vmem:[#allocation2 + $0xe0] sm:$0xff] %v2058_v46  ;;  %v1847_v5 = vpop.xlane.xlu0 %1846 }
 0x33e   :  { %v4304_v15 = vpop.eup %4303  ;;  %v1938_v7 = vmax.f32 %v1847_v5, 1e-12  ;;  %3607 = vmatmul.mubr.f32.gmra.mrb[60].mxu1 %v2059_v59  ;;  %v1853_v2 = vpop.xlane.xlu1 %1852  ;;  %3023 = vst [vmem:[#allocation2 + $0xf8] sm:$0xff] %v2061_v17 }
 0x33f   :  { %v4306_v30 = vpop.eup %4305  ;;  %v1941_v45 = vmax.f32 %v1853_v2, 1e-12  ;;  %v2060_v48 = vmul.f32 %v4304_v15, %v5896_v32 }
 0x340   :  { %4315 = vrcp.f32 %v1938_v7  ;;  %v2063_v33 = vmul.f32 %v4306_v30, %v5900_v55 }
 0x341   :  { %4317 = vrcp.f32 %v1941_v45  ;;  %3609 = vmatprep.mubr.f32.mxu1 %v2060_v48  ;;  %3022 = vst [vmem:[#allocation2 + $0xf0] sm:$0xff] %v2060_v48  ;;  %v1851_v57 = vpop.xlane.xlu0 %1850 }
 0x342   :  { %v4308_v21 = vpop.eup %4307  ;;  %v1940_v28 = vmax.f32 %v1851_v57, 1e-12  ;;  %3610 = vmatmul.mubr.f32.gmra.mrb[62].mxu1 %v2061_v17  ;;  %v1857_v9 = vpop.xlane.xlu1 %1856  ;;  %3025 = vst [vmem:[#allocation2 + $0x108] sm:$0xff] %v2063_v33 }
 0x343   :  { %v3718_v41 = vpop.f32.mrb[48].mxu0  ;;  %v4310_v19 = vpop.eup %4309  ;;  %v1943_v37 = vmax.f32 %v1857_v9, 1e-12  ;;  %v2062_v23 = vmul.f32 %v4308_v21, %v5807_v39 }
 0x344   :  { %2945 = vst.msk [vmem:[%s6862_s4 + $0x88] sm:$0xff] %vm99_vm1, %v3718_v41  ;;  %v2689_v32 = vpop.f32.mrb[49].mxu0  ;;  %4319 = vrcp.f32 %v1940_v28  ;;  %v2065_v55 = vmul.f32 %v4310_v19, %v5919_v12 }
 0x345   :  { %2944 = vst.msk [vmem:[%s6862_s4 + $0x80] sm:$0xff] %vm99_vm1, %v2689_v32  ;;  %4321 = vrcp.f32 %v1943_v37  ;;  %3612 = vmatprep.mubr.f32.mxu1 %v2062_v23  ;;  %3024 = vst [vmem:[#allocation2 + $0x100] sm:$0xff] %v2062_v23  ;;  %v1855_v10 = vpop.xlane.xlu0 %1854 }
 0x346   :  { %v4312_v31 = vpop.eup %4311  ;;  %v1942_v39 = vmax.f32 %v1855_v10, 1e-12  ;;  %3613 = vmatmul.mubr.f32.gmra.mrb[64].mxu1 %v2063_v33  ;;  %v1861_v50 = vpop.xlane.xlu1 %1860  ;;  %3027 = vst [vmem:[#allocation2 + $0x118] sm:$0xff] %v2065_v55 }
 0x347   :  { %v4314_v49 = vpop.eup %4313  ;;  %v1945_v62 = vmax.f32 %v1861_v50, 1e-12  ;;  %v2064_v20 = vmul.f32 %v4312_v31, %v5929_v35  ;;  %v7059_v31 = vld [vmem:[#allocation24_spill] sm:$0xff] }
 0x348   :  { %4323 = vrcp.f32 %v1942_v39  ;;  %v2067_v8 = vmul.f32 %v4314_v49, %v5945_v47 }
 0x349   :  { %4325 = vrcp.f32 %v1945_v62  ;;  %3615 = vmatprep.mubr.f32.mxu1 %v2064_v20  ;;  %3026 = vst [vmem:[#allocation2 + $0x110] sm:$0xff] %v2064_v20  ;;  %v1859_v12 = vpop.xlane.xlu0 %1858 }
 0x34a   :  { %v4316_v42 = vpop.eup %4315  ;;  %v1944_v59 = vmax.f32 %v1859_v12, 1e-12  ;;  %3616 = vmatmul.mubr.f32.gmra.mrb[66].mxu1 %v2065_v55  ;;  %v1865_v27 = vpop.xlane.xlu1 %1864  ;;  %3029 = vst [vmem:[#allocation2 + $0x128] sm:$0xff] %v2067_v8  ;;  %v7058_v55 = vld [vmem:[#allocation25_spill] sm:$0xff] }
 0x34b   :  { %v3721_v1 = vpop.f32.mrb[50].mxu0  ;;  %v4318_v43 = vpop.eup %4317  ;;  %v1947_v22 = vmax.f32 %v1865_v27, 1e-12  ;;  %v2066_v0 = vmul.f32 %v4316_v42, %v5987_v16 }
 0x34c   :  { %2947 = vst.msk [vmem:[%s6862_s4 + $0x98] sm:$0xff] %vm99_vm1, %v3721_v1  ;;  %v2699_v35 = vpop.f32.mrb[51].mxu0  ;;  %4327 = vrcp.f32 %v1944_v59  ;;  %v2069_v47 = vmul.f32 %v4318_v43, %v5962_v44  ;;  %v7060_v59 = vld [vmem:[#allocation26_spill] sm:$0xff] }
 0x34d   :  { %2946 = vst.msk [vmem:[%s6862_s4 + $0x90] sm:$0xff] %vm99_vm1, %v2699_v35  ;;  %4329 = vrcp.f32 %v1947_v22  ;;  %3618 = vmatprep.mubr.f32.mxu1 %v2066_v0  ;;  %3028 = vst [vmem:[#allocation2 + $0x120] sm:$0xff] %v2066_v0  ;;  %v1863_v4 = vpop.xlane.xlu0 %1862  ;;  %v7061_v43 = vld [vmem:[#allocation10_spill] sm:$0xff] }
 0x34e   :  { %v4320_v34 = vpop.eup %4319  ;;  %v1946_v16 = vmax.f32 %v1863_v4, 1e-12  ;;  %3619 = vmatmul.mubr.f32.gmra.mrb[68].mxu1 %v2067_v8  ;;  %v1869_v46 = vpop.xlane.xlu1 %1868  ;;  %3031 = vst [vmem:[#allocation2 + $0x138] sm:$0xff] %v2069_v47 }
 0x34f   :  { %v3724_v61 = vpop.f32.mrb[52].mxu0  ;;  %v4322_v17 = vpop.eup %4321  ;;  %v1949_v5 = vmax.f32 %v1869_v46, 1e-12  ;;  %v2068_v15 = vmul.f32 %v4320_v34, %v6018_v60 }
 0x350   :  { %2949 = vst.msk [vmem:[%s6862_s4 + $0xa8] sm:$0xff] %vm99_vm1, %v3724_v61  ;;  %v2709_v44 = vpop.f32.mrb[53].mxu0  ;;  %4331 = vrcp.f32 %v1946_v16  ;;  %v2071_v7 = vmul.f32 %v4322_v17, %v5992_v24 }
 0x351   :  { %2948 = vst.msk [vmem:[%s6862_s4 + $0xa0] sm:$0xff] %vm99_vm1, %v2709_v44  ;;  %4333 = vrcp.f32 %v1949_v5  ;;  %3621 = vmatprep.mubr.f32.mxu1 %v2068_v15  ;;  %3030 = vst [vmem:[#allocation2 + $0x130] sm:$0xff] %v2068_v15  ;;  %v1867_v2 = vpop.xlane.xlu0 %1866 }
 0x352   :  { %v4324_v30 = vpop.eup %4323  ;;  %v1948_v60 = vmax.f32 %v1867_v2, 1e-12  ;;  %3622 = vmatmul.mubr.f32.gmra.mrb[70].mxu1 %v2069_v47  ;;  %v1873_v45 = vpop.xlane.xlu1 %1872  ;;  %3033 = vst [vmem:[#allocation2 + $0x148] sm:$0xff] %v2071_v7 }
 0x353   :  { %v3727_v48 = vpop.f32.mrb[54].mxu0  ;;  %v4326_v33 = vpop.eup %4325  ;;  %v1951_v57 = vmax.f32 %v1873_v45, 1e-12  ;;  %v2070_v21 = vmul.f32 %v4324_v30, %v6039_v3 }
 0x354   :  { %2951 = vst.msk [vmem:[%s6862_s4 + $0xb8] sm:$0xff] %vm99_vm1, %v3727_v48  ;;  %v2719_v24 = vpop.f32.mrb[55].mxu0  ;;  %4335 = vrcp.f32 %v1948_v60  ;;  %v2073_v28 = vmul.f32 %v4326_v33, %v6044_v36 }
 0x355   :  { %2950 = vst.msk [vmem:[%s6862_s4 + $0xb0] sm:$0xff] %vm99_vm1, %v2719_v24  ;;  %4337 = vrcp.f32 %v1951_v57  ;;  %3624 = vmatprep.mubr.f32.mxu1 %v2070_v21  ;;  %3032 = vst [vmem:[#allocation2 + $0x140] sm:$0xff] %v2070_v21  ;;  %v1871_v9 = vpop.xlane.xlu0 %1870 }
 0x356   :  { %v4328_v41 = vpop.eup %4327  ;;  %v1950_v3 = vmax.f32 %v1871_v9, 1e-12  ;;  %3625 = vmatmul.mubr.f32.gmra.mrb[72].mxu1 %v2071_v7  ;;  %v1877_v19 = vpop.xlane.xlu1 %1876  ;;  %3035 = vst [vmem:[#allocation2 + $0x158] sm:$0xff] %v2073_v28 }
 0x357   :  { %v3730_v37 = vpop.f32.mrb[56].mxu0  ;;  %v4330_v23 = vpop.eup %4329  ;;  %v1953_v32 = vmax.f32 %v1877_v19, 1e-12  ;;  %v2072_v10 = vmul.f32 %v4328_v41, %v7058_v55 }
 0x358   :  { %2953 = vst.msk [vmem:[%s6862_s4 + $0xc8] sm:$0xff] %vm99_vm1, %v3730_v37  ;;  %v2729_v36 = vpop.f32.mrb[57].mxu0  ;;  %4339 = vrcp.f32 %v1950_v3  ;;  %v2075_v39 = vmul.f32 %v4330_v23, %v7059_v31 }
 0x359   :  { %2952 = vst.msk [vmem:[%s6862_s4 + $0xc0] sm:$0xff] %vm99_vm1, %v2729_v36  ;;  %4341 = vrcp.f32 %v1953_v32  ;;  %3627 = vmatprep.mubr.f32.mxu1 %v2072_v10  ;;  %3034 = vst [vmem:[#allocation2 + $0x150] sm:$0xff] %v2072_v10  ;;  %v1875_v50 = vpop.xlane.xlu0 %1874 }
 0x35a   :  { %v4332_v49 = vpop.eup %4331  ;;  %v1952_v62 = vmax.f32 %v1875_v50, 1e-12  ;;  %3628 = vmatmul.mubr.f32.gmra.mrb[74].mxu1 %v2073_v28  ;;  %v1881_v20 = vpop.xlane.xlu1 %1880  ;;  %3037 = vst [vmem:[#allocation2 + $0x168] sm:$0xff] %v2075_v39 }
 0x35b   :  { %v3733_v8 = vpop.f32.mrb[58].mxu0  ;;  %v4334_v12 = vpop.eup %4333  ;;  %v1955_v42 = vmax.f32 %v1881_v20, 1e-12  ;;  %v2074_v27 = vmul.f32 %v4332_v49, %v7060_v59 }
 0x35c   :  { %2955 = vst.msk [vmem:[%s6862_s4 + $0xd8] sm:$0xff] %vm99_vm1, %v3733_v8  ;;  %v2739_v1 = vpop.f32.mrb[59].mxu0  ;;  %4343 = vrcp.f32 %v1952_v62  ;;  %v2077_v22 = vmul.f32 %v4334_v12, %v7061_v43 }
 0x35d   :  { %2954 = vst.msk [vmem:[%s6862_s4 + $0xd0] sm:$0xff] %vm99_vm1, %v2739_v1  ;;  %4345 = vrcp.f32 %v1955_v42  ;;  %3630 = vmatprep.mubr.f32.mxu1 %v2074_v27  ;;  %3036 = vst [vmem:[#allocation2 + $0x160] sm:$0xff] %v2074_v27  ;;  %v1879_v0 = vpop.xlane.xlu0 %1878 }
 0x35e   :  { %v4336_v35 = vpop.eup %4335  ;;  %v1954_v47 = vmax.f32 %v1879_v0, 1e-12  ;;  %3631 = vmatmul.mubr.f32.gmra.mrb[76].mxu1 %v2075_v39  ;;  %v1885_v4 = vpop.xlane.xlu1 %1884  ;;  %3039 = vst [vmem:[#allocation2 + $0x178] sm:$0xff] %v2077_v22 }
 0x35f   :  { %v3736_v34 = vpop.f32.mrb[60].mxu0  ;;  %v4338_v16 = vpop.eup %4337  ;;  %v1957_v46 = vmax.f32 %v1885_v4, 1e-12  ;;  %v2076_v61 = vmul.f32 %v4336_v35, %v6130_v63 }
 0x360   :  { %2957 = vst.msk [vmem:[%s6862_s4 + $0xe8] sm:$0xff] %vm99_vm1, %v3736_v34  ;;  %v2749_v17 = vpop.f32.mrb[61].mxu0  ;;  %4347 = vrcp.f32 %v1954_v47  ;;  %v2079_v5 = vmul.f32 %v4338_v16, %v6149_v11 }
 0x361   :  { %2956 = vst.msk [vmem:[%s6862_s4 + $0xe0] sm:$0xff] %vm99_vm1, %v2749_v17  ;;  %4349 = vrcp.f32 %v1957_v46  ;;  %3633 = vmatprep.mubr.f32.mxu1 %v2076_v61  ;;  %3038 = vst [vmem:[#allocation2 + $0x170] sm:$0xff] %v2076_v61  ;;  %v1883_v15 = vpop.xlane.xlu0 %1882 }
 0x362   :  { %v4340_v44 = vpop.eup %4339  ;;  %v1956_v63 = vmax.f32 %v1883_v15, 1e-12  ;;  %3634 = vmatmul.mubr.f32.gmra.mrb[78].mxu1 %v2077_v22  ;;  %v1889_v7 = vpop.xlane.xlu1 %1888  ;;  %3041 = vst [vmem:[#allocation2 + $0x188] sm:$0xff] %v2079_v5 }
 0x363   :  { %v3739_v2 = vpop.f32.mrb[62].mxu0  ;;  %v4342_v30 = vpop.eup %4341  ;;  %v1959_v60 = vmax.f32 %v1889_v7, 1e-12  ;;  %v2078_v45 = vmul.f32 %v4340_v44, %v6166_v56 }
 0x364   :  { %2959 = vst.msk [vmem:[%s6862_s4 + $0xf8] sm:$0xff] %vm99_vm1, %v3739_v2  ;;  %v2759_v11 = vpop.f32.mrb[63].mxu0  ;;  %4351 = vrcp.f32 %v1956_v63  ;;  %v2081_v48 = vmul.f32 %v4342_v30, %v6174_v26 }
 0x365   :  { %2958 = vst.msk [vmem:[%s6862_s4 + $0xf0] sm:$0xff] %vm99_vm1, %v2759_v11  ;;  %4353 = vrcp.f32 %v1959_v60  ;;  %3636 = vmatprep.mubr.f32.mxu1 %v2078_v45  ;;  %3040 = vst [vmem:[#allocation2 + $0x180] sm:$0xff] %v2078_v45  ;;  %v1887_v33 = vpop.xlane.xlu0 %1886 }
 0x366   :  { %v4344_v57 = vpop.eup %4343  ;;  %v1958_v56 = vmax.f32 %v1887_v33, 1e-12  ;;  %3637 = vmatmul.mubr.f32.gmra.mrb[80].mxu1 %v2079_v5  ;;  %v1893_v21 = vpop.xlane.xlu1 %1892  ;;  %3043 = vst [vmem:[#allocation2 + $0x198] sm:$0xff] %v2081_v48 }
 0x367   :  { %v3742_v24 = vpop.f32.mrb[64].mxu0  ;;  %v4346_v28 = vpop.eup %4345  ;;  %v1961_v9 = vmax.f32 %v1893_v21, 1e-12  ;;  %v2080_v41 = vmul.f32 %v4344_v57, %v6188_v52 }
 0x368   :  { %2961 = vst.msk [vmem:[%s6862_s4 + $0x108] sm:$0xff] %vm99_vm1, %v3742_v24  ;;  %v2769_v26 = vpop.f32.mrb[65].mxu0  ;;  %4355 = vrcp.f32 %v1958_v56  ;;  %v2083_v3 = vmul.f32 %v4346_v28, %v6197_v54 }
 0x369   :  { %2960 = vst.msk [vmem:[%s6862_s4 + $0x100] sm:$0xff] %vm99_vm1, %v2769_v26  ;;  %4357 = vrcp.f32 %v1961_v9  ;;  %3639 = vmatprep.mubr.f32.mxu1 %v2080_v41  ;;  %3042 = vst [vmem:[#allocation2 + $0x190] sm:$0xff] %v2080_v41  ;;  %v1891_v19 = vpop.xlane.xlu0 %1890 }
 0x36a   :  { %v4348_v37 = vpop.eup %4347  ;;  %v1960_v52 = vmax.f32 %v1891_v19, 1e-12  ;;  %3640 = vmatmul.mubr.f32.gmra.mrb[82].mxu1 %v2081_v48  ;;  %v1897_v23 = vpop.xlane.xlu1 %1896  ;;  %3045 = vst [vmem:[#allocation2 + $0x1a8] sm:$0xff] %v2083_v3 }
 0x36b   :  { %v3745_v32 = vpop.f32.mrb[66].mxu0  ;;  %v4350_v55 = vpop.eup %4349  ;;  %v1963_v10 = vmax.f32 %v1897_v23, 1e-12  ;;  %v2082_v36 = vmul.f32 %v4348_v37, %v6213_v18 }
 0x36c   :  { %2963 = vst.msk [vmem:[%s6862_s4 + $0x118] sm:$0xff] %vm99_vm1, %v3745_v32  ;;  %v2779_v54 = vpop.f32.mrb[67].mxu0  ;;  %4359 = vrcp.f32 %v1960_v52  ;;  %v2085_v31 = vmul.f32 %v4350_v55, %v6220_v25 }
 0x36d   :  { %2962 = vst.msk [vmem:[%s6862_s4 + $0x110] sm:$0xff] %vm99_vm1, %v2779_v54  ;;  %4361 = vrcp.f32 %v1963_v10  ;;  %3642 = vmatprep.mubr.f32.mxu1 %v2082_v36  ;;  %3044 = vst [vmem:[#allocation2 + $0x1a0] sm:$0xff] %v2082_v36  ;;  %v1895_v39 = vpop.xlane.xlu0 %1894 }
 0x36e   :  { %v4352_v50 = vpop.eup %4351  ;;  %v1962_v18 = vmax.f32 %v1895_v39, 1e-12  ;;  %3643 = vmatmul.mubr.f32.gmra.mrb[84].mxu1 %v2083_v3  ;;  %v1901_v49 = vpop.xlane.xlu1 %1900  ;;  %3047 = vst [vmem:[#allocation2 + $0x1b8] sm:$0xff] %v2085_v31 }
 0x36f   :  { %v3748_v62 = vpop.f32.mrb[68].mxu0  ;;  %v4354_v20 = vpop.eup %4353  ;;  %v1965_v8 = vmax.f32 %v1901_v49, 1e-12  ;;  %v2084_v12 = vmul.f32 %v4352_v50, %v6229_v53 }
 0x370   :  { %2965 = vst.msk [vmem:[%s6862_s4 + $0x128] sm:$0xff] %vm99_vm1, %v3748_v62  ;;  %v2789_v25 = vpop.f32.mrb[69].mxu0  ;;  %4363 = vrcp.f32 %v1962_v18  ;;  %v2087_v42 = vmul.f32 %v4354_v20, %v6233_v29 }
 0x371   :  { %2964 = vst.msk [vmem:[%s6862_s4 + $0x120] sm:$0xff] %vm99_vm1, %v2789_v25  ;;  %4365 = vrcp.f32 %v1965_v8  ;;  %3645 = vmatprep.mubr.f32.mxu1 %v2084_v12  ;;  %3046 = vst [vmem:[#allocation2 + $0x1b0] sm:$0xff] %v2084_v12  ;;  %v1899_v59 = vpop.xlane.xlu0 %1898 }
 0x372   :  { %v4356_v27 = vpop.eup %4355  ;;  %v1964_v53 = vmax.f32 %v1899_v59, 1e-12  ;;  %3646 = vmatmul.mubr.f32.gmra.mrb[86].mxu1 %v2085_v31  ;;  %3049 = vst [vmem:[#allocation2 + $0x1c8] sm:$0xff] %v2087_v42 }
 0x373   :  { %v3751_v1 = vpop.f32.mrb[70].mxu0  ;;  %v4358_v43 = vpop.eup %4357  ;;  %v2086_v22 = vmul.f32 %v4356_v27, %v6241_v51 }
 0x374   :  { %2967 = vst.msk [vmem:[%s6862_s4 + $0x138] sm:$0xff] %vm99_vm1, %v3751_v1  ;;  %v2799_v0 = vpop.f32.mrb[71].mxu0  ;;  %4367 = vrcp.f32 %v1964_v53  ;;  %v2089_v29 = vmul.f32 %v4358_v43, %v6246_v6 }
 0x375   :  { %2966 = vst.msk [vmem:[%s6862_s4 + $0x130] sm:$0xff] %vm99_vm1, %v2799_v0  ;;  %3648 = vmatprep.mubr.f32.mxu1 %v2086_v22  ;;  %3048 = vst [vmem:[#allocation2 + $0x1c0] sm:$0xff] %v2086_v22 }
 0x376   :  { %v4360_v35 = vpop.eup %4359  ;;  %3649 = vmatmul.mubr.f32.gmra.mrb[88].mxu1 %v2087_v42  ;;  %3051 = vst [vmem:[#allocation2 + $0x1d8] sm:$0xff] %v2089_v29 }
 0x377   :  { %v3754_v51 = vpop.f32.mrb[72].mxu0  ;;  %v4362_v47 = vpop.eup %4361  ;;  %v2088_v4 = vmul.f32 %v4360_v35, %v6255_v14 }
 0x378   :  { %2969 = vst.msk [vmem:[%s6862_s4 + $0x148] sm:$0xff] %vm99_vm1, %v3754_v51  ;;  %v2809_v34 = vpop.f32.mrb[73].mxu0  ;;  %v2091_v6 = vmul.f32 %v4362_v47, %v6261_v40 }
 0x379   :  { %2968 = vst.msk [vmem:[%s6862_s4 + $0x140] sm:$0xff] %vm99_vm1, %v2809_v34  ;;  %3651 = vmatprep.mubr.f32.mxu1 %v2088_v4  ;;  %3050 = vst [vmem:[#allocation2 + $0x1d0] sm:$0xff] %v2088_v4 }
 0x37a   :  { %v4364_v16 = vpop.eup %4363  ;;  %3652 = vmatmul.mubr.f32.gmra.mrb[90].mxu1 %v2089_v29  ;;  %3053 = vst [vmem:[#allocation2 + $0x1e8] sm:$0xff] %v2091_v6 }
 0x37b   :  { %v3757_v46 = vpop.f32.mrb[74].mxu0  ;;  %v4366_v14 = vpop.eup %4365  ;;  %v2090_v61 = vmul.f32 %v4364_v16, %v6265_v13 }
 0x37c   :  { %2971 = vst.msk [vmem:[%s6862_s4 + $0x158] sm:$0xff] %vm99_vm1, %v3757_v46  ;;  %v2819_v17 = vpop.f32.mrb[75].mxu0  ;;  %v2093_v40 = vmul.f32 %v4366_v14, %v6269_v58 }
 0x37d   :  { %2970 = vst.msk [vmem:[%s6862_s4 + $0x150] sm:$0xff] %vm99_vm1, %v2819_v17  ;;  %3654 = vmatprep.mubr.f32.mxu1 %v2090_v61  ;;  %3052 = vst [vmem:[#allocation2 + $0x1e0] sm:$0xff] %v2090_v61 }
 0x37e   :  { %v4368_v5 = vpop.eup %4367  ;;  %3655 = vmatmul.mubr.f32.gmra.mrb[92].mxu1 %v2091_v6  ;;  %3055 = vst [vmem:[#allocation2 + $0x1f8] sm:$0xff] %v2093_v40 }
 0x37f   :  { %v3760_v15 = vpop.f32.mrb[76].mxu0  ;;  %v2092_v13 = vmul.f32 %v4368_v5, %v6273_v38 }
 0x380   :  { %2973 = vst.msk [vmem:[%s6862_s4 + $0x168] sm:$0xff] %vm99_vm1, %v3760_v15  ;;  %v2829_v44 = vpop.f32.mrb[77].mxu0 }
 0x381   :  { %2972 = vst.msk [vmem:[%s6862_s4 + $0x160] sm:$0xff] %vm99_vm1, %v2829_v44  ;;  %3657 = vmatprep.mubr.f32.mxu1 %v2092_v13  ;;  %3054 = vst [vmem:[#allocation2 + $0x1f0] sm:$0xff] %v2092_v13 }
 0x382   :  { %3658 = vmatmul.mubr.f32.gmra.mrb[94].mxu1 %v2093_v40 }
 0x383   :  { %v3763_v58 = vpop.f32.mrb[78].mxu0 }
 0x384   :  { %2975 = vst.msk [vmem:[%s6862_s4 + $0x178] sm:$0xff] %vm99_vm1, %v3763_v58  ;;  %v2839_v38 = vpop.f32.mrb[79].mxu0 }
 0x385   :  { %2974 = vst.msk [vmem:[%s6862_s4 + $0x170] sm:$0xff] %vm99_vm1, %v2839_v38 }
 0x387   :  { %v3766_v63 = vpop.f32.mrb[80].mxu0 }
 0x388   :  { %2977 = vst.msk [vmem:[%s6862_s4 + $0x188] sm:$0xff] %vm99_vm1, %v3766_v63  ;;  %v2849_v7 = vpop.f32.mrb[81].mxu0 }
 0x389   :  { %2976 = vst.msk [vmem:[%s6862_s4 + $0x180] sm:$0xff] %vm99_vm1, %v2849_v7 }
 0x38b   :  { %v3769_v2 = vpop.f32.mrb[82].mxu0 }
 0x38c   :  { %2979 = vst.msk [vmem:[%s6862_s4 + $0x198] sm:$0xff] %vm99_vm1, %v3769_v2  ;;  %v2859_v30 = vpop.f32.mrb[83].mxu0 }
 0x38d   :  { %2978 = vst.msk [vmem:[%s6862_s4 + $0x190] sm:$0xff] %vm99_vm1, %v2859_v30 }
 0x38f   :  { %v3772_v60 = vpop.f32.mrb[84].mxu0 }
 0x390   :  { %2981 = vst.msk [vmem:[%s6862_s4 + $0x1a8] sm:$0xff] %vm99_vm1, %v3772_v60  ;;  %v2869_v45 = vpop.f32.mrb[85].mxu0 }
 0x391   :  { %2980 = vst.msk [vmem:[%s6862_s4 + $0x1a0] sm:$0xff] %vm99_vm1, %v2869_v45 }
 0x393   :  { %v3775_v11 = vpop.f32.mrb[86].mxu0 }
 0x394   :  { %2983 = vst.msk [vmem:[%s6862_s4 + $0x1b8] sm:$0xff] %vm99_vm1, %v3775_v11  ;;  %v2879_v48 = vpop.f32.mrb[87].mxu0 }
 0x395   :  { %2982 = vst.msk [vmem:[%s6862_s4 + $0x1b0] sm:$0xff] %vm99_vm1, %v2879_v48 }
 0x397   :  { %v3778_v33 = vpop.f32.mrb[88].mxu0 }
 0x398   :  { %2985 = vst.msk [vmem:[%s6862_s4 + $0x1c8] sm:$0xff] %vm99_vm1, %v3778_v33  ;;  %v2889_v57 = vpop.f32.mrb[89].mxu0 }
 0x399   :  { %2984 = vst.msk [vmem:[%s6862_s4 + $0x1c0] sm:$0xff] %vm99_vm1, %v2889_v57 }
 0x39a   :  { %v3566_v56 = vpop.f32.mrb[32].mxu1 }
 0x39b   :  { %2480 = vst.msk [vmem:[%s6861_s3 + $0x8] sm:$0xff] %vm99_vm1, %v3566_v56  ;;  %v2160_v21 = vpop.f32.mrb[33].mxu1  ;;  %v3781_v24 = vpop.f32.mrb[90].mxu0 }
 0x39c   :  { %2479 = vst.msk [vmem:[%s6861_s3] sm:$0xff] %vm99_vm1, %v2160_v21  ;;  %2987 = vst.msk [vmem:[%s6862_s4 + $0x1d8] sm:$0xff] %vm99_vm1, %v3781_v24  ;;  %v2899_v28 = vpop.f32.mrb[91].mxu0 }
 0x39d   :  { %2986 = vst.msk [vmem:[%s6862_s4 + $0x1d0] sm:$0xff] %vm99_vm1, %v2899_v28 }
 0x39f   :  { %v3784_v9 = vpop.f32.mrb[92].mxu0 }
 0x3a0   :  { %2989 = vst.msk [vmem:[%s6862_s4 + $0x1e8] sm:$0xff] %vm99_vm1, %v3784_v9  ;;  %v2909_v41 = vpop.f32.mrb[93].mxu0 }
 0x3a1   :  { %2988 = vst.msk [vmem:[%s6862_s4 + $0x1e0] sm:$0xff] %vm99_vm1, %v2909_v41 }
 0x3a3   :  { %v3787_v26 = vpop.f32.mrb[94].mxu0 }
 0x3a4   :  { %2991 = vst.msk [vmem:[%s6862_s4 + $0x1f8] sm:$0xff] %vm99_vm1, %v3787_v26  ;;  %v2919_v3 = vpop.f32.mrb[95].mxu0 }
 0x3a5   :  { %2990 = vst.msk [vmem:[%s6862_s4 + $0x1f0] sm:$0xff] %vm99_vm1, %v2919_v3 }
 0x3a6   :  { %v3569_v19 = vpop.f32.mrb[34].mxu1 }
 0x3a7   :  { %2482 = vst.msk [vmem:[%s6861_s3 + $0x18] sm:$0xff] %vm99_vm1, %v3569_v19  ;;  %v2170_v37 = vpop.f32.mrb[35].mxu1 }
 0x3a8   :  { %2481 = vst.msk [vmem:[%s6861_s3 + $0x10] sm:$0xff] %vm99_vm1, %v2170_v37 }
 0x3b2   :  { %v3572_v52 = vpop.f32.mrb[36].mxu1 }
 0x3b3   :  { %2484 = vst.msk [vmem:[%s6861_s3 + $0x28] sm:$0xff] %vm99_vm1, %v3572_v52  ;;  %v2180_v23 = vpop.f32.mrb[37].mxu1 }
 0x3b4   :  { %2483 = vst.msk [vmem:[%s6861_s3 + $0x20] sm:$0xff] %vm99_vm1, %v2180_v23 }
 0x3be   :  { %v3575_v32 = vpop.f32.mrb[38].mxu1 }
 0x3bf   :  { %2486 = vst.msk [vmem:[%s6861_s3 + $0x38] sm:$0xff] %vm99_vm1, %v3575_v32  ;;  %v2190_v55 = vpop.f32.mrb[39].mxu1 }
 0x3c0   :  { %2485 = vst.msk [vmem:[%s6861_s3 + $0x30] sm:$0xff] %vm99_vm1, %v2190_v55 }
 0x3ca   :  { %v3578_v10 = vpop.f32.mrb[40].mxu1 }
 0x3cb   :  { %2488 = vst.msk [vmem:[%s6861_s3 + $0x48] sm:$0xff] %vm99_vm1, %v3578_v10  ;;  %v2200_v36 = vpop.f32.mrb[41].mxu1 }
 0x3cc   :  { %2487 = vst.msk [vmem:[%s6861_s3 + $0x40] sm:$0xff] %vm99_vm1, %v2200_v36 }
 0x3d6   :  { %v3581_v54 = vpop.f32.mrb[42].mxu1 }
 0x3d7   :  { %2490 = vst.msk [vmem:[%s6861_s3 + $0x58] sm:$0xff] %vm99_vm1, %v3581_v54  ;;  %v2210_v31 = vpop.f32.mrb[43].mxu1 }
 0x3d8   :  { %2489 = vst.msk [vmem:[%s6861_s3 + $0x50] sm:$0xff] %vm99_vm1, %v2210_v31 }
 0x3d9   :  { %4380 = shalt.err (!%p4377_p4)
}
 0x3da   :  { %s4381_s11 = scalar_lea.hbm %s6863_s5, 8192 }
 0x3db   :  { %p4382_p5 = scmp.ne.s32.totalorder %s6863_s5, %s4381_s11  ;;  %p4385_p6 = scmp.lt.u32.totalorder %s4381_s11, %s6863_s5 }
 0x3dd   :  { %p4387_p7 = pnand %p4385_p6, %p4382_p5 }
 0x3df   :  { %4390 = shalt.err (!%p4387_p7)
}
 0x3e0   :  { %s4394_s16 = smov 128   ;;  %s4395_s17 = smov 8  }
 0x3e1   :  { %3071 = dma.vmem_to_hbm [thread:$0]  %s3066_s30, 8192, %s6863_s5, [#allocation3], %s4394_s16, %s4394_s16, %s4395_s17  }
 0x3e2   :  { %v3584_v39 = vpop.f32.mrb[44].mxu1 }
 0x3e3   :  { %2492 = vst.msk [vmem:[%s6861_s3 + $0x68] sm:$0xff] %vm99_vm1, %v3584_v39  ;;  %v2220_v50 = vpop.f32.mrb[45].mxu1 }
 0x3e4   :  { %2491 = vst.msk [vmem:[%s6861_s3 + $0x60] sm:$0xff] %vm99_vm1, %v2220_v50 }
 0x3ea   :  { %v3587_v18 = vpop.f32.mrb[46].mxu1 }
 0x3eb   :  { %2494 = vst.msk [vmem:[%s6861_s3 + $0x78] sm:$0xff] %vm99_vm1, %v3587_v18  ;;  %v2230_v49 = vpop.f32.mrb[47].mxu1 }
 0x3ec   :  { %2493 = vst.msk [vmem:[%s6861_s3 + $0x70] sm:$0xff] %vm99_vm1, %v2230_v49 }
 0x3f2   :  { %v3590_v62 = vpop.f32.mrb[48].mxu1 }
 0x3f3   :  { %2496 = vst.msk [vmem:[%s6861_s3 + $0x88] sm:$0xff] %vm99_vm1, %v3590_v62  ;;  %v2240_v20 = vpop.f32.mrb[49].mxu1 }
 0x3f4   :  { %2495 = vst.msk [vmem:[%s6861_s3 + $0x80] sm:$0xff] %vm99_vm1, %v2240_v20 }
 0x3fb   :  { %v3593_v8 = vpop.f32.mrb[50].mxu1 }
 0x3fc   :  { %2498 = vst.msk [vmem:[%s6861_s3 + $0x98] sm:$0xff] %vm99_vm1, %v3593_v8  ;;  %v2250_v12 = vpop.f32.mrb[51].mxu1 }
 0x3fd   :  { %2497 = vst.msk [vmem:[%s6861_s3 + $0x90] sm:$0xff] %vm99_vm1, %v2250_v12 }
 0x3ff   :  { %v3596_v25 = vpop.f32.mrb[52].mxu1 }
 0x400   :  { %2500 = vst.msk [vmem:[%s6861_s3 + $0xa8] sm:$0xff] %vm99_vm1, %v3596_v25  ;;  %v2260_v42 = vpop.f32.mrb[53].mxu1 }
 0x401   :  { %2499 = vst.msk [vmem:[%s6861_s3 + $0xa0] sm:$0xff] %vm99_vm1, %v2260_v42 }
 0x403   :  { %v3599_v59 = vpop.f32.mrb[54].mxu1 }
 0x404   :  { %2502 = vst.msk [vmem:[%s6861_s3 + $0xb8] sm:$0xff] %vm99_vm1, %v3599_v59  ;;  %v2270_v27 = vpop.f32.mrb[55].mxu1 }
 0x405   :  { %2501 = vst.msk [vmem:[%s6861_s3 + $0xb0] sm:$0xff] %vm99_vm1, %v2270_v27 }
 0x409   :  { %v3602_v53 = vpop.f32.mrb[56].mxu1 }
 0x40a   :  { %2504 = vst.msk [vmem:[%s6861_s3 + $0xc8] sm:$0xff] %vm99_vm1, %v3602_v53  ;;  %v2280_v1 = vpop.f32.mrb[57].mxu1 }
 0x40b   :  { %2503 = vst.msk [vmem:[%s6861_s3 + $0xc0] sm:$0xff] %vm99_vm1, %v2280_v1 }
 0x40d   :  { %v3605_v43 = vpop.f32.mrb[58].mxu1 }
 0x40e   :  { %2506 = vst.msk [vmem:[%s6861_s3 + $0xd8] sm:$0xff] %vm99_vm1, %v3605_v43  ;;  %v2290_v22 = vpop.f32.mrb[59].mxu1 }
 0x40f   :  { %2505 = vst.msk [vmem:[%s6861_s3 + $0xd0] sm:$0xff] %vm99_vm1, %v2290_v22 }
 0x411   :  { %v3608_v0 = vpop.f32.mrb[60].mxu1 }
 0x412   :  { %2508 = vst.msk [vmem:[%s6861_s3 + $0xe8] sm:$0xff] %vm99_vm1, %v3608_v0  ;;  %v2300_v29 = vpop.f32.mrb[61].mxu1 }
 0x413   :  { %2507 = vst.msk [vmem:[%s6861_s3 + $0xe0] sm:$0xff] %vm99_vm1, %v2300_v29 }
 0x415   :  { %v3611_v35 = vpop.f32.mrb[62].mxu1 }
 0x416   :  { %2510 = vst.msk [vmem:[%s6861_s3 + $0xf8] sm:$0xff] %vm99_vm1, %v3611_v35  ;;  %v2310_v51 = vpop.f32.mrb[63].mxu1 }
 0x417   :  { %2509 = vst.msk [vmem:[%s6861_s3 + $0xf0] sm:$0xff] %vm99_vm1, %v2310_v51 }
 0x419   :  { %v3614_v47 = vpop.f32.mrb[64].mxu1 }
 0x41a   :  { %2512 = vst.msk [vmem:[%s6861_s3 + $0x108] sm:$0xff] %vm99_vm1, %v3614_v47  ;;  %v2320_v4 = vpop.f32.mrb[65].mxu1 }
 0x41b   :  { %2511 = vst.msk [vmem:[%s6861_s3 + $0x100] sm:$0xff] %vm99_vm1, %v2320_v4 }
 0x41d   :  { %v3617_v34 = vpop.f32.mrb[66].mxu1 }
 0x41e   :  { %2514 = vst.msk [vmem:[%s6861_s3 + $0x118] sm:$0xff] %vm99_vm1, %v3617_v34  ;;  %v2330_v6 = vpop.f32.mrb[67].mxu1 }
 0x41f   :  { %2513 = vst.msk [vmem:[%s6861_s3 + $0x110] sm:$0xff] %vm99_vm1, %v2330_v6 }
 0x421   :  { %v3620_v16 = vpop.f32.mrb[68].mxu1 }
 0x422   :  { %2516 = vst.msk [vmem:[%s6861_s3 + $0x128] sm:$0xff] %vm99_vm1, %v3620_v16  ;;  %v2340_v46 = vpop.f32.mrb[69].mxu1 }
 0x423   :  { %2515 = vst.msk [vmem:[%s6861_s3 + $0x120] sm:$0xff] %vm99_vm1, %v2340_v46 }
 0x425   :  { %v3623_v14 = vpop.f32.mrb[70].mxu1 }
 0x426   :  { %2518 = vst.msk [vmem:[%s6861_s3 + $0x138] sm:$0xff] %vm99_vm1, %v3623_v14  ;;  %v2350_v61 = vpop.f32.mrb[71].mxu1 }
 0x427   :  { %2517 = vst.msk [vmem:[%s6861_s3 + $0x130] sm:$0xff] %vm99_vm1, %v2350_v61 }
 0x429   :  { %v3626_v17 = vpop.f32.mrb[72].mxu1 }
 0x42a   :  { %2520 = vst.msk [vmem:[%s6861_s3 + $0x148] sm:$0xff] %vm99_vm1, %v3626_v17  ;;  %v2360_v40 = vpop.f32.mrb[73].mxu1 }
 0x42b   :  { %2519 = vst.msk [vmem:[%s6861_s3 + $0x140] sm:$0xff] %vm99_vm1, %v2360_v40 }
 0x42d   :  { %v3629_v5 = vpop.f32.mrb[74].mxu1 }
 0x42e   :  { %2522 = vst.msk [vmem:[%s6861_s3 + $0x158] sm:$0xff] %vm99_vm1, %v3629_v5  ;;  %v2370_v15 = vpop.f32.mrb[75].mxu1 }
 0x42f   :  { %2521 = vst.msk [vmem:[%s6861_s3 + $0x150] sm:$0xff] %vm99_vm1, %v2370_v15 }
 0x431   :  { %v3632_v13 = vpop.f32.mrb[76].mxu1 }
 0x432   :  { %2524 = vst.msk [vmem:[%s6861_s3 + $0x168] sm:$0xff] %vm99_vm1, %v3632_v13  ;;  %v2380_v44 = vpop.f32.mrb[77].mxu1 }
 0x433   :  { %2523 = vst.msk [vmem:[%s6861_s3 + $0x160] sm:$0xff] %vm99_vm1, %v2380_v44 }
 0x435   :  { %v3635_v58 = vpop.f32.mrb[78].mxu1 }
 0x436   :  { %2526 = vst.msk [vmem:[%s6861_s3 + $0x178] sm:$0xff] %vm99_vm1, %v3635_v58  ;;  %v2390_v38 = vpop.f32.mrb[79].mxu1 }
 0x437   :  { %2525 = vst.msk [vmem:[%s6861_s3 + $0x170] sm:$0xff] %vm99_vm1, %v2390_v38 }
 0x439   :  { %v3638_v63 = vpop.f32.mrb[80].mxu1 }
 0x43a   :  { %2528 = vst.msk [vmem:[%s6861_s3 + $0x188] sm:$0xff] %vm99_vm1, %v3638_v63  ;;  %v2400_v7 = vpop.f32.mrb[81].mxu1 }
 0x43b   :  { %2527 = vst.msk [vmem:[%s6861_s3 + $0x180] sm:$0xff] %vm99_vm1, %v2400_v7 }
 0x43d   :  { %v3641_v2 = vpop.f32.mrb[82].mxu1 }
 0x43e   :  { %2530 = vst.msk [vmem:[%s6861_s3 + $0x198] sm:$0xff] %vm99_vm1, %v3641_v2  ;;  %v2410_v30 = vpop.f32.mrb[83].mxu1 }
 0x43f   :  { %2529 = vst.msk [vmem:[%s6861_s3 + $0x190] sm:$0xff] %vm99_vm1, %v2410_v30 }
 0x441   :  { %v3644_v60 = vpop.f32.mrb[84].mxu1 }
 0x442   :  { %2532 = vst.msk [vmem:[%s6861_s3 + $0x1a8] sm:$0xff] %vm99_vm1, %v3644_v60  ;;  %v2420_v45 = vpop.f32.mrb[85].mxu1 }
 0x443   :  { %2531 = vst.msk [vmem:[%s6861_s3 + $0x1a0] sm:$0xff] %vm99_vm1, %v2420_v45 }
 0x445   :  { %v3647_v11 = vpop.f32.mrb[86].mxu1 }
 0x446   :  { %2534 = vst.msk [vmem:[%s6861_s3 + $0x1b8] sm:$0xff] %vm99_vm1, %v3647_v11  ;;  %v2430_v48 = vpop.f32.mrb[87].mxu1 }
 0x447   :  { %2533 = vst.msk [vmem:[%s6861_s3 + $0x1b0] sm:$0xff] %vm99_vm1, %v2430_v48 }
 0x449   :  { %v3650_v33 = vpop.f32.mrb[88].mxu1 }
 0x44a   :  { %2536 = vst.msk [vmem:[%s6861_s3 + $0x1c8] sm:$0xff] %vm99_vm1, %v3650_v33  ;;  %v2440_v57 = vpop.f32.mrb[89].mxu1 }
 0x44b   :  { %2535 = vst.msk [vmem:[%s6861_s3 + $0x1c0] sm:$0xff] %vm99_vm1, %v2440_v57 }
 0x44d   :  { %v3653_v56 = vpop.f32.mrb[90].mxu1 }
 0x44e   :  { %2538 = vst.msk [vmem:[%s6861_s3 + $0x1d8] sm:$0xff] %vm99_vm1, %v3653_v56  ;;  %v2450_v21 = vpop.f32.mrb[91].mxu1 }
 0x44f   :  { %2537 = vst.msk [vmem:[%s6861_s3 + $0x1d0] sm:$0xff] %vm99_vm1, %v2450_v21 }
 0x451   :  { %v3656_v24 = vpop.f32.mrb[92].mxu1 }
 0x452   :  { %2540 = vst.msk [vmem:[%s6861_s3 + $0x1e8] sm:$0xff] %vm99_vm1, %v3656_v24  ;;  %v2460_v28 = vpop.f32.mrb[93].mxu1 }
 0x453   :  { %2539 = vst.msk [vmem:[%s6861_s3 + $0x1e0] sm:$0xff] %vm99_vm1, %v2460_v28 }
 0x455   :  { %v3659_v9 = vpop.f32.mrb[94].mxu1 }
 0x456   :  { %2542 = vst.msk [vmem:[%s6861_s3 + $0x1f8] sm:$0xff] %vm99_vm1, %v3659_v9  ;;  %v2470_v41 = vpop.f32.mrb[95].mxu1 }
 0x457   :  { %2541 = vst.msk [vmem:[%s6861_s3 + $0x1f0] sm:$0xff] %vm99_vm1, %v2470_v41 }
 0x458   :  { %4391 = dma.done.wait [#allocation3], 8192  }
 0x459   :  { %4392 = vsyncadd [#allocation3], 4294959104 }
 0x45a   :  { %3079 = vsyncpa [#allocation3], 1 }

</bundles_post_ra>
